<compile_context>
chip_gen: v6e
topology: v6e:2x2x1
jax: 0.10.0
libtpu: 0.0.40
codegen_flags: <defaults>
</compile_context>

<pallas_src>
import functools

import jax
import jax.numpy as jnp
from jax.experimental import pallas as pl
from jax.experimental.pallas import tpu as pltpu

BN_EPS = 1e-5
CPAD = 128                      # lane-padded channel width for conv / fc outputs
N_OUT = 6                       # fc3 true output width
C1_OUT, C2_OUT, C3_OUT = 64, 32, 16   # true conv output channels (module spec)


def _round_up(x, m):
    return ((x + m - 1) // m) * m


# -----------------------------------------------------------------------------
# Pallas kernels
# -----------------------------------------------------------------------------
def conv_bn_relu_kernel(p_ref, w_ref, g_ref, b_ref, o_ref, *, inv_m):
    """One fused conv stage: im2col GEMM + train-mode BN + ReLU, all in VMEM.

    p_ref : (Mpad, K)    bf16 im2col patches (rows >= M_true are exact zeros)
    w_ref : (K, 128)     bf16 conv weight, K ordered (kh, kw, C_in_true),
                         C_out zero-padded to 128 lanes
    g_ref : (1, 128)     f32 BN gamma (padded channels are 0)
    b_ref : (1, 128)     f32 BN beta
    o_ref : (Mpad, 128)  bf16 post-BN/ReLU activation

    Conv bias is dropped: train-mode BN subtracts the per-channel mean, which
    cancels any additive per-channel bias exactly.  Zero-padded M rows
    contribute 0 to both statistics, so dividing by the *true* M is exact.
    """
    y = jnp.dot(p_ref[...], w_ref[...], preferred_element_type=jnp.float32)
    mean = jnp.sum(y, axis=0, keepdims=True) * inv_m
    # NOTE: single-pass E[x^2]-E[x]^2 in f32; adequate for synthetic weights.
    # Use a shifted two-pass variance if pre-BN outputs develop a large mean.
    var = jnp.maximum(jnp.sum(y * y, axis=0, keepdims=True) * inv_m
                      - mean * mean, 0.0)
    scale = g_ref[...] * jax.lax.rsqrt(var + BN_EPS)
    shift = b_ref[...] - mean * scale
    o_ref[...] = jnp.maximum(y * scale + shift, 0.0).astype(o_ref.dtype)


def conv3_mlp_kernel(p_ref, w_ref, g_ref, b_ref,
                     fw1_ref, fb1_ref, fw2_ref, fb2_ref, fw3_ref, fb3_ref,
                     o_ref, *, inv_m, n_spatial, batch):
    """conv3 + BN + ReLU fused with fc1->ReLU->fc2->ReLU->fc3 (all lane-dense).

    conv3 patch rows are ordered (spatial position p, batch b), so PyTorch's
    (C, H, W) flatten feeding fc1 becomes a sum over p of (B,128)x(128,128)
    matmuls against per-position fc1 weight slabs -> no in-kernel relayout.
    """
    y = jnp.dot(p_ref[...], w_ref[...], preferred_element_type=jnp.float32)
    mean = jnp.sum(y, axis=0, keepdims=True) * inv_m
    var = jnp.maximum(jnp.sum(y * y, axis=0, keepdims=True) * inv_m
                      - mean * mean, 0.0)
    scale = g_ref[...] * jax.lax.rsqrt(var + BN_EPS)
    shift = b_ref[...] - mean * scale
    a = jnp.maximum(y * scale + shift, 0.0)            # f32 (Mpad, 128)

    h = jnp.zeros((batch, CPAD), jnp.float32)
    for p in range(n_spatial):                         # static, fully unrolled
        h = h + jnp.dot(a[p * batch:(p + 1) * batch, :].astype(jnp.bfloat16),
                        fw1_ref[p], preferred_element_type=jnp.float32)
    h = jnp.maximum(h + fb1_ref[...], 0.0)
    h = jnp.dot(h.astype(jnp.bfloat16), fw2_ref[...],
                preferred_element_type=jnp.float32)
    h = jnp.maximum(h + fb2_ref[...], 0.0)
    o_ref[...] = (jnp.dot(h.astype(jnp.bfloat16), fw3_ref[...],
                          preferred_element_type=jnp.float32) + fb3_ref[...])


# -----------------------------------------------------------------------------
# pallas_call wrappers
# -----------------------------------------------------------------------------
def _vmem_spec():
    return pl.BlockSpec(memory_space=pltpu.MemorySpace.VMEM)


def conv_bn_relu(patches, w_mat, gamma, beta, m_true):
    mp, _ = patches.shape
    n = w_mat.shape[1]
    # Un-gridded: the whole stage (<2 MB) fits VMEM at small batch on every
    # generation (v5e/v6e 128 MiB, v7x 64 MiB).
    # TODO(synk): for large batch, grid over M (>=2 "parallel" steps so v7x's
    # second TensorCore has work) with the BN stats reduced in a VMEM scratch.
    return pl.pallas_call(
        functools.partial(conv_bn_relu_kernel, inv_m=1.0 / float(m_true)),
        out_shape=jax.ShapeDtypeStruct((mp, n), jnp.bfloat16),
        in_specs=[_vmem_spec()] * 4,
        out_specs=_vmem_spec(),
    )(patches, w_mat, gamma, beta)


# -----------------------------------------------------------------------------
# Glue (NHWC im2col, stage wrappers) in plain JAX
# -----------------------------------------------------------------------------
def im2col_nhwc(x, kh, kw, stride, pad):
    """x: (B, H, W, C) -> patches (B, Ho, Wo, kh*kw*C), K ordered (kh, kw, C).

    # TODO(synk): patch construction still goes through XLA/HBM between the 3
    # pallas_calls; fusing the shifted-window gather into the stage kernel
    # (in-kernel strided slices / manual DMA over the NHWC input) would cut
    # patch traffic to ~1x of the activation and allow a single-call forward.
    """
    b, h, w, c = x.shape
    xp = jnp.pad(x, ((0, 0), (pad, pad), (pad, pad), (0, 0)))
    ho = (h + 2 * pad - kh) // stride + 1
    wo = (w + 2 * pad - kw) // stride + 1
    cols = []
    for i in range(kh):
        for j in range(kw):
            cols.append(xp[:, i:i + stride * ho:stride,
                           j:j + stride * wo:stride, :])
    patches = jnp.stack(cols, axis=3)                  # (B, Ho, Wo, kh*kw, C)
    return patches.reshape(b, ho, wo, kh * kw * c), ho, wo


def conv_stage(x_nhwc, w_mat, gamma, beta, kh, kw, stride, pad):
    """Fused conv+BN+ReLU; NHWC (true channels) in, NHWC 128-channel bf16 out."""
    b = x_nhwc.shape[0]
    patches, ho, wo = im2col_nhwc(x_nhwc, kh, kw, stride, pad)
    k = patches.shape[-1]
    m = b * ho * wo
    mp = _round_up(m, 8)                               # sublane granule only
    p2 = patches.reshape(m, k)
    p2 = jnp.pad(p2, ((0, mp - m), (0, 0))).astype(jnp.bfloat16)
    out = conv_bn_relu(p2, w_mat, gamma, beta, m)      # stats over true M
    return out[:m].reshape(b, ho, wo, CPAD)


def conv3_mlp_stage(x_nhwc, params, kh, kw, stride, pad):
    """conv3 + BN + ReLU + the full MLP head in one pallas_call."""
    b = x_nhwc.shape[0]
    patches, ho, wo = im2col_nhwc(x_nhwc, kh, kw, stride, pad)
    k = patches.shape[-1]
    n_sp = ho * wo
    m = b * n_sp
    mp = _round_up(m, 8)
    # (p, b) row order so the kernel can take a contiguous (B, 128) slice per
    # conv3 spatial position when applying fc1.
    p2 = patches.transpose(1, 2, 0, 3).reshape(m, k)
    p2 = jnp.pad(p2, ((0, mp - m), (0, 0))).astype(jnp.bfloat16)
    out = pl.pallas_call(
        functools.partial(conv3_mlp_kernel, inv_m=1.0 / float(m),
                          n_spatial=n_sp, batch=b),
        out_shape=jax.ShapeDtypeStruct((b, CPAD), jnp.float32),
        in_specs=[_vmem_spec()] * 10,
        out_specs=_vmem_spec(),
    )(p2, params["w3"], params["g3"], params["be3"],
      params["fw1"], params["fb1"], params["fw2"], params["fb2"],
      params["fw3"], params["fb3"])
    return out[:, :N_OUT]


@jax.jit
def attention_network_coord_forward(x, params):
    """Forward pass of AttentionNetworkCoord(add_se_blocks=False)."""
    # TODO(synk): add_se_blocks=True path (SELayer squeeze-excite) not implemented.
    h = x.transpose(0, 2, 3, 1).astype(jnp.bfloat16)   # NCHW -> NHWC, once
    h = conv_stage(h, params["w1"], params["g1"], params["be1"], 5, 5, 2, 1)
    h = conv_stage(h[..., :C1_OUT], params["w2"], params["g2"], params["be2"],
                   7, 7, 2, 1)
    return conv3_mlp_stage(h[..., :C2_OUT], params, 5, 5, 2, 1)


# -----------------------------------------------------------------------------
# Parameters: synthetic (PyTorch-native layouts) + one-time GEMM-ready prep
# -----------------------------------------------------------------------------
def make_params(key, flattened):
    ks = jax.random.split(key, 12)
    f32 = jnp.float32

    def nrm(k, shape, scale=0.05):
        return (scale * jax.random.normal(k, shape)).astype(f32)

    return {
        # conv1: 5 -> 64, k=5 ; conv2: 64 -> 32, k=7 ; conv3: 32 -> 16, k=5
        "w1": nrm(ks[0], (64, 5, 5, 5)), "b1": nrm(ks[1], (64,)),
        "g1": jnp.ones((64,), f32), "be1": jnp.zeros((64,), f32),
        "w2": nrm(ks[2], (32, 64, 7, 7)), "b2": nrm(ks[3], (32,)),
        "g2": jnp.ones((32,), f32), "be2": jnp.zeros((32,), f32),
        "w3": nrm(ks[4], (16, 32, 5, 5)), "b3": nrm(ks[5], (16,)),
        "g3": jnp.ones((16,), f32), "be3": jnp.zeros((16,), f32),
        # fc weights stored (in, out) == PyTorch weight.T; fc1 rows in (C,H,W) order
        "fw1": nrm(ks[6], (flattened, 64)), "fb1": nrm(ks[7], (1, 64)),
        "fw2": nrm(ks[8], (64, 64)), "fb2": nrm(ks[9], (1, 64)),
        "fw3": nrm(ks[10], (64, 6)), "fb3": nrm(ks[11], (1, 6)),
    }


def prepare_params(p, h3, w3):
    """One-time GEMM-ready layouts (hoisted out of the forward path).

    - conv weights -> (kh*kw*C_in_true, 128) bf16, K ordered (kh, kw, C) to
      match NHWC im2col patches; C_out zero-padded to 128 lanes, C_in NOT padded.
    - conv biases (p['b*']) are intentionally dropped: train-mode BN cancels them.
    - fc1 rearranged from PyTorch (C, H, W) flatten order into one (128, 128)
      slab per conv3 spatial position (zero rows/cols for padding).
    - fc2/fc3 weights and all fc biases zero-padded to 128 lanes.
    """
    f32, bf16 = jnp.float32, jnp.bfloat16

    def conv_w(w):
        c_out, c_in, kh, kw = w.shape
        wt = jnp.transpose(w, (2, 3, 1, 0))            # (kh, kw, C_in, C_out)
        wt = jnp.pad(wt, ((0, 0), (0, 0), (0, 0), (0, CPAD - c_out)))
        return wt.reshape(kh * kw * c_in, CPAD).astype(bf16)

    def bn_vec(v):
        return jnp.pad(v.reshape(1, -1),
                       ((0, 0), (0, CPAD - v.shape[0]))).astype(f32)

    def fc_pad(w, b):
        wp = jnp.pad(w, ((0, CPAD - w.shape[0]), (0, CPAD - w.shape[1]))).astype(bf16)
        bp = jnp.pad(b, ((0, 0), (0, CPAD - b.shape[1]))).astype(f32)
        return wp, bp

    c3 = p["w3"].shape[0]
    n_fc1 = p["fw1"].shape[1]
    # fc1: rows in (C, H, W) order -> (H3*W3, CPAD, CPAD) per-position slabs
    fw1 = p["fw1"].reshape(c3, h3, w3, n_fc1).transpose(1, 2, 0, 3)  # (H3,W3,C3,64)
    fw1 = fw1.reshape(h3 * w3, c3, n_fc1)
    fw1 = jnp.pad(fw1, ((0, 0), (0, CPAD - c3), (0, CPAD - n_fc1))).astype(bf16)
    fb1 = jnp.pad(p["fb1"], ((0, 0), (0, CPAD - p["fb1"].shape[1]))).astype(f32)
    fw2, fb2 = fc_pad(p["fw2"], p["fb2"])
    fw3, fb3 = fc_pad(p["fw3"], p["fb3"])

    return {
        "w1": conv_w(p["w1"]), "g1": bn_vec(p["g1"]), "be1": bn_vec(p["be1"]),
        "w2": conv_w(p["w2"]), "g2": bn_vec(p["g2"]), "be2": bn_vec(p["be2"]),
        "w3": conv_w(p["w3"]), "g3": bn_vec(p["g3"]), "be3": bn_vec(p["be3"]),
        "fw1": fw1, "fb1": fb1, "fw2": fw2, "fb2": fb2, "fw3": fw3, "fb3": fb3,
    }


if __name__ == "__main__":
    # Small input: batch=2, channels=5 (RGB + 2 coord channels), 32x32 spatial.
    # Conv chain: 32 -> 15 -> 6 -> 2  =>  flattened = 16 * 2 * 2 = 64.
    B, C, H, W = 2, 5, 32, 32
    H3 = W3 = 2
    flattened = C3_OUT * H3 * W3

    key = jax.random.PRNGKey(0)
    k_x, k_p = jax.random.split(key)
    x = jax.random.uniform(k_x, (B, C, H, W), dtype=jnp.float32)
    raw = make_params(k_p, flattened)
    params = prepare_params(raw, H3, W3)   # weight layout prep hoisted out of forward

    out = attention_network_coord_forward(x, params)
    out = jax.block_until_ready(out)
    assert out.shape == (B, 6), out.shape
    assert out.dtype == jnp.float32
    print("KERNEL_OK")
</pallas_src>

<mosaic_0001>
module attributes {stable_mosaic.version = 11 : i64} {
  func.func @conv_bn_relu_kernel(%arg0: memref<456x125xbf16, #tpu.memory_space<vmem>>, %arg1: memref<125x128xbf16, #tpu.memory_space<vmem>>, %arg2: memref<1x128xf32, #tpu.memory_space<vmem>>, %arg3: memref<1x128xf32, #tpu.memory_space<vmem>>, %arg4: memref<456x128xbf16, #tpu.memory_space<vmem>>) attributes {dimension_semantics = [], scalar_prefetch = 0 : i64, scratch_operands = 0 : i64, tpu.core_type = #tpu.core_type<tc>} {
    %c0 = arith.constant 0 : index
    %c0_0 = arith.constant 0 : index
    %0 = vector.load %arg0[%c0, %c0_0] : memref<456x125xbf16, #tpu.memory_space<vmem>>, vector<456x125xbf16>
    %c0_1 = arith.constant 0 : index
    %c0_2 = arith.constant 0 : index
    %1 = vector.load %arg1[%c0_1, %c0_2] : memref<125x128xbf16, #tpu.memory_space<vmem>>, vector<125x128xbf16>
    %cst = arith.constant dense<0.000000e+00> : vector<456x128xf32>
    %2 = tpu.matmul %0, %1, %cst {dimension_numbers = #tpu.dot_dimension_numbers<[1], [0], [0], [1], [0, 0, 1, 1], [], []>} : vector<456x125xbf16>, vector<125x128xbf16>, vector<456x128xf32> -> vector<456x128xf32>
    %cst_3 = arith.constant dense<0.000000e+00> : vector<128xf32>
    %3 = vector.multi_reduction <add>, %2, %cst_3 [0] : vector<456x128xf32> to vector<128xf32>
    %4 = vector.shape_cast %3 : vector<128xf32> to vector<1x128xf32>
    %cst_4 = arith.constant 0.00222222228 : f32
    %5 = vector.broadcast %cst_4 : f32 to vector<1x128xf32>
    %6 = arith.mulf %4, %5 : vector<1x128xf32>
    %7 = arith.mulf %2, %2 : vector<456x128xf32>
    %cst_5 = arith.constant dense<0.000000e+00> : vector<128xf32>
    %8 = vector.multi_reduction <add>, %7, %cst_5 [0] : vector<456x128xf32> to vector<128xf32>
    %9 = vector.shape_cast %8 : vector<128xf32> to vector<1x128xf32>
    %cst_6 = arith.constant 0.00222222228 : f32
    %10 = vector.broadcast %cst_6 : f32 to vector<1x128xf32>
    %11 = arith.mulf %9, %10 : vector<1x128xf32>
    %12 = arith.mulf %6, %6 : vector<1x128xf32>
    %13 = arith.subf %11, %12 : vector<1x128xf32>
    %cst_7 = arith.constant 0.000000e+00 : f32
    %14 = vector.broadcast %cst_7 : f32 to vector<1x128xf32>
    %15 = arith.maximumf %13, %14 : vector<1x128xf32>
    %c0_8 = arith.constant 0 : index
    %c0_9 = arith.constant 0 : index
    %16 = vector.load %arg2[%c0_8, %c0_9] : memref<1x128xf32, #tpu.memory_space<vmem>>, vector<1x128xf32>
    %cst_10 = arith.constant 9.99999974E-6 : f32
    %17 = vector.broadcast %cst_10 : f32 to vector<1x128xf32>
    %18 = arith.addf %15, %17 : vector<1x128xf32>
    %19 = math.rsqrt %18 : vector<1x128xf32>
    %20 = arith.mulf %16, %19 : vector<1x128xf32>
    %c0_11 = arith.constant 0 : index
    %c0_12 = arith.constant 0 : index
    %21 = vector.load %arg3[%c0_11, %c0_12] : memref<1x128xf32, #tpu.memory_space<vmem>>, vector<1x128xf32>
    %22 = arith.mulf %6, %20 : vector<1x128xf32>
    %23 = arith.subf %21, %22 : vector<1x128xf32>
    %24 = vector.broadcast %20 : vector<1x128xf32> to vector<456x128xf32>
    %25 = arith.mulf %2, %24 : vector<456x128xf32>
    %26 = vector.broadcast %23 : vector<1x128xf32> to vector<456x128xf32>
    %27 = arith.addf %25, %26 : vector<456x128xf32>
    %cst_13 = arith.constant 0.000000e+00 : f32
    %28 = vector.broadcast %cst_13 : f32 to vector<456x128xf32>
    %29 = arith.maximumf %27, %28 : vector<456x128xf32>
    %30 = arith.truncf %29 : vector<456x128xf32> to vector<456x128xbf16>
    %c0_14 = arith.constant 0 : index
    %c0_15 = arith.constant 0 : index
    %31 = vector.load %arg4[%c0_14, %c0_15] : memref<456x128xbf16, #tpu.memory_space<vmem>>, vector<456x128xbf16>
    tpu.vector_store %arg4[%c0_14, %c0_15], %30 {strides = array<i32>} : memref<456x128xbf16, #tpu.memory_space<vmem>>, vector<456x128xbf16>,
    return
  }
}

module attributes {stable_mosaic.version = 11 : i64} {
  func.func @conv_bn_relu_kernel(%arg0: memref<72x3136xbf16, #tpu.memory_space<vmem>>, %arg1: memref<3136x128xbf16, #tpu.memory_space<vmem>>, %arg2: memref<1x128xf32, #tpu.memory_space<vmem>>, %arg3: memref<1x128xf32, #tpu.memory_space<vmem>>, %arg4: memref<72x128xbf16, #tpu.memory_space<vmem>>) attributes {dimension_semantics = [], scalar_prefetch = 0 : i64, scratch_operands = 0 : i64, tpu.core_type = #tpu.core_type<tc>} {
    %c0 = arith.constant 0 : index
    %c0_0 = arith.constant 0 : index
    %0 = vector.load %arg0[%c0, %c0_0] : memref<72x3136xbf16, #tpu.memory_space<vmem>>, vector<72x3136xbf16>
    %c0_1 = arith.constant 0 : index
    %c0_2 = arith.constant 0 : index
    %1 = vector.load %arg1[%c0_1, %c0_2] : memref<3136x128xbf16, #tpu.memory_space<vmem>>, vector<3136x128xbf16>
    %cst = arith.constant dense<0.000000e+00> : vector<72x128xf32>
    %2 = tpu.matmul %0, %1, %cst {dimension_numbers = #tpu.dot_dimension_numbers<[1], [0], [0], [1], [0, 0, 1, 1], [], []>} : vector<72x3136xbf16>, vector<3136x128xbf16>, vector<72x128xf32> -> vector<72x128xf32>
    %cst_3 = arith.constant dense<0.000000e+00> : vector<128xf32>
    %3 = vector.multi_reduction <add>, %2, %cst_3 [0] : vector<72x128xf32> to vector<128xf32>
    %4 = vector.shape_cast %3 : vector<128xf32> to vector<1x128xf32>
    %cst_4 = arith.constant 0.013888889 : f32
    %5 = vector.broadcast %cst_4 : f32 to vector<1x128xf32>
    %6 = arith.mulf %4, %5 : vector<1x128xf32>
    %7 = arith.mulf %2, %2 : vector<72x128xf32>
    %cst_5 = arith.constant dense<0.000000e+00> : vector<128xf32>
    %8 = vector.multi_reduction <add>, %7, %cst_5 [0] : vector<72x128xf32> to vector<128xf32>
    %9 = vector.shape_cast %8 : vector<128xf32> to vector<1x128xf32>
    %cst_6 = arith.constant 0.013888889 : f32
    %10 = vector.broadcast %cst_6 : f32 to vector<1x128xf32>
    %11 = arith.mulf %9, %10 : vector<1x128xf32>
    %12 = arith.mulf %6, %6 : vector<1x128xf32>
    %13 = arith.subf %11, %12 : vector<1x128xf32>
    %cst_7 = arith.constant 0.000000e+00 : f32
    %14 = vector.broadcast %cst_7 : f32 to vector<1x128xf32>
    %15 = arith.maximumf %13, %14 : vector<1x128xf32>
    %c0_8 = arith.constant 0 : index
    %c0_9 = arith.constant 0 : index
    %16 = vector.load %arg2[%c0_8, %c0_9] : memref<1x128xf32, #tpu.memory_space<vmem>>, vector<1x128xf32>
    %cst_10 = arith.constant 9.99999974E-6 : f32
    %17 = vector.broadcast %cst_10 : f32 to vector<1x128xf32>
    %18 = arith.addf %15, %17 : vector<1x128xf32>
    %19 = math.rsqrt %18 : vector<1x128xf32>
    %20 = arith.mulf %16, %19 : vector<1x128xf32>
    %c0_11 = arith.constant 0 : index
    %c0_12 = arith.constant 0 : index
    %21 = vector.load %arg3[%c0_11, %c0_12] : memref<1x128xf32, #tpu.memory_space<vmem>>, vector<1x128xf32>
    %22 = arith.mulf %6, %20 : vector<1x128xf32>
    %23 = arith.subf %21, %22 : vector<1x128xf32>
    %24 = vector.broadcast %20 : vector<1x128xf32> to vector<72x128xf32>
    %25 = arith.mulf %2, %24 : vector<72x128xf32>
    %26 = vector.broadcast %23 : vector<1x128xf32> to vector<72x128xf32>
    %27 = arith.addf %25, %26 : vector<72x128xf32>
    %cst_13 = arith.constant 0.000000e+00 : f32
    %28 = vector.broadcast %cst_13 : f32 to vector<72x128xf32>
    %29 = arith.maximumf %27, %28 : vector<72x128xf32>
    %30 = arith.truncf %29 : vector<72x128xf32> to vector<72x128xbf16>
    %c0_14 = arith.constant 0 : index
    %c0_15 = arith.constant 0 : index
    %31 = vector.load %arg4[%c0_14, %c0_15] : memref<72x128xbf16, #tpu.memory_space<vmem>>, vector<72x128xbf16>
    tpu.vector_store %arg4[%c0_14, %c0_15], %30 {strides = array<i32>} : memref<72x128xbf16, #tpu.memory_space<vmem>>, vector<72x128xbf16>,
    return
  }
}

module attributes {stable_mosaic.version = 11 : i64} {
  func.func @conv3_mlp_kernel(%arg0: memref<8x800xbf16, #tpu.memory_space<vmem>>, %arg1: memref<800x128xbf16, #tpu.memory_space<vmem>>, %arg2: memref<1x128xf32, #tpu.memory_space<vmem>>, %arg3: memref<1x128xf32, #tpu.memory_space<vmem>>, %arg4: memref<4x128x128xbf16, #tpu.memory_space<vmem>>, %arg5: memref<1x128xf32, #tpu.memory_space<vmem>>, %arg6: memref<128x128xbf16, #tpu.memory_space<vmem>>, %arg7: memref<1x128xf32, #tpu.memory_space<vmem>>, %arg8: memref<128x128xbf16, #tpu.memory_space<vmem>>, %arg9: memref<1x128xf32, #tpu.memory_space<vmem>>, %arg10: memref<2x128xf32, #tpu.memory_space<vmem>>) attributes {dimension_semantics = [], scalar_prefetch = 0 : i64, scratch_operands = 0 : i64, tpu.core_type = #tpu.core_type<tc>} {
    %c0 = arith.constant 0 : index
    %c0_0 = arith.constant 0 : index
    %0 = vector.load %arg0[%c0, %c0_0] : memref<8x800xbf16, #tpu.memory_space<vmem>>, vector<8x800xbf16>
    %c0_1 = arith.constant 0 : index
    %c0_2 = arith.constant 0 : index
    %1 = vector.load %arg1[%c0_1, %c0_2] : memref<800x128xbf16, #tpu.memory_space<vmem>>, vector<800x128xbf16>
    %cst = arith.constant dense<0.000000e+00> : vector<8x128xf32>
    %2 = tpu.matmul %0, %1, %cst {dimension_numbers = #tpu.dot_dimension_numbers<[1], [0], [0], [1], [0, 0, 1, 1], [], []>} : vector<8x800xbf16>, vector<800x128xbf16>, vector<8x128xf32> -> vector<8x128xf32>
    %cst_3 = arith.constant dense<0.000000e+00> : vector<128xf32>
    %3 = vector.multi_reduction <add>, %2, %cst_3 [0] : vector<8x128xf32> to vector<128xf32>
    %4 = vector.shape_cast %3 : vector<128xf32> to vector<1x128xf32>
    %cst_4 = arith.constant 1.250000e-01 : f32
    %5 = vector.broadcast %cst_4 : f32 to vector<1x128xf32>
    %6 = arith.mulf %4, %5 : vector<1x128xf32>
    %7 = arith.mulf %2, %2 : vector<8x128xf32>
    %cst_5 = arith.constant dense<0.000000e+00> : vector<128xf32>
    %8 = vector.multi_reduction <add>, %7, %cst_5 [0] : vector<8x128xf32> to vector<128xf32>
    %9 = vector.shape_cast %8 : vector<128xf32> to vector<1x128xf32>
    %cst_6 = arith.constant 1.250000e-01 : f32
    %10 = vector.broadcast %cst_6 : f32 to vector<1x128xf32>
    %11 = arith.mulf %9, %10 : vector<1x128xf32>
    %12 = arith.mulf %6, %6 : vector<1x128xf32>
    %13 = arith.subf %11, %12 : vector<1x128xf32>
    %cst_7 = arith.constant 0.000000e+00 : f32
    %14 = vector.broadcast %cst_7 : f32 to vector<1x128xf32>
    %15 = arith.maximumf %13, %14 : vector<1x128xf32>
    %c0_8 = arith.constant 0 : index
    %c0_9 = arith.constant 0 : index
    %16 = vector.load %arg2[%c0_8, %c0_9] : memref<1x128xf32, #tpu.memory_space<vmem>>, vector<1x128xf32>
    %cst_10 = arith.constant 9.99999974E-6 : f32
    %17 = vector.broadcast %cst_10 : f32 to vector<1x128xf32>
    %18 = arith.addf %15, %17 : vector<1x128xf32>
    %19 = math.rsqrt %18 : vector<1x128xf32>
    %20 = arith.mulf %16, %19 : vector<1x128xf32>
    %c0_11 = arith.constant 0 : index
    %c0_12 = arith.constant 0 : index
    %21 = vector.load %arg3[%c0_11, %c0_12] : memref<1x128xf32, #tpu.memory_space<vmem>>, vector<1x128xf32>
    %22 = arith.mulf %6, %20 : vector<1x128xf32>
    %23 = arith.subf %21, %22 : vector<1x128xf32>
    %24 = vector.broadcast %20 : vector<1x128xf32> to vector<8x128xf32>
    %25 = arith.mulf %2, %24 : vector<8x128xf32>
    %26 = vector.broadcast %23 : vector<1x128xf32> to vector<8x128xf32>
    %27 = arith.addf %25, %26 : vector<8x128xf32>
    %cst_13 = arith.constant 0.000000e+00 : f32
    %28 = vector.broadcast %cst_13 : f32 to vector<8x128xf32>
    %29 = arith.maximumf %27, %28 : vector<8x128xf32>
    %cst_14 = arith.constant 0.000000e+00 : f32
    %30 = vector.broadcast %cst_14 : f32 to vector<2x128xf32>
    %31 = vector.extract_strided_slice %29 {offsets = [0, 0], sizes = [2, 128], strides = [1, 1]} : vector<8x128xf32> to vector<2x128xf32>
    %32 = arith.truncf %31 : vector<2x128xf32> to vector<2x128xbf16>
    %c0_15 = arith.constant 0 : index
    %c0_16 = arith.constant 0 : index
    %c0_17 = arith.constant 0 : index
    %33 = vector.load %arg4[%c0_15, %c0_16, %c0_17] : memref<4x128x128xbf16, #tpu.memory_space<vmem>>, vector<1x128x128xbf16>
    %34 = vector.shape_cast %33 : vector<1x128x128xbf16> to vector<128x128xbf16>
    %cst_18 = arith.constant dense<0.000000e+00> : vector<2x128xf32>
    %35 = tpu.matmul %32, %34, %cst_18 {dimension_numbers = #tpu.dot_dimension_numbers<[1], [0], [0], [1], [0, 0, 1, 1], [], []>} : vector<2x128xbf16>, vector<128x128xbf16>, vector<2x128xf32> -> vector<2x128xf32>
    %36 = arith.addf %30, %35 : vector<2x128xf32>
    %37 = vector.extract_strided_slice %29 {offsets = [2, 0], sizes = [2, 128], strides = [1, 1]} : vector<8x128xf32> to vector<2x128xf32>
    %38 = arith.truncf %37 : vector<2x128xf32> to vector<2x128xbf16>
    %c1 = arith.constant 1 : index
    %c0_19 = arith.constant 0 : index
    %c0_20 = arith.constant 0 : index
    %39 = vector.load %arg4[%c1, %c0_19, %c0_20] : memref<4x128x128xbf16, #tpu.memory_space<vmem>>, vector<1x128x128xbf16>
    %40 = vector.shape_cast %39 : vector<1x128x128xbf16> to vector<128x128xbf16>
    %cst_21 = arith.constant dense<0.000000e+00> : vector<2x128xf32>
    %41 = tpu.matmul %38, %40, %cst_21 {dimension_numbers = #tpu.dot_dimension_numbers<[1], [0], [0], [1], [0, 0, 1, 1], [], []>} : vector<2x128xbf16>, vector<128x128xbf16>, vector<2x128xf32> -> vector<2x128xf32>
    %42 = arith.addf %36, %41 : vector<2x128xf32>
    %43 = vector.extract_strided_slice %29 {offsets = [4, 0], sizes = [2, 128], strides = [1, 1]} : vector<8x128xf32> to vector<2x128xf32>
    %44 = arith.truncf %43 : vector<2x128xf32> to vector<2x128xbf16>
    %c2 = arith.constant 2 : index
    %c0_22 = arith.constant 0 : index
    %c0_23 = arith.constant 0 : index
    %45 = vector.load %arg4[%c2, %c0_22, %c0_23] : memref<4x128x128xbf16, #tpu.memory_space<vmem>>, vector<1x128x128xbf16>
    %46 = vector.shape_cast %45 : vector<1x128x128xbf16> to vector<128x128xbf16>
    %cst_24 = arith.constant dense<0.000000e+00> : vector<2x128xf32>
    %47 = tpu.matmul %44, %46, %cst_24 {dimension_numbers = #tpu.dot_dimension_numbers<[1], [0], [0], [1], [0, 0, 1, 1], [], []>} : vector<2x128xbf16>, vector<128x128xbf16>, vector<2x128xf32> -> vector<2x128xf32>
    %48 = arith.addf %42, %47 : vector<2x128xf32>
    %49 = vector.extract_strided_slice %29 {offsets = [6, 0], sizes = [2, 128], strides = [1, 1]} : vector<8x128xf32> to vector<2x128xf32>
    %50 = arith.truncf %49 : vector<2x128xf32> to vector<2x128xbf16>
    %c3 = arith.constant 3 : index
    %c0_25 = arith.constant 0 : index
    %c0_26 = arith.constant 0 : index
    %51 = vector.load %arg4[%c3, %c0_25, %c0_26] : memref<4x128x128xbf16, #tpu.memory_space<vmem>>, vector<1x128x128xbf16>
    %52 = vector.shape_cast %51 : vector<1x128x128xbf16> to vector<128x128xbf16>
    %cst_27 = arith.constant dense<0.000000e+00> : vector<2x128xf32>
    %53 = tpu.matmul %50, %52, %cst_27 {dimension_numbers = #tpu.dot_dimension_numbers<[1], [0], [0], [1], [0, 0, 1, 1], [], []>} : vector<2x128xbf16>, vector<128x128xbf16>, vector<2x128xf32> -> vector<2x128xf32>
    %54 = arith.addf %48, %53 : vector<2x128xf32>
    %c0_28 = arith.constant 0 : index
    %c0_29 = arith.constant 0 : index
    %55 = vector.load %arg5[%c0_28, %c0_29] : memref<1x128xf32, #tpu.memory_space<vmem>>, vector<1x128xf32>
    %56 = vector.broadcast %55 : vector<1x128xf32> to vector<2x128xf32>
    %57 = arith.addf %54, %56 : vector<2x128xf32>
    %cst_30 = arith.constant 0.000000e+00 : f32
    %58 = vector.broadcast %cst_30 : f32 to vector<2x128xf32>
    %59 = arith.maximumf %57, %58 : vector<2x128xf32>
    %60 = arith.truncf %59 : vector<2x128xf32> to vector<2x128xbf16>
    %c0_31 = arith.constant 0 : index
    %c0_32 = arith.constant 0 : index
    %61 = vector.load %arg6[%c0_31, %c0_32] : memref<128x128xbf16, #tpu.memory_space<vmem>>, vector<128x128xbf16>
    %cst_33 = arith.constant dense<0.000000e+00> : vector<2x128xf32>
    %62 = tpu.matmul %60, %61, %cst_33 {dimension_numbers = #tpu.dot_dimension_numbers<[1], [0], [0], [1], [0, 0, 1, 1], [], []>} : vector<2x128xbf16>, vector<128x128xbf16>, vector<2x128xf32> -> vector<2x128xf32>
    %c0_34 = arith.constant 0 : index
    %c0_35 = arith.constant 0 : index
    %63 = vector.load %arg7[%c0_34, %c0_35] : memref<1x128xf32, #tpu.memory_space<vmem>>, vector<1x128xf32>
    %64 = vector.broadcast %63 : vector<1x128xf32> to vector<2x128xf32>
    %65 = arith.addf %62, %64 : vector<2x128xf32>
    %cst_36 = arith.constant 0.000000e+00 : f32
    %66 = vector.broadcast %cst_36 : f32 to vector<2x128xf32>
    %67 = arith.maximumf %65, %66 : vector<2x128xf32>
    %68 = arith.truncf %67 : vector<2x128xf32> to vector<2x128xbf16>
    %c0_37 = arith.constant 0 : index
    %c0_38 = arith.constant 0 : index
    %69 = vector.load %arg8[%c0_37, %c0_38] : memref<128x128xbf16, #tpu.memory_space<vmem>>, vector<128x128xbf16>
    %cst_39 = arith.constant dense<0.000000e+00> : vector<2x128xf32>
    %70 = tpu.matmul %68, %69, %cst_39 {dimension_numbers = #tpu.dot_dimension_numbers<[1], [0], [0], [1], [0, 0, 1, 1], [], []>} : vector<2x128xbf16>, vector<128x128xbf16>, vector<2x128xf32> -> vector<2x128xf32>
    %c0_40 = arith.constant 0 : index
    %c0_41 = arith.constant 0 : index
    %71 = vector.load %arg9[%c0_40, %c0_41] : memref<1x128xf32, #tpu.memory_space<vmem>>, vector<1x128xf32>
    %72 = vector.broadcast %71 : vector<1x128xf32> to vector<2x128xf32>
    %73 = arith.addf %70, %72 : vector<2x128xf32>
    %c0_42 = arith.constant 0 : index
    %c0_43 = arith.constant 0 : index
    %74 = vector.load %arg10[%c0_42, %c0_43] : memref<2x128xf32, #tpu.memory_space<vmem>>, vector<2x128xf32>
    tpu.vector_store %arg10[%c0_42, %c0_43], %73 {strides = array<i32>} : memref<2x128xf32, #tpu.memory_space<vmem>>, vector<2x128xf32>,
    return
  }
}

</mosaic_0001>

<bundles_post_ra>
// kernel: attention_network_coord_forward.3
= control target key start
LH: loop header
LB: loop body
LE: loop exit
PB: predicated region body
PF: predicated region fallthrough
CT: control target
= control target key end

     0   :  { %vm369_vm0 = vcmask 1045504   ;;  %vm370_vm1 = vcmask 1046528   ;;  %v1880_v0 = vmov 0.0   ;;  %v1881_v2 = vmov 65535   ;;  %s2731_s1 = inlined_call_operand.vmem [shape: bf16[125,128], index: 1, kind: input, shape index: {}]   ;;  %s2732_s0 = inlined_call_operand.vmem [shape: bf16[456,125], index: 0, kind: input, shape index: {}]   ;;  %s2733_s2 = inlined_call_operand.vmem [shape: f32[1,128], index: 2, kind: input, shape index: {}]   ;;  %s2734_s3 = inlined_call_operand.vmem [shape: f32[1,128], index: 3, kind: input, shape index: {}]   ;;  %s2735_s4 = inlined_call_operand.vmem [shape: bf16[456,128], index: 4, kind: output, shape index: {}]  }
   0x1   :  { %1690 = vmatprep.subr.bf16.mxu0 %v1880_v0  ;;  %v1841_v1 = vld [vmem:[%s2731_s1 + $0x38] sm:$0x7f]   ;;  %1822 = vmatprep.subr.bf16.mxu1 %v1880_v0  ;;  %v371_v3 = vsel %vm369_vm0, 4294967295, %v1881_v2  ;;  %vm1882_vm2 = vmmov 0   ;;  %v1842_v6 = vld [vmem:[%s2731_s1 + $0x30] sm:$0xff]   ;;  %v1843_v7 = vld [vmem:[%s2731_s1 + $0x28] sm:$0xff]  }
   0x2   :  { %v372_v4 = vsel %vm370_vm1, %v371_v3, 0  ;;  %1706 = vmatprep.mubr.msk.bf16.mxu0 %vm1882_vm2, %v1880_v0  ;;  %1766 = vmatprep.mubr.msk.bf16.mxu1 %vm1882_vm2, %v1880_v0  ;;  %v1844_v8 = vld [vmem:[%s2731_s1 + $0x20] sm:$0xff]   ;;  %v1845_v9 = vld [vmem:[%s2731_s1 + $0x18] sm:$0xff]   ;;  %v1846_v10 = vld [vmem:[%s2731_s1 + $0x10] sm:$0xff]   ;;  %vm281_vm3 = vcmask 1022976  }
   0x3   :  { %v374_v5 = vand.u32 %v1841_v1, %v372_v4  ;;  %v1847_v11 = vld [vmem:[%s2731_s1 + $0x8] sm:$0xff]   ;;  %v1848_v12 = vld [vmem:[%s2731_s1] sm:$0xff]   ;;  %v1857_v14 = vld [vmem:[%s2732_s0 + $0x78] sm:$0xff]  }
   0x4   :  { %v1849_v13 = vld [vmem:[%s2732_s0] sm:$0xff]   ;;  %v1850_v15 = vld [vmem:[%s2732_s0 + $0x8] sm:$0xff]   ;;  %v1851_v17 = vld [vmem:[%s2732_s0 + $0x10] sm:$0xff]  }
   0x5   :  { %1691 = vmatpush3.bf16.msra.mxu0 %v374_v5  ;;  %1830 = vmatpush3.bf16.msra.mxu1 %v374_v5  ;;  %v1859_v16 = vld [vmem:[%s2732_s0 + $0x80] sm:$0xff]   ;;  %v1861_v18 = vld [vmem:[%s2732_s0 + $0x88] sm:$0xff]   ;;  %v1852_v19 = vld [vmem:[%s2732_s0 + $0x18] sm:$0xff]  }
   0x6   :  { %1692 = vmatprep.subr.bf16.mxu0 %v1880_v0  ;;  %1823 = vmatprep.subr.bf16.mxu1 %v1880_v0  ;;  %v1863_v20 = vld [vmem:[%s2732_s0 + $0x90] sm:$0xff]   ;;  %v1853_v21 = vld [vmem:[%s2732_s0 + $0x20] sm:$0xff]   ;;  %v1865_v22 = vld [vmem:[%s2732_s0 + $0x98] sm:$0xff]  }
   0x7   :  { %v1854_v23 = vld [vmem:[%s2732_s0 + $0x28] sm:$0xff]   ;;  %v1867_v24 = vld [vmem:[%s2732_s0 + $0xa0] sm:$0xff]   ;;  %v1855_v25 = vld [vmem:[%s2732_s0 + $0x30] sm:$0xff]  }
   0x8   :  { %v1869_v26 = vld [vmem:[%s2732_s0 + $0xa8] sm:$0xff]   ;;  %v1856_v27 = vld [vmem:[%s2732_s0 + $0x38] sm:$0xff]   ;;  %v1871_v28 = vld [vmem:[%s2732_s0 + $0xb0] sm:$0xff]  }
   0x9   :  { %1693 = vmatpush3.bf16.msra.mxu0 %v1842_v6  ;;  %1831 = vmatpush3.bf16.msra.mxu1 %v1842_v6  ;;  %v1858_v29 = vld [vmem:[%s2732_s0 + $0x40] sm:$0xff]   ;;  %v1872_v30 = vld [vmem:[%s2732_s0 + $0xb8] sm:$0xff]   ;;  %v1860_v31 = vld [vmem:[%s2732_s0 + $0x48] sm:$0xff]  }
   0xa   :  { %1694 = vmatprep.subr.bf16.mxu0 %v1880_v0  ;;  %1824 = vmatprep.subr.bf16.mxu1 %v1880_v0  ;;  %v1873_v32 = vld [vmem:[%s2732_s0 + $0xc0] sm:$0xff]   ;;  %v1862_v33 = vld [vmem:[%s2732_s0 + $0x50] sm:$0xff]   ;;  %v1874_v34 = vld [vmem:[%s2732_s0 + $0xc8] sm:$0xff]  }
   0xb   :  { %v1864_v35 = vld [vmem:[%s2732_s0 + $0x58] sm:$0xff]   ;;  %v1875_v36 = vld [vmem:[%s2732_s0 + $0xd0] sm:$0xff]   ;;  %v1866_v37 = vld [vmem:[%s2732_s0 + $0x60] sm:$0xff]  }
   0xc   :  { %v1876_v38 = vld [vmem:[%s2732_s0 + $0xd8] sm:$0xff]   ;;  %v1868_v39 = vld [vmem:[%s2732_s0 + $0x68] sm:$0xff]   ;;  %v1877_v40 = vld [vmem:[%s2732_s0 + $0xe0] ss:$0 sps:$4 sm:$0xff]  }
   0xd   :  { %1695 = vmatpush3.bf16.msra.mxu0 %v1843_v7  ;;  %1832 = vmatpush3.bf16.msra.mxu1 %v1843_v7  ;;  %v1870_v41 = vld [vmem:[%s2732_s0 + $0x70] sm:$0xff]  }
   0xe   :  { %1696 = vmatprep.subr.bf16.mxu0 %v1880_v0  ;;  %1825 = vmatprep.subr.bf16.mxu1 %v1880_v0 }
  0x11   :  { %1697 = vmatpush3.bf16.msra.mxu0 %v1844_v8  ;;  %1833 = vmatpush3.bf16.msra.mxu1 %v1844_v8 }
  0x12   :  { %1698 = vmatprep.subr.bf16.mxu0 %v1880_v0  ;;  %1826 = vmatprep.subr.bf16.mxu1 %v1880_v0 }
  0x15   :  { %1699 = vmatpush3.bf16.msra.mxu0 %v1845_v9  ;;  %1834 = vmatpush3.bf16.msra.mxu1 %v1845_v9 }
  0x16   :  { %1700 = vmatprep.subr.bf16.mxu0 %v1880_v0  ;;  %1827 = vmatprep.subr.bf16.mxu1 %v1880_v0 }
  0x19   :  { %1701 = vmatpush3.bf16.msra.mxu0 %v1846_v10  ;;  %1835 = vmatpush3.bf16.msra.mxu1 %v1846_v10 }
  0x1a   :  { %1702 = vmatprep.subr.bf16.mxu0 %v1880_v0  ;;  %1828 = vmatprep.subr.bf16.mxu1 %v1880_v0 }
  0x1d   :  { %1703 = vmatpush3.bf16.msra.mxu0 %v1847_v11  ;;  %1836 = vmatpush3.bf16.msra.mxu1 %v1847_v11 }
  0x1e   :  { %1704 = vmatprep.subr.bf16.mxu0 %v1880_v0  ;;  %1829 = vmatprep.subr.bf16.mxu1 %v1880_v0 }
  0x21   :  { %1705 = vmatpush3.bf16.msra.mxu0 %v1848_v12  ;;  %1837 = vmatpush3.bf16.msra.mxu1 %v1848_v12 }
  0x24   :  { %1707 = vmatmul.mubr.msk.bf16.vlgmr.msra.gmra.mxu0 %vm281_vm3, %v1849_v13  ;;  %1767 = vmatmul.mubr.msk.bf16.vlgmr.msra.gmra.mxu1 %vm281_vm3, %v1857_v14 }
  0x25   :  { %1710 = vmatprep.mubr.msk.bf16.mxu0 %vm1882_vm2, %v1880_v0  ;;  %1770 = vmatprep.mubr.msk.bf16.mxu1 %vm1882_vm2, %v1880_v0 }
  0x2c   :  { %1711 = vmatmul.mubr.msk.bf16.gmra.mxu0 %vm281_vm3, %v1850_v15  ;;  %1771 = vmatmul.mubr.msk.bf16.gmra.mxu1 %vm281_vm3, %v1859_v16 }
  0x2d   :  { %1714 = vmatprep.mubr.msk.bf16.mxu0 %vm1882_vm2, %v1880_v0  ;;  %1774 = vmatprep.mubr.msk.bf16.mxu1 %vm1882_vm2, %v1880_v0 }
  0x34   :  { %1715 = vmatmul.mubr.msk.bf16.gmra.mxu0 %vm281_vm3, %v1851_v17  ;;  %1775 = vmatmul.mubr.msk.bf16.gmra.mxu1 %vm281_vm3, %v1861_v18 }
  0x35   :  { %1718 = vmatprep.mubr.msk.bf16.mxu0 %vm1882_vm2, %v1880_v0  ;;  %1778 = vmatprep.mubr.msk.bf16.mxu1 %vm1882_vm2, %v1880_v0 }
  0x3c   :  { %1719 = vmatmul.mubr.msk.bf16.gmra.mxu0 %vm281_vm3, %v1852_v19  ;;  %1779 = vmatmul.mubr.msk.bf16.gmra.mxu1 %vm281_vm3, %v1863_v20 }
  0x3d   :  { %1722 = vmatprep.mubr.msk.bf16.mxu0 %vm1882_vm2, %v1880_v0  ;;  %1782 = vmatprep.mubr.msk.bf16.mxu1 %vm1882_vm2, %v1880_v0 }
  0x44   :  { %1723 = vmatmul.mubr.msk.bf16.gmra.mxu0 %vm281_vm3, %v1853_v21  ;;  %1783 = vmatmul.mubr.msk.bf16.gmra.mxu1 %vm281_vm3, %v1865_v22 }
  0x45   :  { %1726 = vmatprep.mubr.msk.bf16.mxu0 %vm1882_vm2, %v1880_v0  ;;  %1786 = vmatprep.mubr.msk.bf16.mxu1 %vm1882_vm2, %v1880_v0 }
  0x4c   :  { %1727 = vmatmul.mubr.msk.bf16.gmra.mxu0 %vm281_vm3, %v1854_v23  ;;  %1787 = vmatmul.mubr.msk.bf16.gmra.mxu1 %vm281_vm3, %v1867_v24 }
  0x4d   :  { %1730 = vmatprep.mubr.msk.bf16.mxu0 %vm1882_vm2, %v1880_v0  ;;  %1790 = vmatprep.mubr.msk.bf16.mxu1 %vm1882_vm2, %v1880_v0 }
  0x54   :  { %1731 = vmatmul.mubr.msk.bf16.gmra.mxu0 %vm281_vm3, %v1855_v25  ;;  %1791 = vmatmul.mubr.msk.bf16.gmra.mxu1 %vm281_vm3, %v1869_v26 }
  0x55   :  { %1734 = vmatprep.mubr.msk.bf16.mxu0 %vm1882_vm2, %v1880_v0  ;;  %1794 = vmatprep.mubr.msk.bf16.mxu1 %vm1882_vm2, %v1880_v0 }
  0x5c   :  { %1735 = vmatmul.mubr.msk.bf16.gmra.mxu0 %vm281_vm3, %v1856_v27  ;;  %1795 = vmatmul.mubr.msk.bf16.gmra.mxu1 %vm281_vm3, %v1871_v28 }
  0x5d   :  { %1738 = vmatprep.mubr.msk.bf16.mxu0 %vm1882_vm2, %v1880_v0  ;;  %1798 = vmatprep.mubr.msk.bf16.mxu1 %vm1882_vm2, %v1880_v0 }
  0x64   :  { %1739 = vmatmul.mubr.msk.bf16.gmra.mxu0 %vm281_vm3, %v1858_v29  ;;  %1799 = vmatmul.mubr.msk.bf16.gmra.mxu1 %vm281_vm3, %v1872_v30 }
  0x65   :  { %1742 = vmatprep.mubr.msk.bf16.mxu0 %vm1882_vm2, %v1880_v0  ;;  %1802 = vmatprep.mubr.msk.bf16.mxu1 %vm1882_vm2, %v1880_v0 }
  0x6c   :  { %1743 = vmatmul.mubr.msk.bf16.gmra.mxu0 %vm281_vm3, %v1860_v31  ;;  %1803 = vmatmul.mubr.msk.bf16.gmra.mxu1 %vm281_vm3, %v1873_v32 }
  0x6d   :  { %1746 = vmatprep.mubr.msk.bf16.mxu0 %vm1882_vm2, %v1880_v0  ;;  %1806 = vmatprep.mubr.msk.bf16.mxu1 %vm1882_vm2, %v1880_v0 }
  0x74   :  { %1747 = vmatmul.mubr.msk.bf16.gmra.mxu0 %vm281_vm3, %v1862_v33  ;;  %1807 = vmatmul.mubr.msk.bf16.gmra.mxu1 %vm281_vm3, %v1874_v34 }
  0x75   :  { %1750 = vmatprep.mubr.msk.bf16.mxu0 %vm1882_vm2, %v1880_v0  ;;  %1810 = vmatprep.mubr.msk.bf16.mxu1 %vm1882_vm2, %v1880_v0 }
  0x7c   :  { %1751 = vmatmul.mubr.msk.bf16.gmra.mxu0 %vm281_vm3, %v1864_v35  ;;  %1811 = vmatmul.mubr.msk.bf16.gmra.mxu1 %vm281_vm3, %v1875_v36 }
  0x7d   :  { %1754 = vmatprep.mubr.msk.bf16.mxu0 %vm1882_vm2, %v1880_v0  ;;  %1814 = vmatprep.mubr.msk.bf16.mxu1 %vm1882_vm2, %v1880_v0 }
  0x84   :  { %1755 = vmatmul.mubr.msk.bf16.gmra.mxu0 %vm281_vm3, %v1866_v37  ;;  %1815 = vmatmul.mubr.msk.bf16.gmra.mxu1 %vm281_vm3, %v1876_v38 }
  0x85   :  { %1758 = vmatprep.mubr.msk.bf16.mxu0 %vm1882_vm2, %v1880_v0  ;;  %1818 = vmatprep.mubr.msk.bf16.mxu1 %vm1882_vm2, %v1880_v0 }
  0x8c   :  { %1759 = vmatmul.mubr.msk.bf16.gmra.mxu0 %vm281_vm3, %v1868_v39  ;;  %1819 = vmatmul.mubr.msk.bf16.gmra.mxu1 %vm281_vm3, %v1877_v40 }
  0x8d   :  { %1762 = vmatprep.mubr.msk.bf16.mxu0 %vm1882_vm2, %v1880_v0 }
  0x94   :  { %1763 = vmatmul.mubr.msk.bf16.gmra.mxu0 %vm281_vm3, %v1870_v41 }
  0xe4   :  { %v2122_v42 = vpop.f32.mrf.mxu0  ;;  %v2124_v43 = vpop.f32.mrf.mxu1 }
  0xe5   :  { %v703_v41 = vmul.f32 %v2122_v42, %v2122_v42 }
  0xe6   :  { %v1708_v44 = vpop.f32.mrf.mxu0  ;;  %v1768_v45 = vpop.f32.mrf.mxu1 }
  0xe8   :  { %v2126_v46 = vpop.f32.mrf.mxu0  ;;  %v2128_v47 = vpop.f32.mrf.mxu1 }
  0xe9   :  { %v704_v38 = vmul.f32 %v2126_v46, %v2126_v46  ;;  %v640_v44 = vadd.f32 %v2126_v46, %v2122_v42 }
  0xea   :  { %v1709_v48 = vpop.f32.mrf.mxu0  ;;  %v1769_v49 = vpop.f32.mrf.mxu1 }
  0xec   :  { %v2130_v50 = vpop.f32.mrf.mxu0  ;;  %v2132_v51 = vpop.f32.mrf.mxu1 }
  0xed   :  { %v705_v45 = vmul.f32 %v2130_v50, %v2130_v50 }
  0xee   :  { %v1712_v52 = vpop.f32.mrf.mxu0  ;;  %v1772_v53 = vpop.f32.mrf.mxu1 }
  0xef   :  { %v760_v52 = vadd.f32 %v704_v38, %v703_v41  ;;  %v641_v53 = vadd.f32 %v640_v44, %v2130_v50 }
  0xf0   :  { %v2134_v54 = vpop.f32.mrf.mxu0  ;;  %v2136_v55 = vpop.f32.mrf.mxu1 }
  0xf2   :  { %v1713_v56 = vpop.f32.mrf.mxu0  ;;  %v1773_v57 = vpop.f32.mrf.mxu1 }
  0xf3   :  { %v706_v56 = vmul.f32 %v2134_v54, %v2134_v54 }
  0xf4   :  { %v2138_v58 = vpop.f32.mrf.mxu0  ;;  %v2140_v59 = vpop.f32.mrf.mxu1 }
  0xf6   :  { %v1716_v60 = vpop.f32.mrf.mxu0  ;;  %v1776_v61 = vpop.f32.mrf.mxu1 }
  0xf7   :  { %v761_v61 = vadd.f32 %v760_v52, %v705_v45 }
  0xf8   :  { %v2142_v62 = vpop.f32.mrf.mxu0  ;;  %v2144_v63 = vpop.f32.mrf.mxu1 }
  0xfa   :  { %v1717_v0 = vpop.f32.mrf.mxu0  ;;  %v1777_v1 = vpop.f32.mrf.mxu1 }
  0xfb   :  { %v642_v0 = vadd.f32 %v641_v53, %v2134_v54  ;;  %v707_v1 = vmul.f32 %v2138_v58, %v2138_v58 }
  0xfc   :  { %v2146_v2 = vpop.f32.mrf.mxu0  ;;  %v2148_v3 = vpop.f32.mrf.mxu1 }
  0xfe   :  { %v1720_v4 = vpop.f32.mrf.mxu0  ;;  %v1780_v5 = vpop.f32.mrf.mxu1 }
 0x100   :  { %v2150_v6 = vpop.f32.mrf.mxu0  ;;  %v2152_v7 = vpop.f32.mrf.mxu1 }
 0x102   :  { %v1721_v8 = vpop.f32.mrf.mxu0  ;;  %v1781_v9 = vpop.f32.mrf.mxu1 }
 0x103   :  { %v762_v8 = vadd.f32 %v761_v61, %v706_v56  ;;  %v643_v9 = vadd.f32 %v642_v0, %v2138_v58 }
 0x104   :  { %v2154_v10 = vpop.f32.mrf.mxu0  ;;  %v2156_v11 = vpop.f32.mrf.mxu1 }
 0x105   :  { %v711_v41 = vmul.f32 %v2154_v10, %v2154_v10 }
 0x106   :  { %v1724_v12 = vpop.f32.mrf.mxu0  ;;  %v1784_v13 = vpop.f32.mrf.mxu1 }
 0x107   :  { %v708_v12 = vmul.f32 %v2142_v62, %v2142_v62 }
 0x108   :  { %v2158_v14 = vpop.f32.mrf.mxu0  ;;  %v2160_v15 = vpop.f32.mrf.mxu1 }
 0x109   :  { %v712_v52 = vmul.f32 %v2158_v14, %v2158_v14 }
 0x10a   :  { %v1725_v16 = vpop.f32.mrf.mxu0  ;;  %v1785_v17 = vpop.f32.mrf.mxu1 }
 0x10b   :  { %v763_v17 = vadd.f32 %v762_v8, %v707_v1 }
 0x10c   :  { %v2162_v18 = vpop.f32.mrf.mxu0  ;;  %v2164_v19 = vpop.f32.mrf.mxu1 }
 0x10d   :  { %v713_v1 = vmul.f32 %v2162_v18, %v2162_v18 }
 0x10e   :  { %v1728_v20 = vpop.f32.mrf.mxu0  ;;  %v1788_v21 = vpop.f32.mrf.mxu1 }
 0x10f   :  { %v644_v20 = vadd.f32 %v643_v9, %v2142_v62  ;;  %v709_v21 = vmul.f32 %v2146_v2, %v2146_v2 }
 0x110   :  { %v2166_v22 = vpop.f32.mrf.mxu0  ;;  %v2168_v23 = vpop.f32.mrf.mxu1 }
 0x112   :  { %v1729_v24 = vpop.f32.mrf.mxu0  ;;  %v1789_v25 = vpop.f32.mrf.mxu1 }
 0x114   :  { %v2170_v26 = vpop.f32.mrf.mxu0  ;;  %v2172_v27 = vpop.f32.mrf.mxu1 }
 0x116   :  { %v1732_v28 = vpop.f32.mrf.mxu0  ;;  %v1792_v29 = vpop.f32.mrf.mxu1 }
 0x117   :  { %v764_v28 = vadd.f32 %v763_v17, %v708_v12  ;;  %v645_v29 = vadd.f32 %v644_v20, %v2146_v2  ;;  %v714_v12 = vmul.f32 %v2166_v22, %v2166_v22 }
 0x118   :  { %v2174_v30 = vpop.f32.mrf.mxu0  ;;  %v2176_v31 = vpop.f32.mrf.mxu1 }
 0x119   :  { %v646_v38 = vadd.f32 %v645_v29, %v2150_v6 }
 0x11a   :  { %v1733_v32 = vpop.f32.mrf.mxu0  ;;  %v1793_v33 = vpop.f32.mrf.mxu1 }
 0x11b   :  { %v710_v32 = vmul.f32 %v2150_v6, %v2150_v6 }
 0x11c   :  { %v2178_v34 = vpop.f32.mrf.mxu0  ;;  %v2180_v35 = vpop.f32.mrf.mxu1 }
 0x11e   :  { %v1736_v36 = vpop.f32.mrf.mxu0  ;;  %v1796_v37 = vpop.f32.mrf.mxu1 }
 0x11f   :  { %v765_v37 = vadd.f32 %v764_v28, %v709_v21 }
 0x120   :  { %v2184_v39 = vpop.f32.mrf.mxu0  ;;  %v2186_v40 = vpop.f32.mrf.mxu1 }
 0x122   :  { %v1737_v48 = vpop.f32.mrf.mxu0  ;;  %v1797_v49 = vpop.f32.mrf.mxu1 }
 0x123   :  { %v766_v48 = vadd.f32 %v765_v37, %v710_v32  ;;  %v647_v49 = vadd.f32 %v646_v38, %v2154_v10  ;;  %v716_v38 = vmul.f32 %v2174_v30, %v2174_v30 }
 0x124   :  { %v2197_v57 = vpop.f32.mrf.mxu0  ;;  %v2199_v60 = vpop.f32.mrf.mxu1 }
 0x125   :  { %v767_v61 = vadd.f32 %v766_v48, %v711_v41  ;;  %v648_v0 = vadd.f32 %v647_v49, %v2158_v14  ;;  %v717_v49 = vmul.f32 %v2178_v34, %v2178_v34 }
 0x126   :  { %v1740_v4 = vpop.f32.mrf.mxu0  ;;  %v1800_v5 = vpop.f32.mrf.mxu1 }
 0x127   :  { %v768_v8 = vadd.f32 %v767_v61, %v712_v52  ;;  %v649_v9 = vadd.f32 %v648_v0, %v2162_v18 }
 0x128   :  { %v2207_v13 = vpop.f32.mrf.mxu0  ;;  %v2209_v16 = vpop.f32.mrf.mxu1 }
 0x129   :  { %2753 = vst [vmem:[#allocation2_spill] sm:$0xff] %v2207_v13  ;;  %v769_v21 = vadd.f32 %v768_v8, %v713_v1 }
 0x12a   :  { %v1741_v24 = vpop.f32.mrf.mxu0  ;;  %v1801_v25 = vpop.f32.mrf.mxu1 }
 0x12b   :  { %v650_v24 = vadd.f32 %v649_v9, %v2166_v22  ;;  %v715_v25 = vmul.f32 %v2170_v26, %v2170_v26  ;;  %v770_v32 = vadd.f32 %v769_v21, %v714_v12  ;;  %v719_v21 = vmul.f32 %v2197_v57, %v2197_v57 }
 0x12c   :  { %v2217_v33 = vpop.f32.mrf.mxu0  ;;  %v2219_v36 = vpop.f32.mrf.mxu1 }
 0x12d   :  { %2754 = vst [vmem:[#allocation3_spill] sm:$0xff] %v2217_v33  ;;  %2755 = vst [vmem:[#allocation4_spill] sm:$0xff] %v2219_v36  ;;  %v651_v37 = vadd.f32 %v650_v24, %v2170_v26 }
 0x12e   :  { %v1744_v44 = vpop.f32.mrf.mxu0  ;;  %v1804_v45 = vpop.f32.mrf.mxu1 }
 0x12f   :  { %v771_v45 = vadd.f32 %v770_v32, %v715_v25  ;;  %v652_v48 = vadd.f32 %v651_v37, %v2174_v30  ;;  %v720_v32 = vmul.f32 %v2207_v13, %v2207_v13 }
 0x130   :  { %v2227_v53 = vpop.f32.mrf.mxu0  ;;  %v2229_v56 = vpop.f32.mrf.mxu1 }
 0x131   :  { %2756 = vst [vmem:[#allocation5_spill] sm:$0xff] %v2227_v53  ;;  %2757 = vst [vmem:[#allocation6_spill] sm:$0xff] %v2229_v56  ;;  %v772_v0 = vadd.f32 %v771_v45, %v716_v38  ;;  %v653_v1 = vadd.f32 %v652_v48, %v2178_v34 }
 0x132   :  { %v1745_v4 = vpop.f32.mrf.mxu0  ;;  %v1805_v5 = vpop.f32.mrf.mxu1 }
 0x133   :  { %v718_v4 = vmul.f32 %v2184_v39, %v2184_v39  ;;  %v773_v9 = vadd.f32 %v772_v0, %v717_v49  ;;  %v654_v12 = vadd.f32 %v653_v1, %v2184_v39  ;;  %v721_v49 = vmul.f32 %v2217_v33, %v2217_v33 }
 0x134   :  { %v2237_v17 = vpop.f32.mrf.mxu0  ;;  %v2239_v20 = vpop.f32.mrf.mxu1 }
 0x135   :  { %2758 = vst [vmem:[#allocation7_spill] sm:$0xff] %v2237_v17  ;;  %2759 = vst [vmem:[#allocation8_spill] sm:$0xff] %v2239_v20 }
 0x136   :  { %v1748_v28 = vpop.f32.mrf.mxu0  ;;  %v1808_v29 = vpop.f32.mrf.mxu1 }
 0x137   :  { %v774_v28 = vadd.f32 %v773_v9, %v718_v4  ;;  %v655_v29 = vadd.f32 %v654_v12, %v2197_v57  ;;  %v722_v4 = vmul.f32 %v2227_v53, %v2227_v53 }
 0x138   :  { %v2247_v41 = vpop.f32.mrf.mxu0  ;;  %v2249_v44 = vpop.f32.mrf.mxu1 }
 0x139   :  { %2760 = vst [vmem:[#allocation9_spill] sm:$0xff] %v2247_v41  ;;  %2761 = vst [vmem:[#allocation10_spill] sm:$0xff] %v2249_v44  ;;  %v775_v45 = vadd.f32 %v774_v28, %v719_v21  ;;  %v656_v48 = vadd.f32 %v655_v29, %v2207_v13 }
 0x13a   :  { %v1749_v52 = vpop.f32.mrf.mxu0  ;;  %v1809_v61 = vpop.f32.mrf.mxu1 }
 0x13b   :  { %v776_v0 = vadd.f32 %v775_v45, %v720_v32  ;;  %v657_v1 = vadd.f32 %v656_v48, %v2217_v33  ;;  %v724_v45 = vmul.f32 %v2247_v41, %v2247_v41 }
 0x13c   :  { %v2257_v5 = vpop.f32.mrf.mxu0  ;;  %v2259_v8 = vpop.f32.mrf.mxu1 }
 0x13d   :  { %2762 = vst [vmem:[#allocation11_spill] sm:$0xff] %v2257_v5  ;;  %2763 = vst [vmem:[#allocation12_spill] sm:$0xff] %v2259_v8  ;;  %v658_v21 = vadd.f32 %v657_v1, %v2227_v53 }
 0x13e   :  { %v1752_v24 = vpop.f32.mrf.mxu0  ;;  %v1812_v25 = vpop.f32.mrf.mxu1 }
 0x13f   :  { %v777_v24 = vadd.f32 %v776_v0, %v721_v49  ;;  %v723_v25 = vmul.f32 %v2237_v17, %v2237_v17  ;;  %v659_v32 = vadd.f32 %v658_v21, %v2237_v17  ;;  %v725_v0 = vmul.f32 %v2257_v5, %v2257_v5 }
 0x140   :  { %v2267_v37 = vpop.f32.mrf.mxu0  ;;  %v2269_v38 = vpop.f32.mrf.mxu1 }
 0x141   :  { %2764 = vst [vmem:[#allocation13_spill] sm:$0xff] %v2267_v37  ;;  %2765 = vst [vmem:[#allocation14_spill] sm:$0xff] %v2269_v38  ;;  %v660_v49 = vadd.f32 %v659_v32, %v2247_v41 }
 0x142   :  { %v1753_v52 = vpop.f32.mrf.mxu0  ;;  %v1813_v61 = vpop.f32.mrf.mxu1 }
 0x143   :  { %v778_v52 = vadd.f32 %v777_v24, %v722_v4  ;;  %v661_v4 = vadd.f32 %v660_v49, %v2257_v5  ;;  %v726_v24 = vmul.f32 %v2267_v37, %v2267_v37 }
 0x144   :  { %v2277_v9 = vpop.f32.mrf.mxu0  ;;  %v2279_v12 = vpop.f32.mrf.mxu1 }
 0x145   :  { %2766 = vst [vmem:[#allocation15_spill] sm:$0xff] %v2279_v12  ;;  %v779_v33 = vadd.f32 %v778_v52, %v723_v25  ;;  %v662_v25 = vadd.f32 %v661_v4, %v2267_v37  ;;  %v727_v52 = vmul.f32 %v2277_v9, %v2277_v9 }
 0x146   :  { %v1756_v28 = vpop.f32.mrf.mxu0  ;;  %v1816_v29 = vpop.f32.mrf.mxu1 }
 0x147   :  { %v780_v28 = vadd.f32 %v779_v33, %v724_v45  ;;  %v663_v33 = vadd.f32 %v662_v25, %v2277_v9 }
 0x148   :  { %v2287_v48 = vpop.f32.mrf.mxu0  ;;  %v2289_v61 = vpop.f32.mrf.mxu1 }
 0x149   :  { %2767 = vst [vmem:[#allocation16_spill] sm:$0xff] %v2289_v61  ;;  %v781_v17 = vadd.f32 %v780_v28, %v725_v0  ;;  %v664_v13 = vadd.f32 %v663_v33, %v2287_v48 }
 0x14a   :  { %v1757_v1 = vpop.f32.mrf.mxu0  ;;  %v1817_v53 = vpop.f32.mrf.mxu1 }
 0x14b   :  { %v782_v1 = vadd.f32 %v781_v17, %v726_v24  ;;  %v728_v53 = vmul.f32 %v2287_v48, %v2287_v48 }
 0x14c   :  { %v2297_v21 = vpop.f32.mrf.mxu0  ;;  %v2299_v29 = vpop.f32.mrf.mxu1 }
 0x14d   :  { %2768 = vst [vmem:[#allocation17_spill] sm:$0xff] %v2299_v29  ;;  %v783_v5 = vadd.f32 %v782_v1, %v727_v52  ;;  %v729_v0 = vmul.f32 %v2297_v21, %v2297_v21 }
 0x14e   :  { %v1760_v32 = vpop.f32.mrf.mxu0  ;;  %v1820_v41 = vpop.f32.mrf.mxu1 }
 0x14f   :  { %v784_v37 = vadd.f32 %v783_v5, %v728_v53  ;;  %v665_v41 = vadd.f32 %v664_v13, %v2297_v21 }
 0x150   :  { %v2307_v45 = vpop.f32.mrf.mxu0  ;;  %v637_v49 = vpop.f32.mrf.mxu1 }
 0x151   :  { %v730_v17 = vmul.f32 %v2307_v45, %v2307_v45  ;;  %v785_v25 = vadd.f32 %v784_v37, %v729_v0  ;;  %v666_v32 = vadd.f32 %v665_v41, %v2307_v45  ;;  %v733_v37 = vmul.f32 %v2124_v43, %v2124_v43 }
 0x152   :  { %v1761_v28 = vpop.f32.mrf.mxu0  ;;  %v1821_v4 = vpop.f32.mrf.mxu1 }
 0x153   :  { %v786_v33 = vadd.f32 %v785_v25, %v730_v17  ;;  %v734_v17 = vmul.f32 %v2128_v47, %v2128_v47 }
 0x154   :  { %v2315_v24 = vpop.f32.mrf.mxu0 }
 0x155   :  { %v731_v52 = vmul.f32 %v2315_v24, %v2315_v24  ;;  %v667_v49 = vadd.f32 %v666_v32, %v2315_v24 }
 0x156   :  { %v1764_v1 = vpop.f32.mrf.mxu0 }
 0x157   :  { %v787_v5 = vadd.f32 %v786_v33, %v731_v52  ;;  %v735_v52 = vmul.f32 %v2132_v51, %v2132_v51 }
 0x158   :  { %v2321_v28 = vpop.f32.mrf.mxu0 }
 0x159   :  { %2769 = vst [vmem:[#allocation18_spill] sm:$0xff] %v2321_v28  ;;  %v668_v13 = vadd.f32 %v667_v49, %v2321_v28  ;;  %v732_v53 = vmul.f32 %v2321_v28, %v2321_v28  ;;  %v736_v49 = vmul.f32 %v2136_v55, %v2136_v55 }
 0x15a   :  { %v1765_v4 = vpop.f32.mrf.mxu0 }
 0x15b   :  { %v669_v0 = vadd.f32 %v668_v13, %v2124_v43  ;;  %v788_v41 = vadd.f32 %v787_v5, %v732_v53  ;;  %v737_v5 = vmul.f32 %v2140_v59, %v2140_v59 }
 0x15d   :  { %v670_v25 = vadd.f32 %v669_v0, %v2128_v47  ;;  %v789_v32 = vadd.f32 %v788_v41, %v733_v37  ;;  %v738_v37 = vmul.f32 %v2144_v63, %v2144_v63 }
 0x15f   :  { %v671_v1 = vadd.f32 %v670_v25, %v2132_v51  ;;  %v790_v33 = vadd.f32 %v789_v32, %v734_v17  ;;  %v739_v17 = vmul.f32 %v2148_v3, %v2148_v3 }
 0x161   :  { %v672_v4 = vadd.f32 %v671_v1, %v2136_v55  ;;  %v791_v28 = vadd.f32 %v790_v33, %v735_v52  ;;  %v740_v52 = vmul.f32 %v2152_v7, %v2152_v7 }
 0x163   :  { %v673_v13 = vadd.f32 %v672_v4, %v2140_v59  ;;  %v792_v53 = vadd.f32 %v791_v28, %v736_v49  ;;  %v741_v28 = vmul.f32 %v2156_v11, %v2156_v11 }
 0x165   :  { %v674_v0 = vadd.f32 %v673_v13, %v2144_v63  ;;  %v793_v41 = vadd.f32 %v792_v53, %v737_v5  ;;  %v742_v5 = vmul.f32 %v2160_v15, %v2160_v15 }
 0x167   :  { %v675_v25 = vadd.f32 %v674_v0, %v2148_v3  ;;  %v794_v32 = vadd.f32 %v793_v41, %v738_v37  ;;  %v743_v37 = vmul.f32 %v2164_v19, %v2164_v19 }
 0x169   :  { %v795_v1 = vadd.f32 %v794_v32, %v739_v17  ;;  %v676_v33 = vadd.f32 %v675_v25, %v2152_v7  ;;  %v744_v17 = vmul.f32 %v2168_v23, %v2168_v23 }
 0x16b   :  { %v677_v49 = vadd.f32 %v676_v33, %v2156_v11  ;;  %v796_v4 = vadd.f32 %v795_v1, %v740_v52  ;;  %v745_v52 = vmul.f32 %v2172_v27, %v2172_v27 }
 0x16d   :  { %v678_v13 = vadd.f32 %v677_v49, %v2160_v15  ;;  %v797_v53 = vadd.f32 %v796_v4, %v741_v28  ;;  %v746_v28 = vmul.f32 %v2176_v31, %v2176_v31 }
 0x16f   :  { %v679_v0 = vadd.f32 %v678_v13, %v2164_v19  ;;  %v798_v41 = vadd.f32 %v797_v53, %v742_v5  ;;  %v747_v13 = vmul.f32 %v2180_v35, %v2180_v35 }
 0x171   :  { %v680_v25 = vadd.f32 %v679_v0, %v2168_v23  ;;  %v799_v32 = vadd.f32 %v798_v41, %v743_v37  ;;  %v748_v41 = vmul.f32 %v2186_v40, %v2186_v40 }
 0x173   :  { %v681_v1 = vadd.f32 %v680_v25, %v2172_v27  ;;  %v800_v33 = vadd.f32 %v799_v32, %v744_v17  ;;  %v749_v32 = vmul.f32 %v2199_v60, %v2199_v60 }
 0x175   :  { %v682_v49 = vadd.f32 %v681_v1, %v2176_v31  ;;  %v801_v4 = vadd.f32 %v800_v33, %v745_v52  ;;  %v750_v33 = vmul.f32 %v2209_v16, %v2209_v16 }
 0x177   :  { %v683_v5 = vadd.f32 %v682_v49, %v2180_v35  ;;  %v802_v53 = vadd.f32 %v801_v4, %v746_v28  ;;  %v751_v4 = vmul.f32 %v2219_v36, %v2219_v36 }
 0x179   :  { %v803_v0 = vadd.f32 %v802_v53, %v747_v13  ;;  %v684_v37 = vadd.f32 %v683_v5, %v2186_v40  ;;  %v752_v53 = vmul.f32 %v2229_v56, %v2229_v56 }
 0x17b   :  { %v804_v25 = vadd.f32 %v803_v0, %v748_v41  ;;  %v685_v17 = vadd.f32 %v684_v37, %v2199_v60  ;;  %v753_v41 = vmul.f32 %v2239_v20, %v2239_v20 }
 0x17d   :  { %v805_v1 = vadd.f32 %v804_v25, %v749_v32  ;;  %v686_v52 = vadd.f32 %v685_v17, %v2209_v16  ;;  %v754_v32 = vmul.f32 %v2249_v44, %v2249_v44 }
 0x17f   :  { %v806_v49 = vadd.f32 %v805_v1, %v750_v33  ;;  %v687_v28 = vadd.f32 %v686_v52, %v2219_v36  ;;  %v755_v33 = vmul.f32 %v2259_v8, %v2259_v8 }
 0x181   :  { %v807_v5 = vadd.f32 %v806_v49, %v751_v4  ;;  %v688_v13 = vadd.f32 %v687_v28, %v2229_v56  ;;  %v756_v4 = vmul.f32 %v2269_v38, %v2269_v38 }
 0x183   :  { %v808_v0 = vadd.f32 %v807_v5, %v752_v53  ;;  %v689_v37 = vadd.f32 %v688_v13, %v2239_v20  ;;  %v757_v53 = vmul.f32 %v2279_v12, %v2279_v12 }
 0x185   :  { %v809_v25 = vadd.f32 %v808_v0, %v753_v41  ;;  %v690_v17 = vadd.f32 %v689_v37, %v2249_v44  ;;  %v758_v41 = vmul.f32 %v2289_v61, %v2289_v61 }
 0x187   :  { %v810_v1 = vadd.f32 %v809_v25, %v754_v32  ;;  %v691_v52 = vadd.f32 %v690_v17, %v2259_v8  ;;  %v759_v25 = vmul.f32 %v2299_v29, %v2299_v29 }
 0x189   :  { %v811_v49 = vadd.f32 %v810_v1, %v755_v33  ;;  %v692_v28 = vadd.f32 %v691_v52, %v2269_v38 }
 0x18b   :  { %v812_v5 = vadd.f32 %v811_v49, %v756_v4  ;;  %v693_v13 = vadd.f32 %v692_v28, %v2279_v12 }
 0x18d   :  { %v813_v0 = vadd.f32 %v812_v5, %v757_v53  ;;  %v694_v37 = vadd.f32 %v693_v13, %v2289_v61 }
 0x18f   :  { %v814_v17 = vadd.f32 %v813_v0, %v758_v41  ;;  %v695_v32 = vadd.f32 %v694_v37, %v2299_v29  ;;  %v834_v37 = vlaneseq  ;;  %v2780_v29 = vld [vmem:[#allocation8_spill] sm:$0xff] }
 0x191   :  { %v696_v1 = vrot.slane %v695_v32, 4  ;;  %v815_v52 = vadd.f32 %v814_v17, %v759_v25  ;;  %v2407_v25 = vshrl.u32 %v834_v37, 7  ;;  %v826_v17 = vld [vmem:[%s2733_s2] sm:$0x1]  ;;  %v2773_v37 = vld [vmem:[#allocation7_spill] sm:$0xff] }
 0x193   :  { %v697_v33 = vadd.f32 %v696_v1, %v695_v32  ;;  %v816_v49 = vrot.slane %v815_v52, 4  ;;  %v836_v32 = vsub.s32 0, %v2407_v25  ;;  %v2774_v25 = vld [vmem:[#allocation9_spill] sm:$0xff] }
 0x195   :  { %v698_v28 = vrot.slane %v697_v33, 2  ;;  %v817_v4 = vadd.f32 %v816_v49, %v815_v52 }
 0x197   :  { %v699_v38 = vadd.f32 %v698_v28, %v697_v33  ;;  %v818_v12 = vrot.slane %v817_v4, 2 }
 0x199   :  { %v700_v5 = vrot.slane %v699_v38, 1  ;;  %v819_v53 = vadd.f32 %v818_v12, %v817_v4 }
 0x19b   :  { %v701_v13 = vadd.f32 %v700_v5, %v699_v38  ;;  %v820_v8 = vrot.slane %v819_v53, 1 }
 0x19d   :  { %v702_v44 = vmul.f32 0.0022222223, %v701_v13  ;;  %v821_v61 = vadd.f32 %v820_v8, %v819_v53  ;;  %v830_v8 = vld [vmem:[%s2734_s3] sm:$0x1] }
 0x19e   :  { %v2770_v13 = vld [vmem:[#allocation2_spill] sm:$0xff] }
 0x19f   :  { %v822_v20 = vmul.f32 0.0022222223, %v821_v61  ;;  %v823_v56 = vmul.f32 %v702_v44, %v702_v44 }
 0x1a1   :  { %v824_v36 = vsub.f32 %v822_v20, %v823_v56 }
 0x1a3   :  { %v825_v0 = vmax.f32 %v824_v36, 0.0 }
 0x1a5   :  { %v827_v41 = vadd.f32 1e-05, %v825_v0  ;;  %v2771_v0 = vld [vmem:[#allocation3_spill] sm:$0xff] }
 0x1a7   :  { %1878 = vrsqrt.f32 %v827_v41  ;;  %v2772_v41 = vld [vmem:[#allocation5_spill] sm:$0xff] }
 0x1b4   :  { %v1879_v12 = vpop.eup %1878 }
 0x1b5   :  { %v829_v38 = vmul.f32 %v1879_v12, %v826_v17  ;;  %v2775_v17 = vld [vmem:[#allocation11_spill] sm:$0xff]  ;;  %v2776_v12 = vld [vmem:[#allocation13_spill] sm:$0xff] }
 0x1b7   :  { %v831_v61 = vmul.f32 %v829_v38, %v702_v44  ;;  %v837_v56 = vrot.slane %v829_v38, %v836_v32 }
 0x1b9   :  { %v832_v36 = vsub.f32 %v830_v8, %v831_v61  ;;  %v839_v20 = vmul.f32 %v837_v56, %v2122_v42  ;;  %v840_v1 = vmul.f32 %v837_v56, %v2126_v46  ;;  %v841_v52 = vmul.f32 %v837_v56, %v2130_v50  ;;  %v2777_v61 = vld [vmem:[#allocation18_spill] sm:$0xff] }
 0x1ba   :  { %v842_v33 = vmul.f32 %v837_v56, %v2134_v54  ;;  %v843_v49 = vmul.f32 %v837_v56, %v2138_v58  ;;  %v844_v28 = vmul.f32 %v837_v56, %v2142_v62  ;;  %v845_v4 = vmul.f32 %v837_v56, %v2146_v2 }
 0x1bb   :  { %v846_v5 = vmul.f32 %v837_v56, %v2150_v6  ;;  %v847_v44 = vmul.f32 %v837_v56, %v2154_v10  ;;  %v848_v53 = vmul.f32 %v837_v56, %v2158_v14  ;;  %v849_v42 = vmul.f32 %v837_v56, %v2162_v18 }
 0x1bc   :  { %v850_v46 = vmul.f32 %v837_v56, %v2166_v22  ;;  %v851_v50 = vmul.f32 %v837_v56, %v2170_v26  ;;  %v852_v54 = vmul.f32 %v837_v56, %v2174_v30  ;;  %v853_v58 = vmul.f32 %v837_v56, %v2178_v34 }
 0x1bd   :  { %v854_v62 = vmul.f32 %v837_v56, %v2184_v39  ;;  %v855_v2 = vmul.f32 %v837_v56, %v2197_v57  ;;  %v856_v6 = vmul.f32 %v837_v56, %v2770_v13  ;;  %v857_v10 = vmul.f32 %v837_v56, %v2771_v0 }
 0x1be   :  { %v858_v14 = vmul.f32 %v837_v56, %v2772_v41  ;;  %v859_v18 = vmul.f32 %v837_v56, %v2773_v37  ;;  %v860_v22 = vmul.f32 %v837_v56, %v2774_v25  ;;  %v861_v26 = vmul.f32 %v837_v56, %v2775_v17 }
 0x1bf   :  { %v862_v30 = vmul.f32 %v837_v56, %v2776_v12  ;;  %v863_v34 = vmul.f32 %v837_v56, %v2277_v9  ;;  %v864_v39 = vmul.f32 %v837_v56, %v2287_v48  ;;  %v865_v57 = vmul.f32 %v837_v56, %v2297_v21  ;;  %v2778_v12 = vld [vmem:[#allocation4_spill] sm:$0xff] }
 0x1c0   :  { %v866_v38 = vmul.f32 %v837_v56, %v2307_v45  ;;  %v867_v8 = vmul.f32 %v837_v56, %v2315_v24  ;;  %v868_v13 = vmul.f32 %v837_v56, %v2777_v61  ;;  %v869_v0 = vmul.f32 %v837_v56, %v2124_v43  ;;  %v2779_v61 = vld [vmem:[#allocation6_spill] sm:$0xff] }
 0x1c1   :  { %v870_v41 = vmul.f32 %v837_v56, %v2128_v47  ;;  %v871_v37 = vmul.f32 %v837_v56, %v2132_v51  ;;  %v872_v25 = vmul.f32 %v837_v56, %v2136_v55  ;;  %v873_v9 = vmul.f32 %v837_v56, %v2140_v59 }
 0x1c2   :  { %v874_v48 = vmul.f32 %v837_v56, %v2144_v63  ;;  %v875_v21 = vmul.f32 %v837_v56, %v2148_v3  ;;  %v876_v45 = vmul.f32 %v837_v56, %v2152_v7  ;;  %v877_v24 = vmul.f32 %v837_v56, %v2156_v11 }
 0x1c3   :  { %v878_v17 = vmul.f32 %v837_v56, %v2160_v15  ;;  %v879_v43 = vmul.f32 %v837_v56, %v2164_v19  ;;  %v880_v47 = vmul.f32 %v837_v56, %v2168_v23  ;;  %v881_v51 = vmul.f32 %v837_v56, %v2172_v27  ;;  %v2781_v23 = vld [vmem:[#allocation10_spill] sm:$0xff] }
 0x1c4   :  { %v882_v55 = vmul.f32 %v837_v56, %v2176_v31  ;;  %v883_v59 = vmul.f32 %v837_v56, %v2180_v35  ;;  %v884_v63 = vmul.f32 %v837_v56, %v2186_v40  ;;  %v885_v3 = vmul.f32 %v837_v56, %v2199_v60  ;;  %v2782_v31 = vld [vmem:[#allocation12_spill] sm:$0xff]  ;;  %v2783_v60 = vld [vmem:[#allocation14_spill] sm:$0xff] }
 0x1c5   :  { %v886_v7 = vmul.f32 %v837_v56, %v2209_v16  ;;  %v887_v11 = vmul.f32 %v837_v56, %v2778_v12  ;;  %v888_v15 = vmul.f32 %v837_v56, %v2779_v61  ;;  %v889_v19 = vmul.f32 %v837_v56, %v2780_v29  ;;  %v2784_v12 = vld [vmem:[#allocation15_spill] sm:$0xff]  ;;  %v2785_v29 = vld [vmem:[#allocation16_spill] sm:$0xff] }
 0x1c6   :  { %v890_v27 = vmul.f32 %v837_v56, %v2781_v23  ;;  %v891_v35 = vmul.f32 %v837_v56, %v2782_v31  ;;  %v900_v40 = vrot.slane %v832_v36, %v836_v32  ;;  %v892_v16 = vmul.f32 %v837_v56, %v2783_v60  ;;  %v2786_v31 = vld [vmem:[#allocation17_spill] sm:$0xff] }
 0x1c7   :  { %v893_v61 = vmul.f32 %v837_v56, %v2784_v12  ;;  %v894_v23 = vmul.f32 %v837_v56, %v2785_v29  ;;  %v895_v32 = vmul.f32 %v837_v56, %v2786_v31 }
 0x1c8   :  { %v2473_v36 = vadd.f32 %v900_v40, %v839_v20  ;;  %v2475_v60 = vadd.f32 %v900_v40, %v840_v1  ;;  %v2477_v12 = vadd.f32 %v900_v40, %v841_v52  ;;  %v2479_v29 = vadd.f32 %v900_v40, %v842_v33 }
 0x1c9   :  { %v2481_v31 = vadd.f32 %v900_v40, %v843_v49  ;;  %v2483_v56 = vadd.f32 %v900_v40, %v844_v28  ;;  %v2485_v20 = vadd.f32 %v900_v40, %v845_v4  ;;  %v2489_v1 = vadd.f32 %v900_v40, %v847_v44 }
 0x1ca   :  { %2787 = vst [vmem:[#allocation2_spill] sm:$0xff] %v2473_v36  ;;  %2788 = vst [vmem:[#allocation3_spill] sm:$0xff] %v2475_v60  ;;  %v2487_v36 = vadd.f32 %v900_v40, %v846_v5  ;;  %v2491_v60 = vadd.f32 %v900_v40, %v848_v53  ;;  %v2493_v52 = vadd.f32 %v900_v40, %v849_v42 }
 0x1cb   :  { %2789 = vst [vmem:[#allocation5_spill] sm:$0xff] %v2477_v12  ;;  %2790 = vst [vmem:[#allocation7_spill] sm:$0xff] %v2479_v29  ;;  %v2495_v12 = vadd.f32 %v900_v40, %v850_v46  ;;  %v2497_v33 = vadd.f32 %v900_v40, %v851_v50  ;;  %v2499_v29 = vadd.f32 %v900_v40, %v852_v54 }
 0x1cc   :  { %v2501_v49 = vadd.f32 %v900_v40, %v853_v58  ;;  %v2503_v28 = vadd.f32 %v900_v40, %v854_v62  ;;  %v2505_v4 = vadd.f32 %v900_v40, %v855_v2  ;;  %v2507_v5 = vadd.f32 %v900_v40, %v856_v6 }
 0x1cd   :  { %v2509_v44 = vadd.f32 %v900_v40, %v857_v10  ;;  %v2511_v53 = vadd.f32 %v900_v40, %v858_v14  ;;  %v2513_v42 = vadd.f32 %v900_v40, %v859_v18  ;;  %v2515_v46 = vadd.f32 %v900_v40, %v860_v22 }
 0x1ce   :  { %v2517_v50 = vadd.f32 %v900_v40, %v861_v26  ;;  %v2519_v54 = vadd.f32 %v900_v40, %v862_v30  ;;  %v2521_v58 = vadd.f32 %v900_v40, %v863_v34  ;;  %v2523_v62 = vadd.f32 %v900_v40, %v864_v39 }
 0x1cf   :  { %v2525_v2 = vadd.f32 %v900_v40, %v865_v57  ;;  %v2527_v6 = vadd.f32 %v900_v40, %v866_v38  ;;  %v2529_v10 = vadd.f32 %v900_v40, %v867_v8  ;;  %v2531_v14 = vadd.f32 %v900_v40, %v868_v13 }
 0x1d0   :  { %v2533_v18 = vadd.f32 %v900_v40, %v869_v0  ;;  %v2535_v22 = vadd.f32 %v900_v40, %v870_v41  ;;  %v2537_v26 = vadd.f32 %v900_v40, %v871_v37  ;;  %v2539_v30 = vadd.f32 %v900_v40, %v872_v25 }
 0x1d1   :  { %v2541_v34 = vadd.f32 %v900_v40, %v873_v9  ;;  %v2543_v39 = vadd.f32 %v900_v40, %v874_v48  ;;  %v2545_v57 = vadd.f32 %v900_v40, %v875_v21  ;;  %v2547_v38 = vadd.f32 %v900_v40, %v876_v45 }
 0x1d2   :  { %v2549_v8 = vadd.f32 %v900_v40, %v877_v24  ;;  %v2551_v13 = vadd.f32 %v900_v40, %v878_v17  ;;  %v2553_v0 = vadd.f32 %v900_v40, %v879_v43  ;;  %v2555_v41 = vadd.f32 %v900_v40, %v880_v47 }
 0x1d3   :  { %v2557_v37 = vadd.f32 %v900_v40, %v881_v51  ;;  %v2559_v25 = vadd.f32 %v900_v40, %v882_v55  ;;  %v2561_v9 = vadd.f32 %v900_v40, %v883_v59  ;;  %v2563_v48 = vadd.f32 %v900_v40, %v884_v63 }
 0x1d4   :  { %v2565_v21 = vadd.f32 %v900_v40, %v885_v3  ;;  %v2567_v45 = vadd.f32 %v900_v40, %v886_v7  ;;  %v2569_v24 = vadd.f32 %v900_v40, %v887_v11  ;;  %v2571_v17 = vadd.f32 %v900_v40, %v888_v15  ;;  %v2798_v7 = vld [vmem:[#allocation2_spill] sm:$0xff]  ;;  %v2799_v11 = vld [vmem:[#allocation3_spill] sm:$0xff]  ;;  %v2800_v15 = vld [vmem:[#allocation5_spill] sm:$0xff] }
 0x1d5   :  { %v2573_v43 = vadd.f32 %v900_v40, %v889_v19  ;;  %v2575_v47 = vadd.f32 %v900_v40, %v890_v27  ;;  %v2577_v51 = vadd.f32 %v900_v40, %v891_v35  ;;  %v2579_v55 = vadd.f32 %v900_v40, %v892_v16  ;;  %v2801_v19 = vld [vmem:[#allocation7_spill] sm:$0xff] }
 0x1d6   :  { %2791 = vst [vmem:[#allocation9_spill] sm:$0xff] %v2567_v45  ;;  %2792 = vst [vmem:[#allocation11_spill] sm:$0xff] %v2569_v24  ;;  %v2581_v59 = vadd.f32 %v900_v40, %v893_v61  ;;  %v2583_v63 = vadd.f32 %v900_v40, %v894_v23  ;;  %v2585_v3 = vadd.f32 %v900_v40, %v895_v32  ;;  %v959_v45 = vmax.f32 %v2798_v7, 0.0 }
 0x1d7   :  { %2793 = vst [vmem:[#allocation13_spill] sm:$0xff] %v2571_v17  ;;  %2794 = vst [vmem:[#allocation18_spill] sm:$0xff] %v2573_v43  ;;  %v960_v24 = vmax.f32 %v2799_v11, 0.0  ;;  %v961_v17 = vmax.f32 %v2800_v15, 0.0  ;;  %v962_v43 = vmax.f32 %v2801_v19, 0.0  ;;  %v963_v27 = vmax.f32 %v2481_v31, 0.0 }
 0x1d8   :  { %2795 = vst [vmem:[#allocation4_spill] sm:$0xff] %v2581_v59  ;;  %2796 = vst [vmem:[#allocation6_spill] sm:$0xff] %v2583_v63  ;;  %v964_v35 = vmax.f32 %v2483_v56, 0.0  ;;  %v965_v16 = vmax.f32 %v2485_v20, 0.0  ;;  %v966_v61 = vmax.f32 %v2487_v36, 0.0  ;;  %v967_v23 = vmax.f32 %v2489_v1, 0.0 }
 0x1d9   :  { %2797 = vst [vmem:[#allocation8_spill] sm:$0xff] %v2585_v3  ;;  %v968_v40 = vmax.f32 %v2491_v60, 0.0  ;;  %v969_v32 = vmax.f32 %v2493_v52, 0.0  ;;  %v970_v7 = vmax.f32 %v2495_v12, 0.0  ;;  %v971_v11 = vmax.f32 %v2497_v33, 0.0 }
 0x1da   :  { %v972_v15 = vmax.f32 %v2499_v29, 0.0  ;;  %v973_v31 = vmax.f32 %v2501_v49, 0.0  ;;  %v974_v56 = vmax.f32 %v2503_v28, 0.0  ;;  %v975_v20 = vmax.f32 %v2505_v4, 0.0 }
 0x1db   :  { %v976_v36 = vmax.f32 %v2507_v5, 0.0  ;;  %v977_v1 = vmax.f32 %v2509_v44, 0.0  ;;  %v978_v60 = vmax.f32 %v2511_v53, 0.0  ;;  %v979_v52 = vmax.f32 %v2513_v42, 0.0 }
 0x1dc   :  { %v980_v12 = vmax.f32 %v2515_v46, 0.0  ;;  %v981_v33 = vmax.f32 %v2517_v50, 0.0  ;;  %v982_v29 = vmax.f32 %v2519_v54, 0.0  ;;  %v983_v49 = vmax.f32 %v2521_v58, 0.0 }
 0x1dd   :  { %v984_v28 = vmax.f32 %v2523_v62, 0.0  ;;  %v985_v4 = vmax.f32 %v2525_v2, 0.0  ;;  %v986_v5 = vmax.f32 %v2527_v6, 0.0  ;;  %v987_v44 = vmax.f32 %v2529_v10, 0.0  ;;  %v2802_v19 = vld [vmem:[#allocation9_spill] sm:$0xff]  ;;  %v2803_v3 = vld [vmem:[#allocation11_spill] sm:$0xff] }
 0x1de   :  { %v988_v53 = vmax.f32 %v2531_v14, 0.0  ;;  %v989_v42 = vmax.f32 %v2533_v18, 0.0  ;;  %v990_v46 = vmax.f32 %v2535_v22, 0.0  ;;  %v991_v50 = vmax.f32 %v2537_v26, 0.0  ;;  %v2804_v63 = vld [vmem:[#allocation13_spill] sm:$0xff]  ;;  %v2805_v59 = vld [vmem:[#allocation18_spill] sm:$0xff] }
 0x1df   :  { %v992_v54 = vmax.f32 %v2539_v30, 0.0  ;;  %v993_v58 = vmax.f32 %v2541_v34, 0.0  ;;  %v994_v62 = vmax.f32 %v2543_v39, 0.0  ;;  %v995_v2 = vmax.f32 %v2545_v57, 0.0 }
 0x1e0   :  { %v996_v6 = vmax.f32 %v2547_v38, 0.0  ;;  %v997_v10 = vmax.f32 %v2549_v8, 0.0  ;;  %v998_v14 = vmax.f32 %v2551_v13, 0.0  ;;  %v999_v18 = vmax.f32 %v2553_v0, 0.0 }
 0x1e1   :  { %v1000_v22 = vmax.f32 %v2555_v41, 0.0  ;;  %v1001_v26 = vmax.f32 %v2557_v37, 0.0  ;;  %v1002_v30 = vmax.f32 %v2559_v25, 0.0  ;;  %v1003_v34 = vmax.f32 %v2561_v9, 0.0  ;;  %v2806_v9 = vld [vmem:[#allocation4_spill] sm:$0xff] }
 0x1e2   :  { %v1004_v39 = vmax.f32 %v2563_v48, 0.0  ;;  %v1005_v57 = vmax.f32 %v2565_v21, 0.0  ;;  %v1006_v38 = vmax.f32 %v2802_v19, 0.0  ;;  %v1007_v8 = vmax.f32 %v2803_v3, 0.0  ;;  %v2807_v21 = vld [vmem:[#allocation6_spill] sm:$0xff]  ;;  %v2808_v3 = vld [vmem:[#allocation8_spill] sm:$0xff] }
 0x1e3   :  { %v1008_v13 = vmax.f32 %v2804_v63, 0.0  ;;  %v1009_v0 = vmax.f32 %v2805_v59, 0.0  ;;  %v1010_v41 = vmax.f32 %v2575_v47, 0.0  ;;  %v1011_v37 = vmax.f32 %v2577_v51, 0.0 }
 0x1e4   :  { %v1012_v25 = vmax.f32 %v2579_v55, 0.0  ;;  %v1013_v48 = vmax.f32 %v2806_v9, 0.0  ;;  %v1014_v19 = vmax.f32 %v2807_v21, 0.0  ;;  %v1015_v63 = vmax.f32 %v2808_v3, 0.0 }
 0x1e5   :  { %v1489_v59 = vpack.c.bf16 %v960_v24, %v959_v45  ;;  %v1494_v47 = vpack.c.bf16 %v962_v43, %v961_v17  ;;  %v1499_v51 = vpack.c.bf16 %v964_v35, %v963_v27  ;;  %v1504_v55 = vpack.c.bf16 %v966_v61, %v965_v16 }
 0x1e6   :  { %v1509_v9 = vpack.c.bf16 %v968_v40, %v967_v23  ;;  %v1514_v21 = vpack.c.bf16 %v970_v7, %v969_v32  ;;  %v1485_v3 = vpack.c.bf16 %v1015_v63, %v1015_v63  ;;  %v1519_v24 = vpack.c.bf16 %v972_v15, %v971_v11 }
 0x1e7   :  { %1490 = vst [vmem:[%s2735_s4] sm:$0xff] %v1489_v59   ;;  %1626 = vst [vmem:[%s2735_s4 + $0x8] sm:$0xff] %v1494_v47   ;;  %v1524_v45 = vpack.c.bf16 %v974_v56, %v973_v31  ;;  %v1529_v17 = vpack.c.bf16 %v976_v36, %v975_v20  ;;  %v1534_v43 = vpack.c.bf16 %v978_v60, %v977_v1 }
 0x1e8   :  { %1627 = vst [vmem:[%s2735_s4 + $0x10] sm:$0xff] %v1499_v51   ;;  %1628 = vst [vmem:[%s2735_s4 + $0x18] sm:$0xff] %v1504_v55   ;;  %v1539_v27 = vpack.c.bf16 %v980_v12, %v979_v52  ;;  %v1544_v35 = vpack.c.bf16 %v982_v29, %v981_v33  ;;  %v1549_v16 = vpack.c.bf16 %v984_v28, %v983_v49 }
 0x1e9   :  { %1629 = vst [vmem:[%s2735_s4 + $0x20] sm:$0xff] %v1509_v9   ;;  %1630 = vst [vmem:[%s2735_s4 + $0x28] sm:$0xff] %v1514_v21   ;;  %v1554_v61 = vpack.c.bf16 %v986_v5, %v985_v4  ;;  %v1559_v23 = vpack.c.bf16 %v988_v53, %v987_v44  ;;  %v1564_v40 = vpack.c.bf16 %v990_v46, %v989_v42 }
 0x1ea   :  { %1631 = vst [vmem:[%s2735_s4 + $0x30] sm:$0xff] %v1519_v24   ;;  %1632 = vst [vmem:[%s2735_s4 + $0x38] sm:$0xff] %v1524_v45   ;;  %v1569_v32 = vpack.c.bf16 %v992_v54, %v991_v50  ;;  %v1574_v7 = vpack.c.bf16 %v994_v62, %v993_v58  ;;  %v1579_v11 = vpack.c.bf16 %v996_v6, %v995_v2 }
 0x1eb   :  { %1633 = vst [vmem:[%s2735_s4 + $0x40] sm:$0xff] %v1529_v17   ;;  %1301 = vst [vmem:[%s2735_s4 + $0xe0] sm:$0xf] %v1485_v3  ;;  %v1584_v15 = vpack.c.bf16 %v998_v14, %v997_v10  ;;  %v1589_v31 = vpack.c.bf16 %v1000_v22, %v999_v18  ;;  %v1594_v56 = vpack.c.bf16 %v1002_v30, %v1001_v26 }
 0x1ec   :  { %1634 = vst [vmem:[%s2735_s4 + $0x48] sm:$0xff] %v1534_v43   ;;  %1635 = vst [vmem:[%s2735_s4 + $0x50] sm:$0xff] %v1539_v27   ;;  %v1599_v20 = vpack.c.bf16 %v1004_v39, %v1003_v34  ;;  %v1604_v36 = vpack.c.bf16 %v1006_v38, %v1005_v57  ;;  %v1609_v1 = vpack.c.bf16 %v1008_v13, %v1007_v8 }
 0x1ed   :  { %1636 = vst [vmem:[%s2735_s4 + $0x58] sm:$0xff] %v1544_v35   ;;  %1637 = vst [vmem:[%s2735_s4 + $0x60] sm:$0xff] %v1549_v16   ;;  %v1614_v60 = vpack.c.bf16 %v1010_v41, %v1009_v0  ;;  %v1619_v52 = vpack.c.bf16 %v1012_v25, %v1011_v37  ;;  %v1624_v12 = vpack.c.bf16 %v1014_v19, %v1013_v48 }
 0x1ee   :  { %1638 = vst [vmem:[%s2735_s4 + $0x68] sm:$0xff] %v1554_v61   ;;  %1639 = vst [vmem:[%s2735_s4 + $0x70] sm:$0xff] %v1559_v23  }
 0x1ef   :  { %1640 = vst [vmem:[%s2735_s4 + $0x78] sm:$0xff] %v1564_v40   ;;  %1641 = vst [vmem:[%s2735_s4 + $0x80] sm:$0xff] %v1569_v32  }
 0x1f0   :  { %1642 = vst [vmem:[%s2735_s4 + $0x88] sm:$0xff] %v1574_v7   ;;  %1643 = vst [vmem:[%s2735_s4 + $0x90] sm:$0xff] %v1579_v11  }
 0x1f1   :  { %1644 = vst [vmem:[%s2735_s4 + $0x98] sm:$0xff] %v1584_v15   ;;  %1645 = vst [vmem:[%s2735_s4 + $0xa0] sm:$0xff] %v1589_v31  }
 0x1f2   :  { %1646 = vst [vmem:[%s2735_s4 + $0xa8] sm:$0xff] %v1594_v56   ;;  %1647 = vst [vmem:[%s2735_s4 + $0xb0] sm:$0xff] %v1599_v20  }
 0x1f3   :  { %1648 = vst [vmem:[%s2735_s4 + $0xb8] sm:$0xff] %v1604_v36   ;;  %1649 = vst [vmem:[%s2735_s4 + $0xc0] sm:$0xff] %v1609_v1  }
 0x1f4   :  { %1650 = vst [vmem:[%s2735_s4 + $0xc8] sm:$0xff] %v1614_v60   ;;  %1651 = vst [vmem:[%s2735_s4 + $0xd0] sm:$0xff] %v1619_v52  }
 0x1f5   :  { %1652 = vst [vmem:[%s2735_s4 + $0xd8] sm:$0xff] %v1624_v12  }

// kernel: attention_network_coord_forward.4
= control target key start
LH: loop header
LB: loop body
LE: loop exit
PB: predicated region body
PF: predicated region fallthrough
CT: control target
= control target key end

     0   :  { %vm4718_vm0 = vmmov 0   ;;  %vm2290_vm1 = vcmask 523264   ;;  %s5904_s1 = inlined_call_operand.vmem [shape: bf16[3136,128], index: 1, kind: input, shape index: {}]   ;;  %s5905_s0 = inlined_call_operand.vmem [shape: bf16[72,3136], index: 0, kind: input, shape index: {}]   ;;  %s5906_s2 = inlined_call_operand.vmem [shape: f32[1,128], index: 2, kind: input, shape index: {}]   ;;  %s5907_s3 = inlined_call_operand.vmem [shape: f32[1,128], index: 3, kind: input, shape index: {}]   ;;  %s5908_s4 = inlined_call_operand.vmem [shape: bf16[72,128], index: 4, kind: output, shape index: {}]  }
   0x1   :  { %v4346_v0 = vld [vmem:[%s5904_s1 + $0x78] sm:$0xff]   ;;  %v4350_v4 = vld [vmem:[%s5904_s1 + $0x70] sm:$0xff]   ;;  %v4354_v8 = vld [vmem:[%s5904_s1 + $0x68] sm:$0xff]  }
   0x2   :  { %v4347_v1 = vld [vmem:[%s5904_s1 + $0xf8] sm:$0xff]   ;;  %3747 = vmatprep.subr.bf16.mxu0 %v4346_v0  ;;  %v4351_v5 = vld [vmem:[%s5904_s1 + $0xf0] sm:$0xff]   ;;  %v4355_v9 = vld [vmem:[%s5904_s1 + $0xe8] sm:$0xff]  }
   0x3   :  { %v4348_v2 = vld [vmem:[%s5904_s1 + $0x38] sm:$0xff]   ;;  %3793 = vmatprep.subr.bf16.mxu1 %v4347_v1  ;;  %v4352_v6 = vld [vmem:[%s5904_s1 + $0x30] sm:$0xff]   ;;  %v4356_v10 = vld [vmem:[%s5904_s1 + $0x28] sm:$0xff]  }
   0x4   :  { %v4349_v3 = vld [vmem:[%s5904_s1 + $0xb8] sm:$0xff]   ;;  %3748 = vmatpush3.bf16.msra.mxu0 %v4348_v2  ;;  %v4353_v7 = vld [vmem:[%s5904_s1 + $0xb0] sm:$0xff]   ;;  %v4357_v11 = vld [vmem:[%s5904_s1 + $0xa8] sm:$0xff]  }
   0x5   :  { %3794 = vmatpush3.bf16.msra.mxu1 %v4349_v3  ;;  %3749 = vmatprep.subr.bf16.mxu0 %v4350_v4  ;;  %v4358_v12 = vld [vmem:[%s5904_s1 + $0x60] sm:$0xff]   ;;  %v4362_v16 = vld [vmem:[%s5904_s1 + $0x58] sm:$0xff]   ;;  %v4366_v20 = vld [vmem:[%s5904_s1 + $0x50] sm:$0xff]  }
   0x6   :  { %3795 = vmatprep.subr.bf16.mxu1 %v4351_v5  ;;  %v4359_v13 = vld [vmem:[%s5904_s1 + $0xe0] sm:$0xff]   ;;  %v4363_v17 = vld [vmem:[%s5904_s1 + $0xd8] sm:$0xff]   ;;  %v4367_v21 = vld [vmem:[%s5904_s1 + $0xd0] sm:$0xff]  }
   0x7   :  { %v4360_v14 = vld [vmem:[%s5904_s1 + $0x20] sm:$0xff]   ;;  %v4364_v18 = vld [vmem:[%s5904_s1 + $0x18] sm:$0xff]   ;;  %v4368_v22 = vld [vmem:[%s5904_s1 + $0x10] sm:$0xff]  }
   0x8   :  { %3750 = vmatpush3.bf16.msra.mxu0 %v4352_v6  ;;  %v4361_v15 = vld [vmem:[%s5904_s1 + $0xa0] sm:$0xff]   ;;  %v4365_v19 = vld [vmem:[%s5904_s1 + $0x98] sm:$0xff]   ;;  %v4369_v23 = vld [vmem:[%s5904_s1 + $0x90] sm:$0xff]  }
   0x9   :  { %3796 = vmatpush3.bf16.msra.mxu1 %v4353_v7  ;;  %3751 = vmatprep.subr.bf16.mxu0 %v4354_v8  ;;  %v4370_v24 = vld [vmem:[%s5904_s1 + $0x48] sm:$0xff]   ;;  %v4374_v28 = vld [vmem:[%s5904_s1 + $0x40] sm:$0xff]   ;;  %v4384_v36 = vld [vmem:[%s5904_s1 + $0x178] sm:$0xff]  }
   0xa   :  { %3797 = vmatprep.subr.bf16.mxu1 %v4355_v9  ;;  %v4371_v25 = vld [vmem:[%s5904_s1 + $0xc8] sm:$0xff]   ;;  %v4375_v29 = vld [vmem:[%s5904_s1 + $0xc0] sm:$0xff]   ;;  %v4385_v37 = vld [vmem:[%s5904_s1 + $0x138] sm:$0xff]  }
   0xb   :  { %v4372_v26 = vld [vmem:[%s5904_s1 + $0x8] sm:$0xff]   ;;  %v4376_v30 = vld [vmem:[%s5904_s1] sm:$0xff]   ;;  %v4386_v38 = vld [vmem:[%s5904_s1 + $0x170] sm:$0xff]  }
   0xc   :  { %3752 = vmatpush3.bf16.msra.mxu0 %v4356_v10  ;;  %v4373_v27 = vld [vmem:[%s5904_s1 + $0x88] sm:$0xff]   ;;  %v4377_v31 = vld [vmem:[%s5904_s1 + $0x80] sm:$0xff]   ;;  %v4387_v39 = vld [vmem:[%s5904_s1 + $0x130] sm:$0xff]  }
   0xd   :  { %3798 = vmatpush3.bf16.msra.mxu1 %v4357_v11  ;;  %3753 = vmatprep.subr.bf16.mxu0 %v4358_v12  ;;  %v4378_v32 = vld [vmem:[%s5905_s0] ss:$100 sps:$4 sm:$0xff]   ;;  %v4381_v34 = vld [vmem:[%s5905_s0 + $0x8] ss:$100 sps:$4 sm:$0xff]   ;;  %v4390_v41 = vld [vmem:[%s5905_s0 + $0xd4] ss:$100 sps:$4 sm:$0xff]  }
   0xe   :  { %3799 = vmatprep.subr.bf16.mxu1 %v4359_v13  ;;  %v4380_v33 = vld [vmem:[%s5905_s0 + $0x4] ss:$100 sps:$4 sm:$0xff]   ;;  %v4383_v35 = vld [vmem:[%s5905_s0 + $0xc] ss:$100 sps:$4 sm:$0xff]   ;;  %v4394_v44 = vld [vmem:[%s5904_s1 + $0x1f8] sm:$0xff]  }
   0xf   :  { %2338 = vmatprep.mubr.bf16.mxu0 %v4380_v33  ;;  %2410 = vmatprep.mubr.bf16.mxu1 %v4383_v35  ;;  %v4388_v40 = vld [vmem:[%s5905_s0 + $0xcc] ss:$100 sps:$4 sm:$0xff]   ;;  %v4395_v45 = vld [vmem:[%s5904_s1 + $0x1b8] sm:$0xff]   ;;  %v4404_v52 = vld [vmem:[%s5904_s1 + $0x160] sm:$0xff]  }
  0x10   :  { %3754 = vmatpush3.bf16.msra.mxu0 %v4360_v14  ;;  %v4392_v42 = vld [vmem:[%s5905_s0 + $0xc8] ss:$100 sps:$4 sm:$0xff]   ;;  %v4393_v43 = vld [vmem:[%s5905_s0 + $0xd0] ss:$100 sps:$4 sm:$0xff]   ;;  %v4402_v51 = vld [vmem:[%s5905_s0 + $0x19c] ss:$100 sps:$4 sm:$0xff]  }
  0x11   :  { %3800 = vmatpush3.bf16.msra.mxu1 %v4361_v15  ;;  %3755 = vmatprep.subr.bf16.mxu0 %v4362_v16  ;;  %v4396_v46 = vld [vmem:[%s5904_s1 + $0x168] sm:$0xff]   ;;  %v4398_v48 = vld [vmem:[%s5904_s1 + $0x1f0] sm:$0xff]   ;;  %v4406_v54 = vld [vmem:[%s5905_s0 + $0x198] ss:$100 sps:$4 sm:$0xff]  }
  0x12   :  { %3801 = vmatprep.subr.bf16.mxu1 %v4363_v17  ;;  %v4397_v47 = vld [vmem:[%s5904_s1 + $0x128] sm:$0xff]   ;;  %v4399_v49 = vld [vmem:[%s5904_s1 + $0x1b0] sm:$0xff]   ;;  %v4407_v55 = vld [vmem:[%s5904_s1 + $0x120] sm:$0xff]  }
  0x13   :  { %v4400_v50 = vld [vmem:[%s5905_s0 + $0x194] ss:$100 sps:$4 sm:$0xff]   ;;  %v4408_v56 = vld [vmem:[%s5904_s1 + $0x1e8] sm:$0xff]   ;;  %v4411_v59 = vld [vmem:[%s5904_s1 + $0x1e0] sm:$0xff]  }
  0x14   :  { %3756 = vmatpush3.bf16.msra.mxu0 %v4364_v18  ;;  %v4405_v53 = vld [vmem:[%s5905_s0 + $0x190] ss:$100 sps:$4 sm:$0xff]   ;;  %v4409_v57 = vld [vmem:[%s5904_s1 + $0x1a8] sm:$0xff]   ;;  %v4410_v58 = vld [vmem:[%s5904_s1 + $0x158] sm:$0xff]  }
  0x15   :  { %3802 = vmatpush3.bf16.msra.mxu1 %v4365_v19  ;;  %3757 = vmatprep.subr.bf16.mxu0 %v4366_v20  ;;  %v4412_v60 = vld [vmem:[%s5904_s1 + $0x118] sm:$0xff]   ;;  %v4413_v61 = vld [vmem:[%s5904_s1 + $0x1a0] sm:$0xff]   ;;  %v4421_v3 = vld [vmem:[%s5904_s1 + $0x150] sm:$0xff]  }
  0x16   :  { %3803 = vmatprep.subr.bf16.mxu1 %v4367_v21  ;;  %v4414_v62 = vld [vmem:[%s5905_s0 + $0x25c] ss:$100 sps:$4 sm:$0xff]   ;;  %v4416_v63 = vld [vmem:[%s5905_s0 + $0x264] ss:$100 sps:$4 sm:$0xff]   ;;  %v4423_v5 = vld [vmem:[%s5904_s1 + $0x110] sm:$0xff]  }
  0x17   :  { %v4418_v0 = vld [vmem:[%s5905_s0 + $0x258] ss:$100 sps:$4 sm:$0xff]   ;;  %v4419_v1 = vld [vmem:[%s5905_s0 + $0x260] ss:$100 sps:$4 sm:$0xff]   ;;  %v4424_v6 = vld [vmem:[%s5904_s1 + $0x1d0] sm:$0xff]  }
  0x18   :  { %3758 = vmatpush3.bf16.msra.mxu0 %v4368_v22  ;;  %v4420_v2 = vld [vmem:[%s5904_s1 + $0x1d8] sm:$0xff]   ;;  %v4425_v7 = vld [vmem:[%s5904_s1 + $0x190] sm:$0xff]   ;;  %v4426_v8 = vld [vmem:[%s5904_s1 + $0x148] sm:$0xff]  }
  0x19   :  { %3804 = vmatpush3.bf16.msra.mxu1 %v4369_v23  ;;  %3759 = vmatprep.subr.bf16.mxu0 %v4370_v24  ;;  %v4422_v4 = vld [vmem:[%s5904_s1 + $0x198] sm:$0xff]   ;;  %v122_v9 = vld [vmem:[%s5905_s0 + $0x320] sm:$0xff]  ;;  %v123_v11 = vld [vmem:[%s5905_s0 + $0x328] sm:$0xff] }
  0x1a   :  { %3805 = vmatprep.subr.bf16.mxu1 %v4371_v25  ;;  %v3481_v10 = vcombine.high %v122_v9, %v122_v9  ;;  %v3480_v12 = vcombine.low %v122_v9, %v122_v9  ;;  %v3483_v13 = vcombine.high %v123_v11, %v123_v11  ;;  %v4429_v14 = vld [vmem:[%s5904_s1 + $0x108] sm:$0xff]   ;;  %v3482_v15 = vcombine.low %v123_v11, %v123_v11  ;;  %v4434_v18 = vld [vmem:[%s5904_s1 + $0x140] sm:$0xff]   ;;  %v4438_v22 = vld [vmem:[%s5905_s0 + $0x10] ss:$100 sps:$4 sm:$0xff]  }
  0x1b   :  { %v4432_v16 = vld [vmem:[%s5904_s1 + $0x1c8] sm:$0xff]   ;;  %v4435_v19 = vld [vmem:[%s5904_s1 + $0x100] sm:$0xff]   ;;  %v4440_v23 = vld [vmem:[%s5905_s0 + $0x14] ss:$100 sps:$4 sm:$0xff]  }
  0x1c   :  { %3760 = vmatpush3.bf16.msra.mxu0 %v4372_v26  ;;  %v4433_v17 = vld [vmem:[%s5904_s1 + $0x188] sm:$0xff]   ;;  %v4436_v20 = vld [vmem:[%s5904_s1 + $0x1c0] sm:$0xff]   ;;  %v4441_v24 = vld [vmem:[%s5905_s0 + $0x18] ss:$100 sps:$4 sm:$0xff]  }
  0x1d   :  { %3806 = vmatpush3.bf16.msra.mxu1 %v4373_v27  ;;  %3761 = vmatprep.subr.bf16.mxu0 %v4374_v28  ;;  %v4437_v21 = vld [vmem:[%s5904_s1 + $0x180] sm:$0xff]   ;;  %v4444_v26 = vld [vmem:[%s5904_s1 + $0x278] sm:$0xff]   ;;  %v4446_v28 = vld [vmem:[%s5904_s1 + $0x270] sm:$0xff]  }
  0x1e   :  { %3807 = vmatprep.subr.bf16.mxu1 %v4375_v29  ;;  %v4443_v25 = vld [vmem:[%s5905_s0 + $0x1c] ss:$100 sps:$4 sm:$0xff]   ;;  %v4447_v29 = vld [vmem:[%s5904_s1 + $0x230] sm:$0xff]  }
  0x1f   :  { %v4445_v27 = vld [vmem:[%s5904_s1 + $0x238] sm:$0xff]   ;;  %v4453_v33 = vld [vmem:[%s5905_s0 + $0xe0] ss:$100 sps:$4 sm:$0xff]  }
  0x20   :  { %3762 = vmatpush3.bf16.msra.mxu0 %v4376_v30  ;;  %v4448_v30 = vld [vmem:[%s5905_s0 + $0xdc] ss:$100 sps:$4 sm:$0xff]  }
  0x21   :  { %3808 = vmatpush3.bf16.msra.mxu1 %v4377_v31  ;;  %3839 = vmatprep.subr.bf16.mxu0 %v4384_v36  ;;  %v4450_v31 = vld [vmem:[%s5905_s0 + $0xe4] ss:$100 sps:$4 sm:$0xff]   ;;  %v4455_v35 = vld [vmem:[%s5904_s1 + $0x2b8] sm:$0xff]  }
  0x22   :  { %3885 = vmatprep.subr.bf16.mxu1 %v4394_v44  ;;  %v4456_v36 = vld [vmem:[%s5904_s1 + $0x268] sm:$0xff]   ;;  %v4495_v9 = vld [vmem:[%s5904_s1 + $0x200] sm:$0xff]  }
  0x23   :  { %2339 = vmatmul.mubr.bf16.vlgmr.msra.gmra.mxu0 %v4378_v32  ;;  %v4452_v32 = vld [vmem:[%s5905_s0 + $0xd8] ss:$100 sps:$4 sm:$0xff]   ;;  %v4466_v44 = vld [vmem:[%s5905_s0 + $0x1a8] ss:$100 sps:$4 sm:$0xff]   ;;  %v4497_v11 = vld [vmem:[%s5904_s1 + $0x280] sm:$0xff]  }
  0x24   :  { %2411 = vmatmul.mubr.bf16.vlgmr.msra.gmra.mxu1 %v4381_v34  ;;  %3840 = vmatpush3.bf16.msra.mxu0 %v4385_v37  ;;  %v4454_v34 = vld [vmem:[%s5904_s1 + $0x2f8] sm:$0xff]   ;;  %v4457_v37 = vld [vmem:[%s5904_s1 + $0x228] sm:$0xff]  }
  0x25   :  { %3841 = vmatprep.subr.bf16.mxu0 %v4386_v38  ;;  %2346 = vmatprep.mubr.bf16.mxu0 %v4388_v40  ;;  %v4458_v38 = vld [vmem:[%s5904_s1 + $0x2f0] sm:$0xff]   ;;  %v4460_v40 = vld [vmem:[%s5905_s0 + $0x1a4] ss:$100 sps:$4 sm:$0xff]  }
  0x26   :  { %2418 = vmatprep.mubr.bf16.mxu1 %v4390_v41  ;;  %3886 = vmatpush3.bf16.msra.mxu1 %v4395_v45  ;;  %v4462_v41 = vld [vmem:[%s5905_s0 + $0x1ac] ss:$100 sps:$4 sm:$0xff]   ;;  %v4467_v45 = vld [vmem:[%s5904_s1 + $0x220] sm:$0xff]  }
  0x27   :  { %3887 = vmatprep.subr.bf16.mxu1 %v4398_v48  ;;  %v4470_v48 = vld [vmem:[%s5904_s1 + $0x258] sm:$0xff]  }
  0x28   :  { %3842 = vmatpush3.bf16.msra.mxu0 %v4387_v39  ;;  %v4459_v39 = vld [vmem:[%s5904_s1 + $0x2b0] sm:$0xff]  }
  0x29   :  { %3843 = vmatprep.subr.bf16.mxu0 %v4396_v46  ;;  %v4468_v46 = vld [vmem:[%s5904_s1 + $0x2e8] sm:$0xff]  }
  0x2a   :  { %3888 = vmatpush3.bf16.msra.mxu1 %v4399_v49  ;;  %v4471_v49 = vld [vmem:[%s5904_s1 + $0x2e0] sm:$0xff]  }
  0x2b   :  { %2347 = vmatmul.mubr.bf16.gmra.mxu0 %v4392_v42  ;;  %3889 = vmatprep.subr.bf16.mxu1 %v4408_v56  ;;  %v4464_v42 = vld [vmem:[%s5904_s1 + $0x260] sm:$0xff]   ;;  %v4480_v56 = vld [vmem:[%s5904_s1 + $0x2d8] sm:$0xff]  }
  0x2c   :  { %2419 = vmatmul.mubr.bf16.gmra.mxu1 %v4393_v43  ;;  %3844 = vmatpush3.bf16.msra.mxu0 %v4397_v47  ;;  %v4465_v43 = vld [vmem:[%s5905_s0 + $0x1a0] ss:$100 sps:$4 sm:$0xff]   ;;  %v4469_v47 = vld [vmem:[%s5904_s1 + $0x2a8] sm:$0xff]  }
  0x2d   :  { %2354 = vmatprep.mubr.bf16.mxu0 %v4400_v50  ;;  %2426 = vmatprep.mubr.bf16.mxu1 %v4402_v51  ;;  %v4472_v50 = vld [vmem:[%s5904_s1 + $0x218] sm:$0xff]   ;;  %v4473_v51 = vld [vmem:[%s5904_s1 + $0x2a0] sm:$0xff]  }
  0x2e   :  { %3845 = vmatprep.subr.bf16.mxu0 %v4404_v52  ;;  %3890 = vmatpush3.bf16.msra.mxu1 %v4409_v57  ;;  %v4474_v52 = vld [vmem:[%s5905_s0 + $0x26c] ss:$100 sps:$4 sm:$0xff]  }
  0x2f   :  { %3891 = vmatprep.subr.bf16.mxu1 %v4411_v59  ;;  %v4481_v57 = vld [vmem:[%s5904_s1 + $0x250] sm:$0xff]  }
  0x30   :  { %3846 = vmatpush3.bf16.msra.mxu0 %v4407_v55  ;;  %v4479_v55 = vld [vmem:[%s5905_s0 + $0x270] ss:$100 sps:$4 sm:$0xff]  }
  0x31   :  { %3847 = vmatprep.subr.bf16.mxu0 %v4410_v58  ;;  %v4482_v58 = vld [vmem:[%s5904_s1 + $0x298] sm:$0xff]   ;;  %v4483_v59 = vld [vmem:[%s5904_s1 + $0x210] sm:$0xff]  }
  0x32   :  { %3892 = vmatpush3.bf16.msra.mxu1 %v4413_v61  ;;  %v4485_v61 = vld [vmem:[%s5904_s1 + $0x290] sm:$0xff]  }
  0x33   :  { %2355 = vmatmul.mubr.bf16.gmra.mxu0 %v4405_v53  ;;  %3893 = vmatprep.subr.bf16.mxu1 %v4420_v2  ;;  %v4476_v53 = vld [vmem:[%s5905_s0 + $0x274] ss:$100 sps:$4 sm:$0xff]  }
  0x34   :  { %2427 = vmatmul.mubr.bf16.gmra.mxu1 %v4406_v54  ;;  %3848 = vmatpush3.bf16.msra.mxu0 %v4412_v60  ;;  %v4478_v54 = vld [vmem:[%s5905_s0 + $0x268] ss:$100 sps:$4 sm:$0xff]   ;;  %v4484_v60 = vld [vmem:[%s5904_s1 + $0x2d0] sm:$0xff]  }
  0x35   :  { %2362 = vmatprep.mubr.bf16.mxu0 %v4414_v62  ;;  %2434 = vmatprep.mubr.bf16.mxu1 %v4416_v63  ;;  %v4486_v62 = vld [vmem:[%s5904_s1 + $0x248] sm:$0xff]   ;;  %v124_v63 = vld [vmem:[%s5905_s0 + $0x330] sm:$0xff] }
  0x36   :  { %3849 = vmatprep.subr.bf16.mxu0 %v4421_v3  ;;  %3894 = vmatpush3.bf16.msra.mxu1 %v4422_v4  ;;  %v4489_v3 = vld [vmem:[%s5904_s1 + $0x208] sm:$0xff]   ;;  %v3484_v4 = vcombine.low %v124_v63, %v124_v63 }
  0x37   :  { %3895 = vmatprep.subr.bf16.mxu1 %v4424_v6  ;;  %v4492_v6 = vld [vmem:[%s5904_s1 + $0x2c8] sm:$0xff]  }
  0x38   :  { %3850 = vmatpush3.bf16.msra.mxu0 %v4423_v5 }
  0x39   :  { %3851 = vmatprep.subr.bf16.mxu0 %v4426_v8  ;;  %v4494_v8 = vld [vmem:[%s5904_s1 + $0x240] sm:$0xff]  }
  0x3a   :  { %3896 = vmatpush3.bf16.msra.mxu1 %v4425_v7  ;;  %v4493_v7 = vld [vmem:[%s5904_s1 + $0x288] sm:$0xff]  }
  0x3b   :  { %2363 = vmatmul.mubr.bf16.gmra.mxu0 %v4418_v0  ;;  %3897 = vmatprep.subr.bf16.mxu1 %v4432_v16  ;;  %v125_v0 = vld [vmem:[%s5905_s0 + $0x338] sm:$0xff] }
  0x3c   :  { %2435 = vmatmul.mubr.bf16.gmra.mxu1 %v4419_v1  ;;  %2370 = vmatprep.mubr.bf16.mxu0 %v3481_v10  ;;  %v3485_v1 = vcombine.high %v124_v63, %v124_v63  ;;  %v3487_v2 = vcombine.high %v125_v0, %v125_v0  ;;  %v3486_v5 = vcombine.low %v125_v0, %v125_v0  ;;  %v4496_v10 = vld [vmem:[%s5904_s1 + $0x2c0] sm:$0xff]   ;;  %v4504_v16 = vld [vmem:[%s5904_s1 + $0x378] sm:$0xff]  }
  0x3d   :  { %2442 = vmatprep.mubr.bf16.mxu1 %v3483_v13  ;;  %3852 = vmatpush3.bf16.msra.mxu0 %v4429_v14  ;;  %v4500_v13 = vld [vmem:[%s5905_s0 + $0x24] ss:$100 sps:$4 sm:$0xff]  }
  0x3e   :  { %3898 = vmatpush3.bf16.msra.mxu1 %v4433_v17  ;;  %3853 = vmatprep.subr.bf16.mxu0 %v4434_v18  ;;  %v4501_v14 = vld [vmem:[%s5905_s0 + $0x28] ss:$100 sps:$4 sm:$0xff]   ;;  %v4505_v17 = vld [vmem:[%s5904_s1 + $0x338] sm:$0xff]   ;;  %v4506_v18 = vld [vmem:[%s5904_s1 + $0x370] sm:$0xff]  }
  0x3f   :  { %3899 = vmatprep.subr.bf16.mxu1 %v4436_v20  ;;  %v4508_v20 = vld [vmem:[%s5905_s0 + $0xec] ss:$100 sps:$4 sm:$0xff]   ;;  %v4555_v63 = vld [vmem:[%s5904_s1 + $0x300] sm:$0xff]  }
  0x40   :  { %v4556_v0 = vld [vmem:[%s5904_s1 + $0x3c0] sm:$0xff]  }
  0x41   :  { %3854 = vmatpush3.bf16.msra.mxu0 %v4435_v19  ;;  %v4507_v19 = vld [vmem:[%s5904_s1 + $0x330] sm:$0xff]  }
  0x42   :  { %3900 = vmatpush3.bf16.msra.mxu1 %v4437_v21  ;;  %3931 = vmatprep.subr.bf16.mxu0 %v4444_v26  ;;  %v4510_v21 = vld [vmem:[%s5905_s0 + $0xf4] ss:$100 sps:$4 sm:$0xff]   ;;  %v4516_v26 = vld [vmem:[%s5904_s1 + $0x368] sm:$0xff]  }
  0x43   :  { %2371 = vmatmul.mubr.bf16.gmra.mxu0 %v3480_v12  ;;  %3977 = vmatprep.subr.bf16.mxu1 %v4454_v34  ;;  %v4498_v12 = vld [vmem:[%s5905_s0 + $0x20] ss:$100 sps:$4 sm:$0xff]   ;;  %v4526_v34 = vld [vmem:[%s5905_s0 + $0x1b8] ss:$100 sps:$4 sm:$0xff]  }
  0x44   :  { %2443 = vmatmul.mubr.bf16.gmra.mxu1 %v3482_v15  ;;  %2482 = vmatprep.mubr.bf16.mxu0 %v4440_v23  ;;  %v4503_v15 = vld [vmem:[%s5905_s0 + $0x2c] ss:$100 sps:$4 sm:$0xff]  }
  0x45   :  { %2554 = vmatprep.mubr.bf16.mxu1 %v4443_v25  ;;  %v4513_v23 = vld [vmem:[%s5905_s0 + $0xf0] ss:$100 sps:$4 sm:$0xff]   ;;  %v4515_v25 = vld [vmem:[%s5904_s1 + $0x3b8] sm:$0xff]  }
  0x4b   :  { %2483 = vmatmul.mubr.bf16.vlgmr.msra.gmra.mxu0 %v4438_v22  ;;  %v4512_v22 = vld [vmem:[%s5905_s0 + $0xe8] ss:$100 sps:$4 sm:$0xff]  }
  0x4c   :  { %2555 = vmatmul.mubr.bf16.vlgmr.msra.gmra.mxu1 %v4441_v24  ;;  %3932 = vmatpush3.bf16.msra.mxu0 %v4445_v27  ;;  %v4514_v24 = vld [vmem:[%s5904_s1 + $0x3f8] sm:$0xff]   ;;  %v4517_v27 = vld [vmem:[%s5904_s1 + $0x328] sm:$0xff]  }
  0x4d   :  { %3933 = vmatprep.subr.bf16.mxu0 %v4446_v28  ;;  %2490 = vmatprep.mubr.bf16.mxu0 %v4448_v30  ;;  %v4518_v28 = vld [vmem:[%s5904_s1 + $0x3f0] sm:$0xff]  }
  0x4e   :  { %2562 = vmatprep.mubr.bf16.mxu1 %v4450_v31  ;;  %3978 = vmatpush3.bf16.msra.mxu1 %v4455_v35  ;;  %v4520_v30 = vld [vmem:[%s5905_s0 + $0x1b4] ss:$100 sps:$4 sm:$0xff]   ;;  %v4522_v31 = vld [vmem:[%s5905_s0 + $0x1bc] ss:$100 sps:$4 sm:$0xff]  }
  0x4f   :  { %3979 = vmatprep.subr.bf16.mxu1 %v4458_v38  ;;  %v4527_v35 = vld [vmem:[%s5904_s1 + $0x320] sm:$0xff]   ;;  %v4530_v38 = vld [vmem:[%s5904_s1 + $0x358] sm:$0xff]  }
  0x50   :  { %3934 = vmatpush3.bf16.msra.mxu0 %v4447_v29  ;;  %v4519_v29 = vld [vmem:[%s5904_s1 + $0x3b0] sm:$0xff]  }
  0x51   :  { %3935 = vmatprep.subr.bf16.mxu0 %v4456_v36  ;;  %v4528_v36 = vld [vmem:[%s5904_s1 + $0x3e8] sm:$0xff]  }
  0x52   :  { %3980 = vmatpush3.bf16.msra.mxu1 %v4459_v39  ;;  %v4531_v39 = vld [vmem:[%s5904_s1 + $0x3e0] sm:$0xff]  }
  0x53   :  { %2491 = vmatmul.mubr.bf16.gmra.mxu0 %v4452_v32  ;;  %3981 = vmatprep.subr.bf16.mxu1 %v4468_v46  ;;  %v4524_v32 = vld [vmem:[%s5904_s1 + $0x360] sm:$0xff]   ;;  %v4540_v46 = vld [vmem:[%s5904_s1 + $0x3d8] sm:$0xff]  }
  0x54   :  { %2563 = vmatmul.mubr.bf16.gmra.mxu1 %v4453_v33  ;;  %3936 = vmatpush3.bf16.msra.mxu0 %v4457_v37  ;;  %v4525_v33 = vld [vmem:[%s5905_s0 + $0x1b0] ss:$100 sps:$4 sm:$0xff]   ;;  %v4529_v37 = vld [vmem:[%s5904_s1 + $0x3a8] sm:$0xff]  }
  0x55   :  { %2498 = vmatprep.mubr.bf16.mxu0 %v4460_v40  ;;  %2570 = vmatprep.mubr.bf16.mxu1 %v4462_v41  ;;  %v4532_v40 = vld [vmem:[%s5904_s1 + $0x318] sm:$0xff]   ;;  %v4533_v41 = vld [vmem:[%s5904_s1 + $0x3a0] sm:$0xff]  }
  0x56   :  { %3937 = vmatprep.subr.bf16.mxu0 %v4464_v42  ;;  %3982 = vmatpush3.bf16.msra.mxu1 %v4469_v47  ;;  %v4534_v42 = vld [vmem:[%s5905_s0 + $0x27c] ss:$100 sps:$4 sm:$0xff]   ;;  %v4541_v47 = vld [vmem:[%s5904_s1 + $0x350] sm:$0xff]  }
  0x57   :  { %3983 = vmatprep.subr.bf16.mxu1 %v4471_v49  ;;  %v4543_v49 = vld [vmem:[%s5904_s1 + $0x310] sm:$0xff]  }
  0x58   :  { %3938 = vmatpush3.bf16.msra.mxu0 %v4467_v45  ;;  %v4539_v45 = vld [vmem:[%s5905_s0 + $0x280] ss:$100 sps:$4 sm:$0xff]  }
  0x59   :  { %3939 = vmatprep.subr.bf16.mxu0 %v4470_v48  ;;  %v4542_v48 = vld [vmem:[%s5904_s1 + $0x398] sm:$0xff]  }
  0x5a   :  { %3984 = vmatpush3.bf16.msra.mxu1 %v4473_v51  ;;  %v4545_v51 = vld [vmem:[%s5904_s1 + $0x390] sm:$0xff]  }
  0x5b   :  { %2499 = vmatmul.mubr.bf16.gmra.mxu0 %v4465_v43  ;;  %3985 = vmatprep.subr.bf16.mxu1 %v4480_v56  ;;  %v4536_v43 = vld [vmem:[%s5905_s0 + $0x284] ss:$100 sps:$4 sm:$0xff]  }
  0x5c   :  { %2571 = vmatmul.mubr.bf16.gmra.mxu1 %v4466_v44  ;;  %3940 = vmatpush3.bf16.msra.mxu0 %v4472_v50  ;;  %v4538_v44 = vld [vmem:[%s5905_s0 + $0x278] ss:$100 sps:$4 sm:$0xff]   ;;  %v4544_v50 = vld [vmem:[%s5904_s1 + $0x3d0] sm:$0xff]  }
  0x5d   :  { %2506 = vmatprep.mubr.bf16.mxu0 %v4474_v52  ;;  %2578 = vmatprep.mubr.bf16.mxu1 %v4476_v53  ;;  %v4546_v52 = vld [vmem:[%s5904_s1 + $0x348] sm:$0xff]   ;;  %v126_v53 = vld [vmem:[%s5905_s0 + $0x340] sm:$0xff] }
  0x5e   :  { %3941 = vmatprep.subr.bf16.mxu0 %v4481_v57  ;;  %3986 = vmatpush3.bf16.msra.mxu1 %v4482_v58  ;;  %v4549_v57 = vld [vmem:[%s5904_s1 + $0x308] sm:$0xff]   ;;  %v3488_v58 = vcombine.low %v126_v53, %v126_v53 }
  0x5f   :  { %3987 = vmatprep.subr.bf16.mxu1 %v4484_v60  ;;  %v4552_v60 = vld [vmem:[%s5904_s1 + $0x3c8] sm:$0xff]  }
  0x60   :  { %3942 = vmatpush3.bf16.msra.mxu0 %v4483_v59 }
  0x61   :  { %3943 = vmatprep.subr.bf16.mxu0 %v4486_v62  ;;  %v4554_v62 = vld [vmem:[%s5904_s1 + $0x340] sm:$0xff]  }
  0x62   :  { %3988 = vmatpush3.bf16.msra.mxu1 %v4485_v61  ;;  %v4553_v61 = vld [vmem:[%s5904_s1 + $0x388] sm:$0xff]  }
  0x63   :  { %2507 = vmatmul.mubr.bf16.gmra.mxu0 %v4478_v54  ;;  %3989 = vmatprep.subr.bf16.mxu1 %v4492_v6  ;;  %v127_v54 = vld [vmem:[%s5905_s0 + $0x348] sm:$0xff]  ;;  %v4564_v6 = vld [vmem:[%s5904_s1 + $0x478] sm:$0xff]  }
  0x64   :  { %2579 = vmatmul.mubr.bf16.gmra.mxu1 %v4479_v55  ;;  %2514 = vmatprep.mubr.bf16.mxu0 %v3485_v1  ;;  %v3489_v55 = vcombine.high %v126_v53, %v126_v53  ;;  %v3491_v56 = vcombine.high %v127_v54, %v127_v54  ;;  %v3490_v59 = vcombine.low %v127_v54, %v127_v54  ;;  %v4557_v1 = vld [vmem:[%s5904_s1 + $0x380] sm:$0xff]  }
  0x65   :  { %2586 = vmatprep.mubr.bf16.mxu1 %v3487_v2  ;;  %3944 = vmatpush3.bf16.msra.mxu0 %v4489_v3  ;;  %v4558_v2 = vld [vmem:[%s5905_s0 + $0x30] ss:$100 sps:$4 sm:$0xff]   ;;  %v4615_v53 = vld [vmem:[%s5904_s1 + $0x400] sm:$0xff]  }
  0x66   :  { %3990 = vmatpush3.bf16.msra.mxu1 %v4493_v7  ;;  %3945 = vmatprep.subr.bf16.mxu0 %v4494_v8  ;;  %v4560_v3 = vld [vmem:[%s5905_s0 + $0x34] ss:$100 sps:$4 sm:$0xff]   ;;  %v4616_v54 = vld [vmem:[%s5904_s1 + $0x4c0] sm:$0xff]  }
  0x67   :  { %3991 = vmatprep.subr.bf16.mxu1 %v4496_v10  ;;  %v4565_v7 = vld [vmem:[%s5904_s1 + $0x438] sm:$0xff]   ;;  %v4566_v8 = vld [vmem:[%s5904_s1 + $0x470] sm:$0xff]  }
  0x68   :  { %v4568_v10 = vld [vmem:[%s5905_s0 + $0xfc] ss:$100 sps:$4 sm:$0xff]  }
  0x69   :  { %3946 = vmatpush3.bf16.msra.mxu0 %v4495_v9  ;;  %v4567_v9 = vld [vmem:[%s5904_s1 + $0x430] sm:$0xff]  }
  0x6a   :  { %3992 = vmatpush3.bf16.msra.mxu1 %v4497_v11  ;;  %4023 = vmatprep.subr.bf16.mxu0 %v4504_v16  ;;  %v4570_v11 = vld [vmem:[%s5905_s0 + $0x104] ss:$100 sps:$4 sm:$0xff]  }
  0x6b   :  { %2515 = vmatmul.mubr.bf16.gmra.mxu0 %v3484_v4  ;;  %4069 = vmatprep.subr.bf16.mxu1 %v4514_v24  ;;  %v4561_v4 = vld [vmem:[%s5905_s0 + $0x38] ss:$100 sps:$4 sm:$0xff]   ;;  %v4576_v16 = vld [vmem:[%s5904_s1 + $0x468] sm:$0xff]  }
  0x6c   :  { %2587 = vmatmul.mubr.bf16.gmra.mxu1 %v3486_v5  ;;  %2626 = vmatprep.mubr.bf16.mxu0 %v4500_v13  ;;  %v4563_v5 = vld [vmem:[%s5905_s0 + $0x3c] ss:$100 sps:$4 sm:$0xff]   ;;  %v4586_v24 = vld [vmem:[%s5905_s0 + $0x1c8] ss:$100 sps:$4 sm:$0xff]  }
  0x6d   :  { %2698 = vmatprep.mubr.bf16.mxu1 %v4503_v15  ;;  %v4573_v13 = vld [vmem:[%s5905_s0 + $0x100] ss:$100 sps:$4 sm:$0xff]   ;;  %v4575_v15 = vld [vmem:[%s5904_s1 + $0x4b8] sm:$0xff]  }
  0x73   :  { %2627 = vmatmul.mubr.bf16.vlgmr.msra.gmra.mxu0 %v4498_v12  ;;  %v4572_v12 = vld [vmem:[%s5905_s0 + $0xf8] ss:$100 sps:$4 sm:$0xff]  }
  0x74   :  { %2699 = vmatmul.mubr.bf16.vlgmr.msra.gmra.mxu1 %v4501_v14  ;;  %4024 = vmatpush3.bf16.msra.mxu0 %v4505_v17  ;;  %v4574_v14 = vld [vmem:[%s5904_s1 + $0x4f8] sm:$0xff]   ;;  %v4577_v17 = vld [vmem:[%s5904_s1 + $0x428] sm:$0xff]  }
  0x75   :  { %4025 = vmatprep.subr.bf16.mxu0 %v4506_v18  ;;  %2634 = vmatprep.mubr.bf16.mxu0 %v4508_v20  ;;  %v4578_v18 = vld [vmem:[%s5904_s1 + $0x4f0] sm:$0xff]   ;;  %v4580_v20 = vld [vmem:[%s5905_s0 + $0x1c4] ss:$100 sps:$4 sm:$0xff]  }
  0x76   :  { %2706 = vmatprep.mubr.bf16.mxu1 %v4510_v21  ;;  %4070 = vmatpush3.bf16.msra.mxu1 %v4515_v25  ;;  %v4582_v21 = vld [vmem:[%s5905_s0 + $0x1cc] ss:$100 sps:$4 sm:$0xff]   ;;  %v4587_v25 = vld [vmem:[%s5904_s1 + $0x420] sm:$0xff]  }
  0x77   :  { %4071 = vmatprep.subr.bf16.mxu1 %v4518_v28  ;;  %v4590_v28 = vld [vmem:[%s5904_s1 + $0x458] sm:$0xff]  }
  0x78   :  { %4026 = vmatpush3.bf16.msra.mxu0 %v4507_v19  ;;  %v4579_v19 = vld [vmem:[%s5904_s1 + $0x4b0] sm:$0xff]  }
  0x79   :  { %4027 = vmatprep.subr.bf16.mxu0 %v4516_v26  ;;  %v4588_v26 = vld [vmem:[%s5904_s1 + $0x4e8] sm:$0xff]  }
  0x7a   :  { %4072 = vmatpush3.bf16.msra.mxu1 %v4519_v29  ;;  %v4591_v29 = vld [vmem:[%s5904_s1 + $0x4e0] sm:$0xff]  }
  0x7b   :  { %2635 = vmatmul.mubr.bf16.gmra.mxu0 %v4512_v22  ;;  %4073 = vmatprep.subr.bf16.mxu1 %v4528_v36  ;;  %v4584_v22 = vld [vmem:[%s5904_s1 + $0x460] sm:$0xff]   ;;  %v4600_v36 = vld [vmem:[%s5904_s1 + $0x4d8] sm:$0xff]  }
  0x7c   :  { %2707 = vmatmul.mubr.bf16.gmra.mxu1 %v4513_v23  ;;  %4028 = vmatpush3.bf16.msra.mxu0 %v4517_v27  ;;  %v4585_v23 = vld [vmem:[%s5905_s0 + $0x1c0] ss:$100 sps:$4 sm:$0xff]   ;;  %v4589_v27 = vld [vmem:[%s5904_s1 + $0x4a8] sm:$0xff]  }
  0x7d   :  { %2642 = vmatprep.mubr.bf16.mxu0 %v4520_v30  ;;  %2714 = vmatprep.mubr.bf16.mxu1 %v4522_v31  ;;  %v4592_v30 = vld [vmem:[%s5904_s1 + $0x418] sm:$0xff]   ;;  %v4593_v31 = vld [vmem:[%s5904_s1 + $0x4a0] sm:$0xff]  }
  0x7e   :  { %4029 = vmatprep.subr.bf16.mxu0 %v4524_v32  ;;  %4074 = vmatpush3.bf16.msra.mxu1 %v4529_v37  ;;  %v4594_v32 = vld [vmem:[%s5905_s0 + $0x28c] ss:$100 sps:$4 sm:$0xff]  }
  0x7f   :  { %4075 = vmatprep.subr.bf16.mxu1 %v4531_v39  ;;  %v4601_v37 = vld [vmem:[%s5904_s1 + $0x450] sm:$0xff]  }
  0x80   :  { %4030 = vmatpush3.bf16.msra.mxu0 %v4527_v35  ;;  %v4599_v35 = vld [vmem:[%s5905_s0 + $0x290] ss:$100 sps:$4 sm:$0xff]  }
  0x81   :  { %4031 = vmatprep.subr.bf16.mxu0 %v4530_v38  ;;  %v4602_v38 = vld [vmem:[%s5904_s1 + $0x498] sm:$0xff]   ;;  %v4603_v39 = vld [vmem:[%s5904_s1 + $0x410] sm:$0xff]  }
  0x82   :  { %4076 = vmatpush3.bf16.msra.mxu1 %v4533_v41  ;;  %v4605_v41 = vld [vmem:[%s5904_s1 + $0x490] sm:$0xff]  }
  0x83   :  { %2643 = vmatmul.mubr.bf16.gmra.mxu0 %v4525_v33  ;;  %4077 = vmatprep.subr.bf16.mxu1 %v4540_v46  ;;  %v4596_v33 = vld [vmem:[%s5905_s0 + $0x294] ss:$100 sps:$4 sm:$0xff]  }
  0x84   :  { %2715 = vmatmul.mubr.bf16.gmra.mxu1 %v4526_v34  ;;  %4032 = vmatpush3.bf16.msra.mxu0 %v4532_v40  ;;  %v4598_v34 = vld [vmem:[%s5905_s0 + $0x288] ss:$100 sps:$4 sm:$0xff]   ;;  %v4604_v40 = vld [vmem:[%s5904_s1 + $0x4d0] sm:$0xff]  }
  0x85   :  { %2650 = vmatprep.mubr.bf16.mxu0 %v4534_v42  ;;  %2722 = vmatprep.mubr.bf16.mxu1 %v4536_v43  ;;  %v4606_v42 = vld [vmem:[%s5904_s1 + $0x448] sm:$0xff]   ;;  %v128_v43 = vld [vmem:[%s5905_s0 + $0x350] sm:$0xff] }
  0x86   :  { %4033 = vmatprep.subr.bf16.mxu0 %v4541_v47  ;;  %4078 = vmatpush3.bf16.msra.mxu1 %v4542_v48  ;;  %v3492_v46 = vcombine.low %v128_v43, %v128_v43  ;;  %v4609_v48 = vld [vmem:[%s5904_s1 + $0x408] sm:$0xff]  }
  0x87   :  { %4079 = vmatprep.subr.bf16.mxu1 %v4544_v50  ;;  %v4612_v50 = vld [vmem:[%s5904_s1 + $0x4c8] sm:$0xff]  }
  0x88   :  { %4034 = vmatpush3.bf16.msra.mxu0 %v4543_v49 }
  0x89   :  { %4035 = vmatprep.subr.bf16.mxu0 %v4546_v52  ;;  %v4614_v52 = vld [vmem:[%s5904_s1 + $0x440] sm:$0xff]  }
  0x8a   :  { %4080 = vmatpush3.bf16.msra.mxu1 %v4545_v51  ;;  %v4613_v51 = vld [vmem:[%s5904_s1 + $0x488] sm:$0xff]  }
  0x8b   :  { %2651 = vmatmul.mubr.bf16.gmra.mxu0 %v4538_v44  ;;  %4081 = vmatprep.subr.bf16.mxu1 %v4552_v60  ;;  %v3493_v44 = vcombine.high %v128_v43, %v128_v43  ;;  %v4624_v60 = vld [vmem:[%s5904_s1 + $0x578] sm:$0xff]   ;;  %v4663_v43 = vld [vmem:[%s5904_s1 + $0x510] sm:$0xff]  }
  0x8c   :  { %2723 = vmatmul.mubr.bf16.gmra.mxu1 %v4539_v45  ;;  %2658 = vmatprep.mubr.bf16.mxu0 %v3489_v55  ;;  %v129_v45 = vld [vmem:[%s5905_s0 + $0x358] sm:$0xff]  ;;  %v4617_v55 = vld [vmem:[%s5904_s1 + $0x480] sm:$0xff]  }
  0x8d   :  { %2730 = vmatprep.mubr.bf16.mxu1 %v3491_v56  ;;  %4036 = vmatpush3.bf16.msra.mxu0 %v4549_v57  ;;  %v3495_v47 = vcombine.high %v129_v45, %v129_v45  ;;  %v3494_v49 = vcombine.low %v129_v45, %v129_v45  ;;  %v4618_v56 = vld [vmem:[%s5905_s0 + $0x40] ss:$100 sps:$4 sm:$0xff]   ;;  %v4664_v45 = vld [vmem:[%s5904_s1 + $0x5d0] sm:$0xff]  }
  0x8e   :  { %4082 = vmatpush3.bf16.msra.mxu1 %v4553_v61  ;;  %4037 = vmatprep.subr.bf16.mxu0 %v4554_v62  ;;  %v4620_v57 = vld [vmem:[%s5905_s0 + $0x44] ss:$100 sps:$4 sm:$0xff]   ;;  %v4625_v61 = vld [vmem:[%s5904_s1 + $0x538] sm:$0xff]   ;;  %v4626_v62 = vld [vmem:[%s5904_s1 + $0x570] sm:$0xff]  }
  0x8f   :  { %4083 = vmatprep.subr.bf16.mxu1 %v4556_v0  ;;  %v4628_v0 = vld [vmem:[%s5905_s0 + $0x10c] ss:$100 sps:$4 sm:$0xff]  }
  0x91   :  { %4038 = vmatpush3.bf16.msra.mxu0 %v4555_v63  ;;  %v4627_v63 = vld [vmem:[%s5904_s1 + $0x530] sm:$0xff]  }
  0x92   :  { %4084 = vmatpush3.bf16.msra.mxu1 %v4557_v1  ;;  %4115 = vmatprep.subr.bf16.mxu0 %v4564_v6  ;;  %v4630_v1 = vld [vmem:[%s5905_s0 + $0x114] ss:$100 sps:$4 sm:$0xff]   ;;  %v4636_v6 = vld [vmem:[%s5904_s1 + $0x568] sm:$0xff]  }
  0x93   :  { %2659 = vmatmul.mubr.bf16.gmra.mxu0 %v3488_v58  ;;  %4161 = vmatprep.subr.bf16.mxu1 %v4574_v14  ;;  %v4621_v58 = vld [vmem:[%s5905_s0 + $0x48] ss:$100 sps:$4 sm:$0xff]   ;;  %v4646_v14 = vld [vmem:[%s5905_s0 + $0x1d8] ss:$100 sps:$4 sm:$0xff]  }
  0x94   :  { %2731 = vmatmul.mubr.bf16.gmra.mxu1 %v3490_v59  ;;  %2770 = vmatprep.mubr.bf16.mxu0 %v4560_v3  ;;  %v4623_v59 = vld [vmem:[%s5905_s0 + $0x4c] ss:$100 sps:$4 sm:$0xff]  }
  0x95   :  { %2842 = vmatprep.mubr.bf16.mxu1 %v4563_v5  ;;  %v4633_v3 = vld [vmem:[%s5905_s0 + $0x110] ss:$100 sps:$4 sm:$0xff]   ;;  %v4635_v5 = vld [vmem:[%s5904_s1 + $0x5b8] sm:$0xff]  }
  0x9b   :  { %2771 = vmatmul.mubr.bf16.vlgmr.msra.gmra.mxu0 %v4558_v2  ;;  %v4632_v2 = vld [vmem:[%s5905_s0 + $0x108] ss:$100 sps:$4 sm:$0xff]  }
  0x9c   :  { %2843 = vmatmul.mubr.bf16.vlgmr.msra.gmra.mxu1 %v4561_v4  ;;  %4116 = vmatpush3.bf16.msra.mxu0 %v4565_v7  ;;  %v4634_v4 = vld [vmem:[%s5904_s1 + $0x5f8] sm:$0xff]   ;;  %v4637_v7 = vld [vmem:[%s5904_s1 + $0x528] sm:$0xff]  }
  0x9d   :  { %4117 = vmatprep.subr.bf16.mxu0 %v4566_v8  ;;  %2778 = vmatprep.mubr.bf16.mxu0 %v4568_v10  ;;  %v4638_v8 = vld [vmem:[%s5904_s1 + $0x5f0] sm:$0xff]  }
  0x9e   :  { %2850 = vmatprep.mubr.bf16.mxu1 %v4570_v11  ;;  %4162 = vmatpush3.bf16.msra.mxu1 %v4575_v15  ;;  %v4640_v10 = vld [vmem:[%s5905_s0 + $0x1d4] ss:$100 sps:$4 sm:$0xff]   ;;  %v4642_v11 = vld [vmem:[%s5905_s0 + $0x1dc] ss:$100 sps:$4 sm:$0xff]  }
  0x9f   :  { %4163 = vmatprep.subr.bf16.mxu1 %v4578_v18  ;;  %v4647_v15 = vld [vmem:[%s5904_s1 + $0x520] sm:$0xff]   ;;  %v4650_v18 = vld [vmem:[%s5904_s1 + $0x558] sm:$0xff]  }
  0xa0   :  { %4118 = vmatpush3.bf16.msra.mxu0 %v4567_v9  ;;  %v4639_v9 = vld [vmem:[%s5904_s1 + $0x5b0] sm:$0xff]  }
  0xa1   :  { %4119 = vmatprep.subr.bf16.mxu0 %v4576_v16  ;;  %v4648_v16 = vld [vmem:[%s5904_s1 + $0x5e8] sm:$0xff]  }
  0xa2   :  { %4164 = vmatpush3.bf16.msra.mxu1 %v4579_v19 }
  0xa3   :  { %2779 = vmatmul.mubr.bf16.gmra.mxu0 %v4572_v12  ;;  %4165 = vmatprep.subr.bf16.mxu1 %v4588_v26  ;;  %v4644_v12 = vld [vmem:[%s5904_s1 + $0x560] sm:$0xff]  }
  0xa4   :  { %2851 = vmatmul.mubr.bf16.gmra.mxu1 %v4573_v13  ;;  %4120 = vmatpush3.bf16.msra.mxu0 %v4577_v17  ;;  %v4645_v13 = vld [vmem:[%s5905_s0 + $0x1d0] ss:$100 sps:$4 sm:$0xff]   ;;  %v4649_v17 = vld [vmem:[%s5904_s1 + $0x5a8] sm:$0xff]  }
  0xa5   :  { %2786 = vmatprep.mubr.bf16.mxu0 %v4580_v20  ;;  %2858 = vmatprep.mubr.bf16.mxu1 %v4582_v21  ;;  %v4651_v20 = vld [vmem:[%s5904_s1 + $0x5e0] sm:$0xff]  }
  0xa6   :  { %4121 = vmatprep.subr.bf16.mxu0 %v4584_v22  ;;  %4166 = vmatpush3.bf16.msra.mxu1 %v4589_v27  ;;  %v4652_v22 = vld [vmem:[%s5904_s1 + $0x518] sm:$0xff]  }
  0xa7   :  { %4167 = vmatprep.subr.bf16.mxu1 %v4591_v29  ;;  %v4654_v27 = vld [vmem:[%s5905_s0 + $0x29c] ss:$100 sps:$4 sm:$0xff]  }
  0xa8   :  { %4122 = vmatpush3.bf16.msra.mxu0 %v4587_v25 }
  0xa9   :  { %4123 = vmatprep.subr.bf16.mxu0 %v4590_v28 }
  0xaa   :  { %4168 = vmatpush3.bf16.msra.mxu1 %v4593_v31  ;;  %v4658_v31 = vld [vmem:[%s5905_s0 + $0x298] ss:$100 sps:$4 sm:$0xff]  }
  0xab   :  { %2787 = vmatmul.mubr.bf16.gmra.mxu0 %v4585_v23  ;;  %4169 = vmatprep.subr.bf16.mxu1 %v4600_v36 }
  0xac   :  { %2859 = vmatmul.mubr.bf16.gmra.mxu1 %v4586_v24  ;;  %4124 = vmatpush3.bf16.msra.mxu0 %v4592_v30  ;;  %v4653_v24 = vld [vmem:[%s5904_s1 + $0x5a0] sm:$0xff]  }
  0xad   :  { %2794 = vmatprep.mubr.bf16.mxu0 %v4594_v32  ;;  %2866 = vmatprep.mubr.bf16.mxu1 %v4596_v33  ;;  %v4656_v30 = vld [vmem:[%s5905_s0 + $0x2a4] ss:$100 sps:$4 sm:$0xff]  }
  0xae   :  { %4125 = vmatprep.subr.bf16.mxu0 %v4601_v37  ;;  %4170 = vmatpush3.bf16.msra.mxu1 %v4602_v38  ;;  %v4659_v32 = vld [vmem:[%s5905_s0 + $0x2a0] ss:$100 sps:$4 sm:$0xff]   ;;  %v4661_v37 = vld [vmem:[%s5904_s1 + $0x550] sm:$0xff]  }
  0xaf   :  { %4171 = vmatprep.subr.bf16.mxu1 %v4604_v40  ;;  %v4662_v40 = vld [vmem:[%s5904_s1 + $0x598] sm:$0xff]  }
  0xb0   :  { %4126 = vmatpush3.bf16.msra.mxu0 %v4603_v39 }
  0xb1   :  { %4127 = vmatprep.subr.bf16.mxu0 %v4606_v42 }
  0xb2   :  { %4172 = vmatpush3.bf16.msra.mxu1 %v4605_v41 }
  0xb3   :  { %2795 = vmatmul.mubr.bf16.gmra.mxu0 %v4598_v34  ;;  %4173 = vmatprep.subr.bf16.mxu1 %v4612_v50  ;;  %v4660_v34 = vld [vmem:[%s5904_s1 + $0x5d8] sm:$0xff]  }
  0xb4   :  { %2867 = vmatmul.mubr.bf16.gmra.mxu1 %v4599_v35  ;;  %2802 = vmatprep.mubr.bf16.mxu0 %v3493_v44 }
  0xb5   :  { %2874 = vmatprep.mubr.bf16.mxu1 %v3495_v47  ;;  %4128 = vmatpush3.bf16.msra.mxu0 %v4609_v48  ;;  %v4665_v48 = vld [vmem:[%s5904_s1 + $0x590] sm:$0xff]  }
  0xb6   :  { %4174 = vmatpush3.bf16.msra.mxu1 %v4613_v51  ;;  %4129 = vmatprep.subr.bf16.mxu0 %v4614_v52  ;;  %v4666_v51 = vld [vmem:[%s5904_s1 + $0x548] sm:$0xff]  }
  0xb7   :  { %4175 = vmatprep.subr.bf16.mxu1 %v4616_v54  ;;  %v130_v54 = vld [vmem:[%s5905_s0 + $0x360] sm:$0xff] }
  0xb9   :  { %4130 = vmatpush3.bf16.msra.mxu0 %v4615_v53 }
  0xba   :  { %4176 = vmatpush3.bf16.msra.mxu1 %v4617_v55  ;;  %4207 = vmatprep.subr.bf16.mxu0 %v4624_v60  ;;  %v131_v55 = vld [vmem:[%s5905_s0 + $0x368] sm:$0xff]  ;;  %v3496_v60 = vcombine.low %v130_v54, %v130_v54 }
  0xbb   :  { %2803 = vmatmul.mubr.bf16.gmra.mxu0 %v3492_v46  ;;  %4253 = vmatprep.subr.bf16.mxu1 %v4634_v4 }
  0xbc   :  { %2875 = vmatmul.mubr.bf16.gmra.mxu1 %v3494_v49  ;;  %2914 = vmatprep.mubr.bf16.mxu0 %v4620_v57  ;;  %v3497_v57 = vcombine.high %v130_v54, %v130_v54  ;;  %v4696_v54 = vld [vmem:[%s5905_s0 + $0x1e0] ss:$100 sps:$4 sm:$0xff]  }
  0xbd   :  { %2986 = vmatprep.mubr.bf16.mxu1 %v4623_v59  ;;  %v4669_v59 = vld [vmem:[%s5904_s1 + $0x508] sm:$0xff]  }
  0xc3   :  { %2915 = vmatmul.mubr.bf16.vlgmr.msra.gmra.mxu0 %v4618_v56 }
  0xc4   :  { %2987 = vmatmul.mubr.bf16.vlgmr.msra.gmra.mxu1 %v4621_v58  ;;  %4208 = vmatpush3.bf16.msra.mxu0 %v4625_v61  ;;  %v3499_v58 = vcombine.high %v131_v55, %v131_v55 }
  0xc5   :  { %4209 = vmatprep.subr.bf16.mxu0 %v4626_v62  ;;  %2922 = vmatprep.mubr.bf16.mxu0 %v4628_v0  ;;  %v3498_v62 = vcombine.low %v131_v55, %v131_v55 }
  0xc6   :  { %2994 = vmatprep.mubr.bf16.mxu1 %v4630_v1  ;;  %4254 = vmatpush3.bf16.msra.mxu1 %v4635_v5 }
  0xc7   :  { %4255 = vmatprep.subr.bf16.mxu1 %v4638_v8  ;;  %v4675_v8 = vld [vmem:[%s5904_s1 + $0x500] sm:$0xff]  }
  0xc8   :  { %4210 = vmatpush3.bf16.msra.mxu0 %v4627_v63  ;;  %v4672_v63 = vld [vmem:[%s5904_s1 + $0x5c8] sm:$0xff]  }
  0xc9   :  { %4211 = vmatprep.subr.bf16.mxu0 %v4636_v6  ;;  %v4674_v6 = vld [vmem:[%s5904_s1 + $0x540] sm:$0xff]  }
  0xca   :  { %4256 = vmatpush3.bf16.msra.mxu1 %v4639_v9 }
  0xcb   :  { %2923 = vmatmul.mubr.bf16.gmra.mxu0 %v4632_v2  ;;  %4257 = vmatprep.subr.bf16.mxu1 %v4648_v16 }
  0xcc   :  { %2995 = vmatmul.mubr.bf16.gmra.mxu1 %v4633_v3  ;;  %4212 = vmatpush3.bf16.msra.mxu0 %v4637_v7  ;;  %v4673_v3 = vld [vmem:[%s5904_s1 + $0x588] sm:$0xff]  }
  0xcd   :  { %2930 = vmatprep.mubr.bf16.mxu0 %v4640_v10  ;;  %3002 = vmatprep.mubr.bf16.mxu1 %v4642_v11  ;;  %v4676_v11 = vld [vmem:[%s5904_s1 + $0x5c0] sm:$0xff]  }
  0xce   :  { %4213 = vmatprep.subr.bf16.mxu0 %v4644_v12  ;;  %4258 = vmatpush3.bf16.msra.mxu1 %v4649_v17  ;;  %v4678_v17 = vld [vmem:[%s5905_s0 + $0x50] ss:$100 sps:$4 sm:$0xff]  }
  0xcf   :  { %4259 = vmatprep.subr.bf16.mxu1 %v4651_v20  ;;  %v4681_v20 = vld [vmem:[%s5905_s0 + $0x58] ss:$100 sps:$4 sm:$0xff]  }
  0xd0   :  { %4214 = vmatpush3.bf16.msra.mxu0 %v4647_v15 }
  0xd1   :  { %4215 = vmatprep.subr.bf16.mxu0 %v4650_v18  ;;  %v4680_v18 = vld [vmem:[%s5905_s0 + $0x54] ss:$100 sps:$4 sm:$0xff]  }
  0xd2   :  { %4260 = vmatpush3.bf16.msra.mxu1 %v4653_v24  ;;  %v4683_v24 = vld [vmem:[%s5905_s0 + $0x5c] ss:$100 sps:$4 sm:$0xff]  }
  0xd3   :  { %2931 = vmatmul.mubr.bf16.gmra.mxu0 %v4645_v13  ;;  %4261 = vmatprep.subr.bf16.mxu1 %v4660_v34  ;;  %v4691_v34 = vld [vmem:[%s5904_s1 + $0x610] sm:$0xff]  }
  0xd4   :  { %3003 = vmatmul.mubr.bf16.gmra.mxu1 %v4646_v14  ;;  %4216 = vmatpush3.bf16.msra.mxu0 %v4652_v22  ;;  %v4677_v14 = vld [vmem:[%s5904_s1 + $0x580] sm:$0xff]  }
  0xd5   :  { %2938 = vmatprep.mubr.bf16.mxu0 %v4654_v27  ;;  %3010 = vmatprep.mubr.bf16.mxu1 %v4656_v30  ;;  %v4684_v27 = vld [vmem:[%s5904_s1 + $0x618] sm:$0xff]   ;;  %v4687_v30 = vld [vmem:[%s5905_s0 + $0x124] ss:$100 sps:$4 sm:$0xff]  }
  0xd6   :  { %4217 = vmatprep.subr.bf16.mxu0 %v4661_v37  ;;  %4262 = vmatpush3.bf16.msra.mxu1 %v4662_v40 }
  0xd7   :  { %4263 = vmatprep.subr.bf16.mxu1 %v4664_v45  ;;  %v4694_v45 = vld [vmem:[%s5905_s0 + $0x1ec] ss:$100 sps:$4 sm:$0xff]  }
  0xd8   :  { %4218 = vmatpush3.bf16.msra.mxu0 %v4663_v43 }
  0xd9   :  { %4219 = vmatprep.subr.bf16.mxu0 %v4666_v51 }
  0xda   :  { %4264 = vmatpush3.bf16.msra.mxu1 %v4665_v48  ;;  %v4698_v48 = vld [vmem:[%s5904_s1 + $0x608] sm:$0xff]  }
  0xdb   :  { %2939 = vmatmul.mubr.bf16.gmra.mxu0 %v4658_v31  ;;  %4265 = vmatprep.subr.bf16.mxu1 %v4672_v63 }
  0xdc   :  { %3011 = vmatmul.mubr.bf16.gmra.mxu1 %v4659_v32  ;;  %2946 = vmatprep.mubr.bf16.mxu0 %v3497_v57  ;;  %v4709_v57 = vld [vmem:[%s5904_s1 + $0x600] sm:$0xff]  }
  0xdd   :  { %3018 = vmatprep.mubr.bf16.mxu1 %v3499_v58  ;;  %4220 = vmatpush3.bf16.msra.mxu0 %v4669_v59  ;;  %v4697_v58 = vld [vmem:[%s5905_s0 + $0x1e8] ss:$100 sps:$4 sm:$0xff]  }
  0xde   :  { %4266 = vmatpush3.bf16.msra.mxu1 %v4673_v3  ;;  %4221 = vmatprep.subr.bf16.mxu0 %v4674_v6  ;;  %v4701_v59 = vld [vmem:[%s5905_s0 + $0x2ac] ss:$100 sps:$4 sm:$0xff]  }
  0xdf   :  { %4267 = vmatprep.subr.bf16.mxu1 %v4676_v11 }
  0xe1   :  { %4222 = vmatpush3.bf16.msra.mxu0 %v4675_v8  ;;  %v133_v8 = vld [vmem:[%s5905_s0 + $0x378] sm:$0xff] }
  0xe2   :  { %4268 = vmatpush3.bf16.msra.mxu1 %v4677_v14 }
  0xe3   :  { %v3763_v19 = vpop.f32.mrf.mxu0  ;;  %2947 = vmatmul.mubr.bf16.gmra.mxu0 %v3496_v60 }
  0xe4   :  { %v3809_v21 = vpop.f32.mrf.mxu1  ;;  %3019 = vmatmul.mubr.bf16.gmra.mxu1 %v3498_v62  ;;  %3058 = vmatprep.mubr.bf16.mxu0 %v4680_v18  ;;  %v4704_v62 = vld [vmem:[%s5905_s0 + $0x2b4] ss:$100 sps:$4 sm:$0xff]  }
  0xe5   :  { %v3764_v23 = vpop.f32.mrf.mxu0  ;;  %3130 = vmatprep.mubr.bf16.mxu1 %v4683_v24 }
  0xe6   :  { %v3765_v25 = vadd.f32 %v3764_v23, %v3763_v19  ;;  %v3810_v26 = vpop.f32.mrf.mxu1 }
  0xe7   :  { %v3811_v28 = vadd.f32 %v3810_v26, %v3809_v21  ;;  %v3766_v29 = vpop.f32.mrf.mxu0  ;;  %v4717_v21 = vmov 0.0  }
  0xe8   :  { %v3812_v33 = vpop.f32.mrf.mxu1  ;;  %4308 = vmatprep.subr.bf16.mxu0 %v4717_v21  ;;  %4336 = vmatprep.subr.bf16.mxu1 %v4717_v21 }
  0xe9   :  { %v5545_v35 = vadd.f32 %v3811_v28, %v3765_v25  ;;  %v3767_v36 = vpop.f32.mrf.mxu0 }
  0xea   :  { %v3768_v38 = vadd.f32 %v3767_v36, %v3766_v29  ;;  %v3813_v39 = vpop.f32.mrf.mxu1  ;;  %v4685_v29 = vld [vmem:[%s5905_s0 + $0x11c] ss:$100 sps:$4 sm:$0xff]  }
  0xeb   :  { %v3814_v41 = vadd.f32 %v3813_v39, %v3812_v33  ;;  %v3769_v42 = vpop.f32.mrf.mxu0  ;;  %3059 = vmatmul.mubr.bf16.vlgmr.msra.gmra.mxu0 %v4678_v17 }
  0xec   :  { %v3815_v44 = vpop.f32.mrf.mxu1  ;;  %3131 = vmatmul.mubr.bf16.vlgmr.msra.gmra.mxu1 %v4681_v20  ;;  %4309 = vmatpush3.bf16.msra.mxu0 %v4684_v27 }
  0xed   :  { %v5559_v46 = vadd.f32 %v3814_v41, %v3768_v38  ;;  %v3770_v47 = vpop.f32.mrf.mxu0  ;;  %3066 = vmatprep.mubr.bf16.mxu0 %v4685_v29  ;;  %3138 = vmatprep.mubr.bf16.mxu1 %v4687_v30  ;;  %v4689_v38 = vld [vmem:[%s5905_s0 + $0x118] ss:$100 sps:$4 sm:$0xff]   ;;  %v4690_v41 = vld [vmem:[%s5905_s0 + $0x120] ss:$100 sps:$4 sm:$0xff]  }
  0xee   :  { %v3771_v49 = vadd.f32 %v3770_v47, %v3769_v42  ;;  %v3816_v50 = vpop.f32.mrf.mxu1  ;;  %4310 = vmatprep.subr.bf16.mxu0 %v4717_v21  ;;  %4340 = vmatpush3.bf16.msra.mxu1 %v4684_v27  ;;  %v4692_v42 = vld [vmem:[%s5905_s0 + $0x1e4] ss:$100 sps:$4 sm:$0xff]  }
  0xef   :  { %v3817_v52 = vadd.f32 %v3816_v50, %v3815_v44  ;;  %v3772_v53 = vpop.f32.mrf.mxu0  ;;  %4337 = vmatprep.subr.bf16.mxu1 %v4717_v21 }
  0xf0   :  { %v3818_v56 = vpop.f32.mrf.mxu1  ;;  %4311 = vmatpush3.bf16.msra.mxu0 %v4691_v34 }
  0xf1   :  { %v3773_v61 = vpop.f32.mrf.mxu0  ;;  %v5579_v0 = vadd.f32 %v3817_v52, %v3771_v49  ;;  %4312 = vmatprep.subr.bf16.mxu0 %v4717_v21 }
  0xf2   :  { %v3774_v1 = vadd.f32 %v3773_v61, %v3772_v53  ;;  %v3819_v2 = vpop.f32.mrf.mxu1  ;;  %4341 = vmatpush3.bf16.msra.mxu1 %v4691_v34 }
  0xf3   :  { %v3820_v4 = vadd.f32 %v3819_v2, %v3818_v56  ;;  %v3775_v5 = vpop.f32.mrf.mxu0  ;;  %3067 = vmatmul.mubr.bf16.gmra.mxu0 %v4689_v38  ;;  %4338 = vmatprep.subr.bf16.mxu1 %v4717_v21 }
  0xf4   :  { %v3821_v7 = vpop.f32.mrf.mxu1  ;;  %3139 = vmatmul.mubr.bf16.gmra.mxu1 %v4690_v41  ;;  %3074 = vmatprep.mubr.bf16.mxu0 %v4692_v42 }
  0xf5   :  { %v5590_v9 = vadd.f32 %v3820_v4, %v3774_v1  ;;  %v3776_v10 = vpop.f32.mrf.mxu0  ;;  %3146 = vmatprep.mubr.bf16.mxu1 %v4694_v45  ;;  %4313 = vmatpush3.bf16.msra.mxu0 %v4698_v48 }
  0xf6   :  { %v3777_v12 = vadd.f32 %v3776_v10, %v3775_v5  ;;  %v3822_v13 = vpop.f32.mrf.mxu1  ;;  %4314 = vmatprep.subr.bf16.mxu0 %v4717_v21  ;;  %4342 = vmatpush3.bf16.msra.mxu1 %v4698_v48 }
  0xf7   :  { %v3823_v15 = vadd.f32 %v3822_v13, %v3821_v7  ;;  %v3778_v16 = vpop.f32.mrf.mxu0  ;;  %4339 = vmatprep.subr.bf16.mxu1 %v4717_v21  ;;  %v132_v7 = vld [vmem:[%s5905_s0 + $0x370] sm:$0xff] }
  0xf8   :  { %v3824_v19 = vpop.f32.mrf.mxu1  ;;  %v4702_v13 = vld [vmem:[%s5905_s0 + $0x2b0] ss:$100 sps:$4 sm:$0xff]   ;;  %v3500_v34 = vcombine.low %v132_v7, %v132_v7 }
  0xf9   :  { %v5608_v22 = vadd.f32 %v3823_v15, %v3777_v12  ;;  %v3779_v23 = vpop.f32.mrf.mxu0  ;;  %4315 = vmatpush3.bf16.msra.mxu0 %v4709_v57  ;;  %v4699_v12 = vld [vmem:[%s5905_s0 + $0x2a8] ss:$100 sps:$4 sm:$0xff]   ;;  %v3501_v15 = vcombine.high %v132_v7, %v132_v7  ;;  %v4713_v7 = vld [vmem:[%s5905_s0 + $0x380] ss:$0 sps:$4 sm:$0xff]  }
  0xfa   :  { %v3780_v25 = vadd.f32 %v3779_v23, %v3778_v16  ;;  %v3825_v26 = vpop.f32.mrf.mxu1  ;;  %4343 = vmatpush3.bf16.msra.mxu1 %v4709_v57  ;;  %v3503_v16 = vcombine.high %v133_v8, %v133_v8 }
  0xfb   :  { %v3826_v28 = vadd.f32 %v3825_v26, %v3824_v19  ;;  %v3781_v32 = vpop.f32.mrf.mxu0  ;;  %3075 = vmatmul.mubr.bf16.gmra.mxu0 %v4696_v54  ;;  %v4711_v54 = vld [vmem:[%s5905_s0 + $0x2b8] ss:$100 sps:$4 sm:$0xff]  }
  0xfc   :  { %v3827_v33 = vpop.f32.mrf.mxu1  ;;  %3147 = vmatmul.mubr.bf16.gmra.mxu1 %v4697_v58  ;;  %3082 = vmatprep.mubr.bf16.mxu0 %v4701_v59 }
  0xfd   :  { %v5623_v31 = vadd.f32 %v3826_v28, %v3780_v25  ;;  %v3782_v36 = vpop.f32.mrf.mxu0  ;;  %3154 = vmatprep.mubr.bf16.mxu1 %v4704_v62 }
  0xfe   :  { %v3828_v37 = vpop.f32.mrf.mxu1  ;;  %v3783_v39 = vadd.f32 %v3782_v36, %v3781_v32  ;;  %v3502_v36 = vcombine.low %v133_v8, %v133_v8 }
  0xff   :  { %v3829_v40 = vadd.f32 %v3828_v37, %v3827_v33  ;;  %v3784_v43 = vpop.f32.mrf.mxu0 }
 0x100   :  { %v3830_v44 = vpop.f32.mrf.mxu1 }
 0x101   :  { %v5642_v47 = vadd.f32 %v3829_v40, %v3783_v39  ;;  %v3785_v49 = vpop.f32.mrf.mxu0 }
 0x102   :  { %v3831_v50 = vpop.f32.mrf.mxu1  ;;  %v3786_v51 = vadd.f32 %v3785_v49, %v3784_v43 }
 0x103   :  { %v3832_v52 = vadd.f32 %v3831_v50, %v3830_v44  ;;  %v3787_v55 = vpop.f32.mrf.mxu0  ;;  %3083 = vmatmul.mubr.bf16.gmra.mxu0 %v4699_v12 }
 0x104   :  { %v3833_v56 = vpop.f32.mrf.mxu1  ;;  %3155 = vmatmul.mubr.bf16.gmra.mxu1 %v4702_v13  ;;  %3090 = vmatprep.mubr.bf16.mxu0 %v3501_v15 }
 0x105   :  { %v5648_v53 = vadd.f32 %v3832_v52, %v3786_v51  ;;  %v3788_v60 = vpop.f32.mrf.mxu0  ;;  %3162 = vmatprep.mubr.bf16.mxu1 %v3503_v16  ;;  %v4710_v52 = vld [vmem:[%s5905_s0 + $0x60] ss:$100 sps:$4 sm:$0xff]  }
 0x106   :  { %v3834_v61 = vpop.f32.mrf.mxu1  ;;  %v3789_v63 = vadd.f32 %v3788_v60, %v3787_v55 }
 0x107   :  { %v3835_v1 = vadd.f32 %v3834_v61, %v3833_v56  ;;  %v3790_v2 = vpop.f32.mrf.mxu0 }
 0x108   :  { %v3836_v3 = vpop.f32.mrf.mxu1 }
 0x109   :  { %v5668_v4 = vadd.f32 %v3835_v1, %v3789_v63  ;;  %v3791_v5 = vpop.f32.mrf.mxu0 }
 0x10a   :  { %v3837_v6 = vpop.f32.mrf.mxu1 }
 0x10b   :  { %v3855_v10 = vpop.f32.mrf.mxu0  ;;  %3091 = vmatmul.mubr.bf16.gmra.mxu0 %v3500_v34  ;;  %v4712_v6 = vld [vmem:[%s5905_s0 + $0x128] ss:$100 sps:$4 sm:$0xff]  }
 0x10c   :  { %v3901_v11 = vpop.f32.mrf.mxu1  ;;  %3163 = vmatmul.mubr.bf16.gmra.mxu1 %v3502_v36  ;;  %4316 = vmatprep.mubr.msk.bf16.mxu0 %vm4718_vm0, %v4717_v21 }
 0x10d   :  { %v3856_v14 = vpop.f32.mrf.mxu0  ;;  %4328 = vmatprep.mubr.msk.bf16.mxu1 %vm4718_vm0, %v4717_v21 }
 0x10e   :  { %v3857_v17 = vadd.f32 %v3856_v14, %v3855_v10  ;;  %v3902_v18 = vpop.f32.mrf.mxu1 }
 0x10f   :  { %v3903_v19 = vadd.f32 %v3902_v18, %v3901_v11  ;;  %v3858_v20 = vpop.f32.mrf.mxu0 }
 0x110   :  { %v2485_v23 = vadd.f32 %v3857_v17, %v5545_v35  ;;  %v3904_v24 = vpop.f32.mrf.mxu1 }
 0x111   :  { %v3859_v25 = vpop.f32.mrf.mxu0 }
 0x112   :  { %v5683_v26 = vadd.f32 %v3903_v19, %v2485_v23  ;;  %v3860_v27 = vadd.f32 %v3859_v25, %v3858_v20  ;;  %v3905_v28 = vpop.f32.mrf.mxu1 }
 0x113   :  { %v3906_v29 = vadd.f32 %v3905_v28, %v3904_v24  ;;  %v3861_v30 = vpop.f32.mrf.mxu0  ;;  %4317 = vmatmul.mubr.msk.bf16.vlgmr.msra.gmra.mxu0 %vm2290_vm1, %v4710_v52  ;;  %v4714_v24 = vld [vmem:[%s5905_s0 + $0x1f0] ss:$100 sps:$4 sm:$0xff]  }
 0x114   :  { %v2488_v32 = vadd.f32 %v3860_v27, %v5559_v46  ;;  %v3907_v33 = vpop.f32.mrf.mxu1  ;;  %4329 = vmatmul.mubr.msk.bf16.vlgmr.msra.gmra.mxu1 %vm2290_vm1, %v4711_v54  ;;  %4320 = vmatprep.mubr.msk.bf16.mxu0 %vm4718_vm0, %v4717_v21 }
 0x115   :  { %v3862_v37 = vpop.f32.mrf.mxu0  ;;  %4332 = vmatprep.mubr.msk.bf16.mxu1 %vm4718_vm0, %v4717_v21 }
 0x116   :  { %v5686_v38 = vadd.f32 %v3906_v29, %v2488_v32  ;;  %v3863_v35 = vadd.f32 %v3862_v37, %v3861_v30  ;;  %v3908_v39 = vpop.f32.mrf.mxu1 }
 0x117   :  { %v3909_v40 = vadd.f32 %v3908_v39, %v3907_v33  ;;  %v3864_v41 = vpop.f32.mrf.mxu0 }
 0x118   :  { %v2493_v42 = vadd.f32 %v3863_v35, %v5579_v0  ;;  %v3910_v43 = vpop.f32.mrf.mxu1 }
 0x119   :  { %v3865_v44 = vpop.f32.mrf.mxu0 }
 0x11a   :  { %v5693_v46 = vadd.f32 %v3909_v40, %v2493_v42  ;;  %v3866_v45 = vadd.f32 %v3865_v44, %v3864_v41  ;;  %v3911_v48 = vpop.f32.mrf.mxu1 }
 0x11b   :  { %v3912_v49 = vadd.f32 %v3911_v48, %v3910_v43  ;;  %v3867_v50 = vpop.f32.mrf.mxu0  ;;  %4321 = vmatmul.mubr.msk.bf16.gmra.mxu0 %vm2290_vm1, %v4712_v6 }
 0x11c   :  { %v2496_v51 = vadd.f32 %v3866_v45, %v5590_v9  ;;  %v3913_v0 = vpop.f32.mrf.mxu1  ;;  %4333 = vmatmul.mubr.msk.bf16.gmra.mxu1 %vm2290_vm1, %v4713_v7  ;;  %4324 = vmatprep.mubr.msk.bf16.mxu0 %vm4718_vm0, %v4717_v21 }
 0x11d   :  { %v3868_v55 = vpop.f32.mrf.mxu0 }
 0x11e   :  { %v5702_v56 = vadd.f32 %v3912_v49, %v2496_v51  ;;  %v3869_v57 = vadd.f32 %v3868_v55, %v3867_v50  ;;  %v3914_v58 = vpop.f32.mrf.mxu1 }
 0x11f   :  { %v3915_v59 = vadd.f32 %v3914_v58, %v3913_v0  ;;  %v3870_v60 = vpop.f32.mrf.mxu0 }
 0x120   :  { %v2501_v61 = vadd.f32 %v3869_v57, %v5608_v22  ;;  %v3916_v9 = vpop.f32.mrf.mxu1 }
 0x121   :  { %v3871_v62 = vpop.f32.mrf.mxu0 }
 0x122   :  { %v5711_v63 = vadd.f32 %v3915_v59, %v2501_v61  ;;  %v3872_v1 = vadd.f32 %v3871_v62, %v3870_v60  ;;  %v3917_v2 = vpop.f32.mrf.mxu1 }
 0x123   :  { %v3918_v3 = vadd.f32 %v3917_v2, %v3916_v9  ;;  %v3873_v22 = vpop.f32.mrf.mxu0  ;;  %4325 = vmatmul.mubr.msk.bf16.gmra.mxu0 %vm2290_vm1, %v4714_v24 }
 0x124   :  { %v2504_v5 = vadd.f32 %v3872_v1, %v5623_v31  ;;  %v3919_v8 = vpop.f32.mrf.mxu1 }
 0x125   :  { %v3874_v11 = vpop.f32.mrf.mxu0 }
 0x126   :  { %v5720_v10 = vadd.f32 %v3918_v3, %v2504_v5  ;;  %v3875_v12 = vadd.f32 %v3874_v11, %v3873_v22  ;;  %v3920_v13 = vpop.f32.mrf.mxu1 }
 0x127   :  { %v3921_v14 = vadd.f32 %v3920_v13, %v3919_v8  ;;  %v3876_v15 = vpop.f32.mrf.mxu0 }
 0x128   :  { %v2509_v31 = vadd.f32 %v3875_v12, %v5642_v47  ;;  %v3922_v16 = vpop.f32.mrf.mxu1 }
 0x129   :  { %v3877_v17 = vpop.f32.mrf.mxu0 }
 0x12a   :  { %v5727_v18 = vadd.f32 %v3921_v14, %v2509_v31  ;;  %v3878_v19 = vadd.f32 %v3877_v17, %v3876_v15  ;;  %v3923_v20 = vpop.f32.mrf.mxu1 }
 0x12b   :  { %v3924_v23 = vadd.f32 %v3923_v20, %v3922_v16  ;;  %v3879_v47 = vpop.f32.mrf.mxu0 }
 0x12c   :  { %v2512_v25 = vadd.f32 %v3878_v19, %v5648_v53  ;;  %v3925_v27 = vpop.f32.mrf.mxu1 }
 0x12d   :  { %v3880_v21 = vpop.f32.mrf.mxu0 }
 0x12e   :  { %v5733_v28 = vadd.f32 %v3924_v23, %v2512_v25  ;;  %v3926_v29 = vpop.f32.mrf.mxu1  ;;  %v3881_v32 = vadd.f32 %v3880_v21, %v3879_v47 }
 0x12f   :  { %v3927_v30 = vadd.f32 %v3926_v29, %v3925_v27  ;;  %v3882_v34 = vpop.f32.mrf.mxu0 }
 0x130   :  { %v3928_v33 = vpop.f32.mrf.mxu1  ;;  %v2517_v36 = vadd.f32 %v3881_v32, %v5668_v4 }
 0x131   :  { %v3883_v35 = vpop.f32.mrf.mxu0 }
 0x132   :  { %v3929_v37 = vpop.f32.mrf.mxu1  ;;  %v5737_v39 = vadd.f32 %v3927_v30, %v2517_v36 }
 0x133   :  { %v3947_v40 = vpop.f32.mrf.mxu0 }
 0x134   :  { %v3993_v53 = vpop.f32.mrf.mxu1 }
 0x135   :  { %v3948_v41 = vpop.f32.mrf.mxu0 }
 0x136   :  { %v3994_v42 = vpop.f32.mrf.mxu1  ;;  %v3949_v43 = vadd.f32 %v3948_v41, %v3947_v40 }
 0x137   :  { %v3995_v44 = vadd.f32 %v3994_v42, %v3993_v53  ;;  %v3950_v45 = vpop.f32.mrf.mxu0 }
 0x138   :  { %v3996_v48 = vpop.f32.mrf.mxu1  ;;  %v2629_v49 = vadd.f32 %v3949_v43, %v5683_v26 }
 0x139   :  { %v3951_v50 = vpop.f32.mrf.mxu0 }
 0x13a   :  { %v3997_v51 = vpop.f32.mrf.mxu1  ;;  %v5740_v0 = vadd.f32 %v3995_v44, %v2629_v49  ;;  %v3952_v52 = vadd.f32 %v3951_v50, %v3950_v45 }
 0x13b   :  { %v3998_v4 = vadd.f32 %v3997_v51, %v3996_v48  ;;  %v3953_v54 = vpop.f32.mrf.mxu0 }
 0x13c   :  { %v3999_v55 = vpop.f32.mrf.mxu1  ;;  %v2632_v57 = vadd.f32 %v3952_v52, %v5686_v38 }
 0x13d   :  { %v3954_v58 = vpop.f32.mrf.mxu0 }
 0x13e   :  { %v4000_v59 = vpop.f32.mrf.mxu1  ;;  %v5743_v60 = vadd.f32 %v3998_v4, %v2632_v57  ;;  %v3955_v61 = vadd.f32 %v3954_v58, %v3953_v54 }
 0x13f   :  { %v4001_v9 = vadd.f32 %v4000_v59, %v3999_v55  ;;  %v3956_v62 = vpop.f32.mrf.mxu0 }
 0x140   :  { %v4002_v1 = vpop.f32.mrf.mxu1  ;;  %v2637_v26 = vadd.f32 %v3955_v61, %v5693_v46 }
 0x141   :  { %v3957_v2 = vpop.f32.mrf.mxu0 }
 0x142   :  { %v4003_v3 = vpop.f32.mrf.mxu1  ;;  %v5746_v5 = vadd.f32 %v4001_v9, %v2637_v26  ;;  %v3958_v22 = vadd.f32 %v3957_v2, %v3956_v62 }
 0x143   :  { %v4004_v6 = vadd.f32 %v4003_v3, %v4002_v1  ;;  %v3959_v7 = vpop.f32.mrf.mxu0 }
 0x144   :  { %v4005_v8 = vpop.f32.mrf.mxu1  ;;  %v2640_v38 = vadd.f32 %v3958_v22, %v5702_v56 }
 0x145   :  { %v3960_v11 = vpop.f32.mrf.mxu0 }
 0x146   :  { %v4006_v12 = vpop.f32.mrf.mxu1  ;;  %v5749_v13 = vadd.f32 %v4004_v6, %v2640_v38  ;;  %v3961_v14 = vadd.f32 %v3960_v11, %v3959_v7 }
 0x147   :  { %v4007_v15 = vadd.f32 %v4006_v12, %v4005_v8  ;;  %v3962_v31 = vpop.f32.mrf.mxu0 }
 0x148   :  { %v4008_v16 = vpop.f32.mrf.mxu1  ;;  %v2645_v46 = vadd.f32 %v3961_v14, %v5711_v63 }
 0x149   :  { %v3963_v17 = vpop.f32.mrf.mxu0 }
 0x14a   :  { %v4009_v19 = vpop.f32.mrf.mxu1  ;;  %v5752_v20 = vadd.f32 %v4007_v15, %v2645_v46  ;;  %v3964_v23 = vadd.f32 %v3963_v17, %v3962_v31 }
 0x14b   :  { %v4010_v24 = vadd.f32 %v4009_v19, %v4008_v16  ;;  %v3965_v25 = vpop.f32.mrf.mxu0 }
 0x14c   :  { %v2648_v27 = vadd.f32 %v3964_v23, %v5720_v10  ;;  %v4011_v56 = vpop.f32.mrf.mxu1 }
 0x14d   :  { %v3966_v47 = vpop.f32.mrf.mxu0 }
 0x14e   :  { %v5755_v29 = vadd.f32 %v4010_v24, %v2648_v27  ;;  %v3967_v21 = vadd.f32 %v3966_v47, %v3965_v25  ;;  %v4012_v30 = vpop.f32.mrf.mxu1 }
 0x14f   :  { %v4013_v32 = vadd.f32 %v4012_v30, %v4011_v56  ;;  %v3968_v33 = vpop.f32.mrf.mxu0 }
 0x150   :  { %v2653_v34 = vadd.f32 %v3967_v21, %v5727_v18  ;;  %v4014_v63 = vpop.f32.mrf.mxu1 }
 0x151   :  { %v3969_v36 = vpop.f32.mrf.mxu0 }
 0x152   :  { %v5758_v37 = vadd.f32 %v4013_v32, %v2653_v34  ;;  %v3970_v35 = vadd.f32 %v3969_v36, %v3968_v33  ;;  %v4015_v40 = vpop.f32.mrf.mxu1 }
 0x153   :  { %v4016_v53 = vadd.f32 %v4015_v40, %v4014_v63  ;;  %v3971_v43 = vpop.f32.mrf.mxu0 }
 0x154   :  { %v2656_v41 = vadd.f32 %v3970_v35, %v5733_v28  ;;  %v4017_v10 = vpop.f32.mrf.mxu1 }
 0x155   :  { %v3972_v45 = vpop.f32.mrf.mxu0 }
 0x156   :  { %v5761_v42 = vadd.f32 %v4016_v53, %v2656_v41  ;;  %v4018_v44 = vpop.f32.mrf.mxu1  ;;  %v3973_v49 = vadd.f32 %v3972_v45, %v3971_v43 }
 0x157   :  { %v4019_v48 = vadd.f32 %v4018_v44, %v4017_v10  ;;  %v3974_v51 = vpop.f32.mrf.mxu0 }
 0x158   :  { %v4020_v50 = vpop.f32.mrf.mxu1  ;;  %v2661_v18 = vadd.f32 %v3973_v49, %v5737_v39 }
 0x159   :  { %v3975_v4 = vpop.f32.mrf.mxu0 }
 0x15a   :  { %v4021_v52 = vpop.f32.mrf.mxu1  ;;  %v5764_v54 = vadd.f32 %v4019_v48, %v2661_v18 }
 0x15b   :  { %v4039_v55 = vpop.f32.mrf.mxu0 }
 0x15c   :  { %v4085_v57 = vpop.f32.mrf.mxu1 }
 0x15d   :  { %v4040_v58 = vpop.f32.mrf.mxu0 }
 0x15e   :  { %v4086_v28 = vpop.f32.mrf.mxu1  ;;  %v4041_v59 = vadd.f32 %v4040_v58, %v4039_v55 }
 0x15f   :  { %v4087_v61 = vadd.f32 %v4086_v28, %v4085_v57  ;;  %v4042_v9 = vpop.f32.mrf.mxu0 }
 0x160   :  { %v4088_v62 = vpop.f32.mrf.mxu1  ;;  %v2773_v1 = vadd.f32 %v4041_v59, %v5740_v0 }
 0x161   :  { %v4043_v26 = vpop.f32.mrf.mxu0 }
 0x162   :  { %v4089_v2 = vpop.f32.mrf.mxu1  ;;  %v5767_v3 = vadd.f32 %v4087_v61, %v2773_v1  ;;  %v4044_v22 = vadd.f32 %v4043_v26, %v4042_v9 }
 0x163   :  { %v4090_v39 = vadd.f32 %v4089_v2, %v4088_v62  ;;  %v4045_v6 = vpop.f32.mrf.mxu0 }
 0x164   :  { %v4091_v7 = vpop.f32.mrf.mxu1  ;;  %v2776_v8 = vadd.f32 %v4044_v22, %v5743_v60 }
 0x165   :  { %v4046_v38 = vpop.f32.mrf.mxu0 }
 0x166   :  { %v4092_v11 = vpop.f32.mrf.mxu1  ;;  %v5770_v12 = vadd.f32 %v4090_v39, %v2776_v8  ;;  %v4047_v14 = vadd.f32 %v4046_v38, %v4045_v6 }
 0x167   :  { %v4093_v15 = vadd.f32 %v4092_v11, %v4091_v7  ;;  %v4048_v31 = vpop.f32.mrf.mxu0 }
 0x168   :  { %v4094_v16 = vpop.f32.mrf.mxu1  ;;  %v2781_v0 = vadd.f32 %v4047_v14, %v5746_v5 }
 0x169   :  { %v4049_v46 = vpop.f32.mrf.mxu0 }
 0x16a   :  { %v4095_v17 = vpop.f32.mrf.mxu1  ;;  %v5773_v19 = vadd.f32 %v4093_v15, %v2781_v0  ;;  %v4050_v23 = vadd.f32 %v4049_v46, %v4048_v31 }
 0x16b   :  { %v4096_v24 = vadd.f32 %v4095_v17, %v4094_v16  ;;  %v4051_v25 = vpop.f32.mrf.mxu0 }
 0x16c   :  { %v4097_v27 = vpop.f32.mrf.mxu1  ;;  %v2784_v60 = vadd.f32 %v4050_v23, %v5749_v13 }
 0x16d   :  { %v4052_v56 = vpop.f32.mrf.mxu0 }
 0x16e   :  { %v4098_v47 = vpop.f32.mrf.mxu1  ;;  %v5776_v21 = vadd.f32 %v4096_v24, %v2784_v60  ;;  %v4053_v30 = vadd.f32 %v4052_v56, %v4051_v25 }
 0x16f   :  { %v4099_v32 = vadd.f32 %v4098_v47, %v4097_v27  ;;  %v4054_v33 = vpop.f32.mrf.mxu0 }
 0x170   :  { %v4100_v34 = vpop.f32.mrf.mxu1  ;;  %v2789_v5 = vadd.f32 %v4053_v30, %v5752_v20 }
 0x171   :  { %v4055_v63 = vpop.f32.mrf.mxu0 }
 0x172   :  { %v4101_v36 = vpop.f32.mrf.mxu1  ;;  %v5779_v35 = vadd.f32 %v4099_v32, %v2789_v5  ;;  %v4056_v40 = vadd.f32 %v4055_v63, %v4054_v33 }
 0x173   :  { %v4102_v53 = vadd.f32 %v4101_v36, %v4100_v34  ;;  %v4057_v10 = vpop.f32.mrf.mxu0 }
 0x174   :  { %v2792_v41 = vadd.f32 %v4056_v40, %v5755_v29  ;;  %v4103_v13 = vpop.f32.mrf.mxu1 }
 0x175   :  { %v4058_v44 = vpop.f32.mrf.mxu0 }
 0x176   :  { %v5782_v43 = vadd.f32 %v4102_v53, %v2792_v41  ;;  %v4104_v45 = vpop.f32.mrf.mxu1  ;;  %v4059_v48 = vadd.f32 %v4058_v44, %v4057_v10 }
 0x177   :  { %v4105_v49 = vadd.f32 %v4104_v45, %v4103_v13  ;;  %v4060_v50 = vpop.f32.mrf.mxu0 }
 0x178   :  { %v4106_v51 = vpop.f32.mrf.mxu1  ;;  %v2797_v20 = vadd.f32 %v4059_v48, %v5758_v37 }
 0x179   :  { %v4061_v18 = vpop.f32.mrf.mxu0 }
 0x17a   :  { %v4107_v52 = vpop.f32.mrf.mxu1  ;;  %v5785_v4 = vadd.f32 %v4105_v49, %v2797_v20  ;;  %v4062_v55 = vadd.f32 %v4061_v18, %v4060_v50 }
 0x17b   :  { %v4108_v57 = vadd.f32 %v4107_v52, %v4106_v51  ;;  %v4063_v58 = vpop.f32.mrf.mxu0 }
 0x17c   :  { %v2800_v29 = vadd.f32 %v4062_v55, %v5761_v42  ;;  %v4109_v28 = vpop.f32.mrf.mxu1 }
 0x17d   :  { %v4064_v61 = vpop.f32.mrf.mxu0 }
 0x17e   :  { %v5788_v59 = vadd.f32 %v4108_v57, %v2800_v29  ;;  %v4110_v9 = vpop.f32.mrf.mxu1  ;;  %v4065_v62 = vadd.f32 %v4064_v61, %v4063_v58 }
 0x17f   :  { %v4111_v1 = vadd.f32 %v4110_v9, %v4109_v28  ;;  %v4066_v26 = vpop.f32.mrf.mxu0 }
 0x180   :  { %v4112_v2 = vpop.f32.mrf.mxu1  ;;  %v2805_v37 = vadd.f32 %v4065_v62, %v5764_v54 }
 0x181   :  { %v4067_v22 = vpop.f32.mrf.mxu0 }
 0x182   :  { %v4113_v39 = vpop.f32.mrf.mxu1  ;;  %v5791_v6 = vadd.f32 %v4111_v1, %v2805_v37 }
 0x183   :  { %v4131_v7 = vpop.f32.mrf.mxu0 }
 0x184   :  { %v4177_v8 = vpop.f32.mrf.mxu1 }
 0x185   :  { %v4132_v38 = vpop.f32.mrf.mxu0 }
 0x186   :  { %v4133_v42 = vadd.f32 %v4132_v38, %v4131_v7  ;;  %v4178_v11 = vpop.f32.mrf.mxu1 }
 0x187   :  { %v4179_v14 = vadd.f32 %v4178_v11, %v4177_v8  ;;  %v4134_v15 = vpop.f32.mrf.mxu0 }
 0x188   :  { %v2917_v31 = vadd.f32 %v4133_v42, %v5767_v3  ;;  %v4180_v16 = vpop.f32.mrf.mxu1 }
 0x189   :  { %v4135_v0 = vpop.f32.mrf.mxu0 }
 0x18a   :  { %v5794_v46 = vadd.f32 %v4179_v14, %v2917_v31  ;;  %v4136_v17 = vadd.f32 %v4135_v0, %v4134_v15  ;;  %v4181_v23 = vpop.f32.mrf.mxu1 }
 0x18b   :  { %v4182_v54 = vadd.f32 %v4181_v23, %v4180_v16  ;;  %v4137_v24 = vpop.f32.mrf.mxu0 }
 0x18c   :  { %v2920_v25 = vadd.f32 %v4136_v17, %v5770_v12  ;;  %v4183_v27 = vpop.f32.mrf.mxu1 }
 0x18d   :  { %v4138_v60 = vpop.f32.mrf.mxu0 }
 0x18e   :  { %v5797_v56 = vadd.f32 %v4182_v54, %v2920_v25  ;;  %v4139_v47 = vadd.f32 %v4138_v60, %v4137_v24  ;;  %v4184_v30 = vpop.f32.mrf.mxu1 }
 0x18f   :  { %v4185_v32 = vadd.f32 %v4184_v30, %v4183_v27  ;;  %v4140_v33 = vpop.f32.mrf.mxu0 }
 0x190   :  { %v2925_v3 = vadd.f32 %v4139_v47, %v5773_v19  ;;  %v4186_v34 = vpop.f32.mrf.mxu1 }
 0x191   :  { %v4141_v5 = vpop.f32.mrf.mxu0 }
 0x192   :  { %v5800_v63 = vadd.f32 %v4185_v32, %v2925_v3  ;;  %v4142_v36 = vadd.f32 %v4141_v5, %v4140_v33  ;;  %v4187_v40 = vpop.f32.mrf.mxu1 }
 0x193   :  { %v4188_v53 = vadd.f32 %v4187_v40, %v4186_v34  ;;  %v4143_v41 = vpop.f32.mrf.mxu0 }
 0x194   :  { %v2928_v12 = vadd.f32 %v4142_v36, %v5776_v21  ;;  %v4189_v10 = vpop.f32.mrf.mxu1 }
 0x195   :  { %v4144_v13 = vpop.f32.mrf.mxu0 }
 0x196   :  { %v5803_v44 = vadd.f32 %v4188_v53, %v2928_v12  ;;  %v4145_v45 = vadd.f32 %v4144_v13, %v4143_v41  ;;  %v4190_v48 = vpop.f32.mrf.mxu1 }
 0x197   :  { %v4191_v49 = vadd.f32 %v4190_v48, %v4189_v10  ;;  %v4146_v50 = vpop.f32.mrf.mxu0 }
 0x198   :  { %v2933_v19 = vadd.f32 %v4145_v45, %v5779_v35  ;;  %v4192_v51 = vpop.f32.mrf.mxu1 }
 0x199   :  { %v4147_v20 = vpop.f32.mrf.mxu0 }
 0x19a   :  { %v5806_v18 = vadd.f32 %v4191_v49, %v2933_v19  ;;  %v4148_v52 = vadd.f32 %v4147_v20, %v4146_v50  ;;  %v4193_v55 = vpop.f32.mrf.mxu1 }
 0x19b   :  { %v4194_v57 = vadd.f32 %v4193_v55, %v4192_v51  ;;  %v4149_v21 = vpop.f32.mrf.mxu0 }
 0x19c   :  { %v2936_v29 = vadd.f32 %v4148_v52, %v5782_v43  ;;  %v4195_v58 = vpop.f32.mrf.mxu1 }
 0x19d   :  { %v4150_v61 = vpop.f32.mrf.mxu0 }
 0x19e   :  { %v5809_v28 = vadd.f32 %v4194_v57, %v2936_v29  ;;  %v4151_v9 = vadd.f32 %v4150_v61, %v4149_v21  ;;  %v4196_v62 = vpop.f32.mrf.mxu1 }
 0x19f   :  { %v4197_v1 = vadd.f32 %v4196_v62, %v4195_v58  ;;  %v4152_v26 = vpop.f32.mrf.mxu0 }
 0x1a0   :  { %v2941_v35 = vadd.f32 %v4151_v9, %v5785_v4  ;;  %v4198_v2 = vpop.f32.mrf.mxu1 }
 0x1a1   :  { %v4153_v37 = vpop.f32.mrf.mxu0 }
 0x1a2   :  { %v5812_v22 = vadd.f32 %v4197_v1, %v2941_v35  ;;  %v4154_v39 = vadd.f32 %v4153_v37, %v4152_v26  ;;  %v4199_v7 = vpop.f32.mrf.mxu1 }
 0x1a3   :  { %v4200_v8 = vadd.f32 %v4199_v7, %v4198_v2  ;;  %v4155_v11 = vpop.f32.mrf.mxu0 }
 0x1a4   :  { %v2944_v43 = vadd.f32 %v4154_v39, %v5788_v59  ;;  %v4201_v38 = vpop.f32.mrf.mxu1 }
 0x1a5   :  { %v4156_v15 = vpop.f32.mrf.mxu0 }
 0x1a6   :  { %v5815_v42 = vadd.f32 %v4200_v8, %v2944_v43  ;;  %v4202_v14 = vpop.f32.mrf.mxu1  ;;  %v4157_v16 = vadd.f32 %v4156_v15, %v4155_v11 }
 0x1a7   :  { %v4203_v31 = vadd.f32 %v4202_v14, %v4201_v38  ;;  %v4158_v17 = vpop.f32.mrf.mxu0 }
 0x1a8   :  { %v4204_v0 = vpop.f32.mrf.mxu1  ;;  %v2949_v4 = vadd.f32 %v4157_v16, %v5791_v6 }
 0x1a9   :  { %v4159_v54 = vpop.f32.mrf.mxu0 }
 0x1aa   :  { %v4205_v23 = vpop.f32.mrf.mxu1  ;;  %v5818_v24 = vadd.f32 %v4203_v31, %v2949_v4 }
 0x1ab   :  { %v4223_v25 = vpop.f32.mrf.mxu0 }
 0x1ac   :  { %v4269_v27 = vpop.f32.mrf.mxu1 }
 0x1ad   :  { %v4224_v60 = vpop.f32.mrf.mxu0 }
 0x1ae   :  { %v4270_v59 = vpop.f32.mrf.mxu1  ;;  %v4225_v62 = vadd.f32 %v4224_v60, %v4223_v25 }
 0x1af   :  { %v4226_v47 = vpop.f32.mrf.mxu0  ;;  %v4271_v7 = vadd.f32 %v4270_v59, %v4269_v27 }
 0x1b0   :  { %v4272_v30 = vpop.f32.mrf.mxu1  ;;  %v3061_v39 = vadd.f32 %v4225_v62, %v5794_v46 }
 0x1b1   :  { %v4227_v32 = vpop.f32.mrf.mxu0 }
 0x1b2   :  { %v4273_v33 = vpop.f32.mrf.mxu1  ;;  %v4228_v35 = vadd.f32 %v4227_v32, %v4226_v47  ;;  %v3133_v16 = vadd.f32 %v4271_v7, %v3061_v39 }
 0x1b3   :  { %v4229_v3 = vpop.f32.mrf.mxu0  ;;  %v4274_v14 = vadd.f32 %v4273_v33, %v4272_v30 }
 0x1b4   :  { %v4275_v34 = vpop.f32.mrf.mxu1  ;;  %v3064_v11 = vadd.f32 %v4228_v35, %v5797_v56 }
 0x1b5   :  { %v4230_v5 = vpop.f32.mrf.mxu0 }
 0x1b6   :  { %v4276_v36 = vpop.f32.mrf.mxu1  ;;  %v4231_v8 = vadd.f32 %v4230_v5, %v4229_v3  ;;  %v3136_v60 = vadd.f32 %v4274_v14, %v3064_v11 }
 0x1b7   :  { %v4232_v40 = vpop.f32.mrf.mxu0  ;;  %v4277_v17 = vadd.f32 %v4276_v36, %v4275_v34 }
 0x1b8   :  { %v4278_v53 = vpop.f32.mrf.mxu1  ;;  %v3069_v0 = vadd.f32 %v4231_v8, %v5800_v63 }
 0x1b9   :  { %v4233_v41 = vpop.f32.mrf.mxu0 }
 0x1ba   :  { %v4279_v6 = vpop.f32.mrf.mxu1  ;;  %v4234_v4 = vadd.f32 %v4233_v41, %v4232_v40  ;;  %v3141_v33 = vadd.f32 %v4277_v17, %v3069_v0 }
 0x1bb   :  { %v4235_v12 = vpop.f32.mrf.mxu0  ;;  %v4280_v56 = vadd.f32 %v4279_v6, %v4278_v53 }
 0x1bc   :  { %v4281_v10 = vpop.f32.mrf.mxu1  ;;  %v3072_v47 = vadd.f32 %v4234_v4, %v5803_v44 }
 0x1bd   :  { %v4236_v13 = vpop.f32.mrf.mxu0 }
 0x1be   :  { %v4282_v45 = vpop.f32.mrf.mxu1  ;;  %v4237_v3 = vadd.f32 %v4236_v13, %v4235_v12  ;;  %v3144_v39 = vadd.f32 %v4280_v56, %v3072_v47 }
 0x1bf   :  { %v4238_v48 = vpop.f32.mrf.mxu0  ;;  %v4283_v44 = vadd.f32 %v4282_v45, %v4281_v10 }
 0x1c0   :  { %v5820_v49 = vpop.f32.mrf.mxu1  ;;  %v3077_v12 = vadd.f32 %v4237_v3, %v5806_v18 }
 0x1c1   :  { %v4239_v50 = vpop.f32.mrf.mxu0 }
 0x1c2   :  { %v5822_v19 = vpop.f32.mrf.mxu1  ;;  %v4240_v53 = vadd.f32 %v4239_v50, %v4238_v48 }
 0x1c3   :  { %v4241_v51 = vpop.f32.mrf.mxu0  ;;  %v4286_v45 = vadd.f32 %v5822_v19, %v5820_v49 }
 0x1c4   :  { %v5824_v20 = vpop.f32.mrf.mxu1  ;;  %v3080_v10 = vadd.f32 %v4240_v53, %v5809_v28 }
 0x1c5   :  { %v4242_v52 = vpop.f32.mrf.mxu0 }
 0x1c6   :  { %v5826_v55 = vpop.f32.mrf.mxu1  ;;  %v4243_v6 = vadd.f32 %v4242_v52, %v4241_v51 }
 0x1c7   :  { %v4244_v57 = vpop.f32.mrf.mxu0  ;;  %v4289_v18 = vadd.f32 %v5826_v55, %v5824_v20  ;;  %v3152_v55 = vadd.f32 %v4286_v45, %v3080_v10  ;;  %v3292_v45 = vlaneseq }
 0x1c8   :  { %v5828_v29 = vpop.f32.mrf.mxu1  ;;  %v3085_v48 = vadd.f32 %v4243_v6, %v5812_v22 }
 0x1c9   :  { %v4245_v21 = vpop.f32.mrf.mxu0 }
 0x1ca   :  { %v5830_v58 = vpop.f32.mrf.mxu1 }
 0x1cb   :  { %v4247_v61 = vpop.f32.mrf.mxu0  ;;  %v4292_v49 = vadd.f32 %v5830_v58, %v5828_v29 }
 0x1cc   :  { %v5832_v9 = vpop.f32.mrf.mxu1 }
 0x1cd   :  { %v4248_v1 = vpop.f32.mrf.mxu0 }
 0x1ce   :  { %v5834_v26 = vpop.f32.mrf.mxu1  ;;  %v4249_v52 = vadd.f32 %v4248_v1, %v4247_v61 }
 0x1cf   :  { %v4250_v2 = vpop.f32.mrf.mxu0  ;;  %v4295_v1 = vadd.f32 %v5834_v26, %v5832_v9 }
 0x1d0   :  { %v4296_v37 = vpop.f32.mrf.mxu1  ;;  %v3093_v61 = vadd.f32 %v4249_v52, %v5818_v24 }
 0x1d1   :  { %v4251_v43 = vpop.f32.mrf.mxu0 }
 0x1d2   :  { %v4297_v38 = vpop.f32.mrf.mxu1  ;;  %v4246_v43 = vadd.f32 %v4245_v21, %v4244_v57  ;;  %v3149_v21 = vadd.f32 %v4283_v44, %v3077_v12 }
 0x1d3   :  { %v3204_v15 = vpop.f32.mrf.mxu0 }
 0x1d4   :  { %v3228_v31 = vpop.f32.mrf.mxu1  ;;  %v5839_v25 = vadd.f32 %v3204_v15, %v3133_v16  ;;  %v3088_v28 = vadd.f32 %v4246_v43, %v5815_v42  ;;  %v3157_v16 = vadd.f32 %v4289_v18, %v3085_v48  ;;  %v3293_v48 = vshrl.u32 %v3292_v45, 7  ;;  %v3284_v18 = vld [vmem:[%s5906_s2] sm:$0x1] }
 0x1d5   :  { %v4318_v23 = vpop.f32.mrf.mxu0 }
 0x1d6   :  { %v4330_v54 = vpop.f32.mrf.mxu1  ;;  %v3257_v63 = vmul.f32 %v5839_v25, %v5839_v25  ;;  %v3229_v4 = vadd.f32 %v3228_v31, %v3157_v16  ;;  %v3160_v23 = vadd.f32 %v4292_v49, %v3088_v28 }
 0x1d7   :  { %v3207_v46 = vpop.f32.mrf.mxu0 }
 0x1d8   :  { %v3231_v27 = vpop.f32.mrf.mxu1  ;;  %v5841_v59 = vadd.f32 %v3207_v46, %v3136_v60  ;;  %v3165_v46 = vadd.f32 %v4295_v1, %v3093_v61 }
 0x1d9   :  { %v4319_v30 = vpop.f32.mrf.mxu0  ;;  %v3232_v60 = vadd.f32 %v3231_v27, %v3160_v23 }
 0x1da   :  { %v4331_v32 = vpop.f32.mrf.mxu1  ;;  %v3242_v34 = vadd.f32 %v5841_v59, %v5839_v25  ;;  %v3258_v5 = vmul.f32 %v5841_v59, %v5841_v59  ;;  %v3263_v30 = vmul.f32 %v3229_v4, %v3229_v4 }
 0x1db   :  { %v3212_v36 = vpop.f32.mrf.mxu0  ;;  %v3264_v9 = vmul.f32 %v3232_v60, %v3232_v60 }
 0x1dc   :  { %v3236_v40 = vpop.f32.mrf.mxu1  ;;  %v3266_v41 = vadd.f32 %v3258_v5, %v3257_v63  ;;  %v5850_v62 = vadd.f32 %v3212_v36, %v3141_v33 }
 0x1dd   :  { %v4322_v35 = vpop.f32.mrf.mxu0  ;;  %v3237_v24 = vadd.f32 %v3236_v40, %v3165_v46 }
 0x1de   :  { %v4334_v2 = vpop.f32.mrf.mxu1  ;;  %v3243_v13 = vadd.f32 %v3242_v34, %v5850_v62  ;;  %v3259_v37 = vmul.f32 %v5850_v62, %v5850_v62 }
 0x1df   :  { %v3215_v7 = vpop.f32.mrf.mxu0  ;;  %v3265_v63 = vmul.f32 %v3237_v24, %v3237_v24 }
 0x1e0   :  { %v3239_v8 = vpop.f32.mrf.mxu1  ;;  %v3267_v38 = vadd.f32 %v3266_v41, %v3259_v37  ;;  %v5856_v11 = vadd.f32 %v3215_v7, %v3144_v39 }
 0x1e1   :  { %v4323_v50 = vpop.f32.mrf.mxu0 }
 0x1e2   :  { %v4335_v51 = vpop.f32.mrf.mxu1  ;;  %v3244_v14 = vadd.f32 %v3243_v13, %v5856_v11  ;;  %v3260_v57 = vmul.f32 %v5856_v11, %v5856_v11  ;;  %v3294_v50 = vsub.s32 0, %v3293_v48 }
 0x1e3   :  { %v3220_v15 = vpop.f32.mrf.mxu0 }
 0x1e4   :  { %v3268_v19 = vadd.f32 %v3267_v38, %v3260_v57  ;;  %v5870_v22 = vadd.f32 %v3220_v15, %v3149_v21 }
 0x1e5   :  { %v4326_v20 = vpop.f32.mrf.mxu0 }
 0x1e6   :  { %v3245_v0 = vadd.f32 %v3244_v14, %v5870_v22  ;;  %v3261_v17 = vmul.f32 %v5870_v22, %v5870_v22  ;;  %v3288_v14 = vld [vmem:[%s5907_s3] sm:$0x1] }
 0x1e7   :  { %v3223_v42 = vpop.f32.mrf.mxu0 }
 0x1e8   :  { %v3269_v29 = vadd.f32 %v3268_v19, %v3261_v17  ;;  %v3224_v58 = vadd.f32 %v3223_v42, %v3152_v55 }
 0x1e9   :  { %v4327_v54 = vpop.f32.mrf.mxu0 }
 0x1ea   :  { %v3246_v47 = vadd.f32 %v3245_v0, %v3224_v58  ;;  %v3262_v56 = vmul.f32 %v3224_v58, %v3224_v58 }
 0x1ec   :  { %v3247_v32 = vadd.f32 %v3246_v47, %v3229_v4  ;;  %v3270_v33 = vadd.f32 %v3269_v29, %v3262_v56 }
 0x1ee   :  { %v3248_v26 = vadd.f32 %v3247_v32, %v3232_v60  ;;  %v3271_v3 = vadd.f32 %v3270_v33, %v3263_v30 }
 0x1f0   :  { %v3249_v34 = vadd.f32 %v3248_v26, %v3237_v24  ;;  %v3272_v5 = vadd.f32 %v3271_v3, %v3264_v9 }
 0x1f2   :  { %v3250_v36 = vrot.slane %v3249_v34, 4  ;;  %v3273_v31 = vadd.f32 %v3272_v5, %v3265_v63 }
 0x1f4   :  { %v3251_v41 = vadd.f32 %v3250_v36, %v3249_v34  ;;  %v3274_v44 = vrot.slane %v3273_v31, 4 }
 0x1f6   :  { %v3252_v53 = vrot.slane %v3251_v41, 2  ;;  %v3275_v6 = vadd.f32 %v3274_v44, %v3273_v31 }
 0x1f8   :  { %v3253_v27 = vadd.f32 %v3252_v53, %v3251_v41  ;;  %v3276_v35 = vrot.slane %v3275_v6, 2 }
 0x1fa   :  { %v3254_v2 = vrot.slane %v3253_v27, 1  ;;  %v3277_v12 = vadd.f32 %v3276_v35, %v3275_v6 }
 0x1fc   :  { %v3255_v13 = vadd.f32 %v3254_v2, %v3253_v27  ;;  %v3278_v40 = vrot.slane %v3277_v12, 1 }
 0x1fe   :  { %v3256_v37 = vmul.f32 0.013888889, %v3255_v13  ;;  %v3279_v39 = vadd.f32 %v3278_v40, %v3277_v12 }
 0x200   :  { %v3280_v7 = vmul.f32 0.013888889, %v3279_v39  ;;  %v3281_v8 = vmul.f32 %v3256_v37, %v3256_v37 }
 0x202   :  { %v3282_v43 = vsub.f32 %v3280_v7, %v3281_v8 }
 0x204   :  { %v3283_v38 = vmax.f32 %v3282_v43, 0.0 }
 0x206   :  { %v3285_v10 = vadd.f32 1e-05, %v3283_v38 }
 0x208   :  { %4715 = vrsqrt.f32 %v3285_v10 }
 0x215   :  { %v4716_v51 = vpop.eup %4715 }
 0x216   :  { %v3287_v52 = vmul.f32 %v4716_v51, %v3284_v18 }
 0x218   :  { %v3289_v57 = vmul.f32 %v3287_v52, %v3256_v37  ;;  %v3295_v21 = vrot.slane %v3287_v52, %v3294_v50 }
 0x21a   :  { %v3290_v15 = vsub.f32 %v3288_v14, %v3289_v57  ;;  %v3297_v28 = vmul.f32 %v3295_v21, %v5839_v25  ;;  %v3298_v49 = vmul.f32 %v3295_v21, %v5841_v59  ;;  %v3299_v19 = vmul.f32 %v3295_v21, %v5850_v62 }
 0x21b   :  { %v3300_v16 = vmul.f32 %v3295_v21, %v5856_v11  ;;  %v3301_v20 = vmul.f32 %v3295_v21, %v5870_v22  ;;  %v3302_v55 = vmul.f32 %v3295_v21, %v3224_v58  ;;  %v3303_v61 = vmul.f32 %v3295_v21, %v3229_v4 }
 0x21c   :  { %v3304_v1 = vmul.f32 %v3295_v21, %v3232_v60  ;;  %v3305_v0 = vmul.f32 %v3295_v21, %v3237_v24  ;;  %v3310_v17 = vrot.slane %v3290_v15, %v3294_v50 }
 0x21e   :  { %v3312_v42 = vadd.f32 %v3310_v17, %v3297_v28  ;;  %v3313_v23 = vadd.f32 %v3310_v17, %v3298_v49  ;;  %v3314_v29 = vadd.f32 %v3310_v17, %v3299_v19  ;;  %v3315_v54 = vadd.f32 %v3310_v17, %v3300_v16 }
 0x21f   :  { %v3316_v46 = vadd.f32 %v3310_v17, %v3301_v20  ;;  %v3317_v47 = vadd.f32 %v3310_v17, %v3302_v55  ;;  %v3318_v25 = vadd.f32 %v3310_v17, %v3303_v61  ;;  %v3319_v56 = vadd.f32 %v3310_v17, %v3304_v1 }
 0x220   :  { %v3320_v59 = vadd.f32 %v3310_v17, %v3305_v0  ;;  %v3321_v30 = vmax.f32 %v3312_v42, 0.0  ;;  %v3322_v62 = vmax.f32 %v3313_v23, 0.0  ;;  %v3323_v32 = vmax.f32 %v3314_v29, 0.0 }
 0x221   :  { %v3324_v11 = vmax.f32 %v3315_v54, 0.0  ;;  %v3325_v33 = vmax.f32 %v3316_v46, 0.0  ;;  %v3326_v22 = vmax.f32 %v3317_v47, 0.0  ;;  %v3327_v58 = vmax.f32 %v3318_v25, 0.0 }
 0x222   :  { %v3328_v4 = vmax.f32 %v3319_v56, 0.0  ;;  %v3329_v60 = vmax.f32 %v3320_v59, 0.0  ;;  %v3727_v24 = vpack.c.bf16 %v3322_v62, %v3321_v30 }
 0x223   :  { %v3732_v9 = vpack.c.bf16 %v3324_v11, %v3323_v32  ;;  %v3737_v26 = vpack.c.bf16 %v3326_v22, %v3325_v33 }
 0x224   :  { %v3723_v3 = vpack.c.bf16 %v3329_v60, %v3329_v60  ;;  %3728 = vst [vmem:[%s5908_s4] sm:$0xff] %v3727_v24   ;;  %v3742_v63 = vpack.c.bf16 %v3328_v4, %v3327_v58 }
 0x225   :  { %3744 = vst [vmem:[%s5908_s4 + $0x8] sm:$0xff] %v3732_v9   ;;  %3745 = vst [vmem:[%s5908_s4 + $0x10] sm:$0xff] %v3737_v26  }
 0x226   :  { %3746 = vst [vmem:[%s5908_s4 + $0x18] sm:$0xff] %v3742_v63   ;;  %3375 = vst [vmem:[%s5908_s4 + $0x20] sm:$0xf] %v3723_v3 }

// kernel: attention_network_coord_forward.5
= control target key start
LH: loop header
LB: loop body
LE: loop exit
PB: predicated region body
PF: predicated region fallthrough
CT: control target
= control target key end

     0   :  { %v1887_v40 = vmov 0.0   ;;  %vm1888_vm0 = vmmov 0   ;;  %vm465_vm1 = vcmask 261120   ;;  %s2333_s0 = inlined_call_operand.vmem [shape: bf16[8,800], index: 0, kind: input, shape index: {}]   ;;  %s2334_s1 = inlined_call_operand.vmem [shape: bf16[800,128], index: 1, kind: input, shape index: {}]   ;;  %s2335_s2 = inlined_call_operand.vmem [shape: f32[1,128], index: 2, kind: input, shape index: {}]   ;;  %s2336_s3 = inlined_call_operand.vmem [shape: f32[1,128], index: 3, kind: input, shape index: {}]   ;;  %s2337_s4 = inlined_call_operand.vmem [shape: bf16[4,128,128], index: 4, kind: input, shape index: {}]   ;;  %s2338_s5 = inlined_call_operand.vmem [shape: f32[1,128], index: 5, kind: input, shape index: {}]   ;;  %s2339_s6 = inlined_call_operand.vmem [shape: bf16[128,128], index: 6, kind: input, shape index: {}]   ;;  %s2340_s7 = inlined_call_operand.vmem [shape: f32[1,128], index: 7, kind: input, shape index: {}]   ;;  %s2341_s8 = inlined_call_operand.vmem [shape: bf16[128,128], index: 8, kind: input, shape index: {}]   ;;  %s2342_s9 = inlined_call_operand.vmem [shape: f32[1,128], index: 9, kind: input, shape index: {}]   ;;  %s2343_s10 = inlined_call_operand.hbm [shape: f32[2,128], index: 10, kind: output, shape index: {}]  }
   0x1   :  { %v1758_v0 = vld [vmem:[%s2334_s1 + $0x78] sm:$0xff]   ;;  %v1762_v4 = vld [vmem:[%s2334_s1 + $0x70] sm:$0xff]   ;;  %v1766_v8 = vld [vmem:[%s2334_s1 + $0x68] sm:$0xff]  }
   0x2   :  { %v1759_v1 = vld [vmem:[%s2334_s1 + $0xf8] sm:$0xff]   ;;  %1504 = vmatprep.subr.bf16.mxu0 %v1758_v0  ;;  %v1763_v5 = vld [vmem:[%s2334_s1 + $0xf0] sm:$0xff]   ;;  %v1767_v9 = vld [vmem:[%s2334_s1 + $0xe8] sm:$0xff]  }
   0x3   :  { %v1760_v2 = vld [vmem:[%s2334_s1 + $0x38] sm:$0xff]   ;;  %1526 = vmatprep.subr.bf16.mxu1 %v1759_v1  ;;  %v1764_v6 = vld [vmem:[%s2334_s1 + $0x30] sm:$0xff]   ;;  %v1768_v10 = vld [vmem:[%s2334_s1 + $0x28] sm:$0xff]  }
   0x4   :  { %v1761_v3 = vld [vmem:[%s2334_s1 + $0xb8] sm:$0xff]   ;;  %1505 = vmatpush3.bf16.msra.mxu0 %v1760_v2  ;;  %v1765_v7 = vld [vmem:[%s2334_s1 + $0xb0] sm:$0xff]   ;;  %v1769_v11 = vld [vmem:[%s2334_s1 + $0xa8] sm:$0xff]  }
   0x5   :  { %1527 = vmatpush3.bf16.msra.mxu1 %v1761_v3  ;;  %1506 = vmatprep.subr.bf16.mxu0 %v1762_v4  ;;  %v1770_v12 = vld [vmem:[%s2334_s1 + $0x60] sm:$0xff]   ;;  %v1774_v16 = vld [vmem:[%s2334_s1 + $0x58] sm:$0xff]   ;;  %v1778_v20 = vld [vmem:[%s2334_s1 + $0x50] sm:$0xff]  }
   0x6   :  { %1528 = vmatprep.subr.bf16.mxu1 %v1763_v5  ;;  %v1771_v13 = vld [vmem:[%s2334_s1 + $0xe0] sm:$0xff]   ;;  %v1775_v17 = vld [vmem:[%s2334_s1 + $0xd8] sm:$0xff]   ;;  %v1779_v21 = vld [vmem:[%s2334_s1 + $0xd0] sm:$0xff]  }
   0x7   :  { %v1772_v14 = vld [vmem:[%s2334_s1 + $0x20] sm:$0xff]   ;;  %v1776_v18 = vld [vmem:[%s2334_s1 + $0x18] sm:$0xff]   ;;  %v1780_v22 = vld [vmem:[%s2334_s1 + $0x10] sm:$0xff]  }
   0x8   :  { %1507 = vmatpush3.bf16.msra.mxu0 %v1764_v6  ;;  %v1773_v15 = vld [vmem:[%s2334_s1 + $0xa0] sm:$0xff]   ;;  %v1777_v19 = vld [vmem:[%s2334_s1 + $0x98] sm:$0xff]   ;;  %v1781_v23 = vld [vmem:[%s2334_s1 + $0x90] sm:$0xff]  }
   0x9   :  { %1529 = vmatpush3.bf16.msra.mxu1 %v1765_v7  ;;  %1508 = vmatprep.subr.bf16.mxu0 %v1766_v8  ;;  %v1782_v24 = vld [vmem:[%s2334_s1 + $0x48] sm:$0xff]   ;;  %v1786_v28 = vld [vmem:[%s2334_s1 + $0x40] sm:$0xff]   ;;  %v1794_v38 = vld [vmem:[%s2334_s1 + $0x178] sm:$0xff]  }
   0xa   :  { %1530 = vmatprep.subr.bf16.mxu1 %v1767_v9  ;;  %v1783_v25 = vld [vmem:[%s2334_s1 + $0xc8] sm:$0xff]   ;;  %v1787_v29 = vld [vmem:[%s2334_s1 + $0xc0] sm:$0xff]   ;;  %v1795_v39 = vld [vmem:[%s2334_s1 + $0x138] sm:$0xff]  }
   0xb   :  { %v1784_v26 = vld [vmem:[%s2334_s1 + $0x8] sm:$0xff]   ;;  %v1788_v30 = vld [vmem:[%s2334_s1] sm:$0xff]   ;;  %v1796_v41 = vld [vmem:[%s2334_s1 + $0x170] sm:$0xff]  }
   0xc   :  { %1509 = vmatpush3.bf16.msra.mxu0 %v1768_v10  ;;  %v1785_v27 = vld [vmem:[%s2334_s1 + $0x88] sm:$0xff]   ;;  %v1789_v31 = vld [vmem:[%s2334_s1 + $0x80] sm:$0xff]   ;;  %v1797_v42 = vld [vmem:[%s2334_s1 + $0x130] sm:$0xff]  }
   0xd   :  { %1531 = vmatpush3.bf16.msra.mxu1 %v1769_v11  ;;  %1510 = vmatprep.subr.bf16.mxu0 %v1770_v12  ;;  %v37_v32 = vld [vmem:[%s2333_s0] sm:$0xff]  ;;  %v38_v33 = vld [vmem:[%s2333_s0 + $0x8] sm:$0xff]  ;;  %v1802_v47 = vld [vmem:[%s2334_s1 + $0x158] sm:$0xff]  }
   0xe   :  { %1532 = vmatprep.subr.bf16.mxu1 %v1771_v13  ;;  %v1347_v34 = vcombine.low %v37_v32, %v37_v32  ;;  %v1348_v35 = vcombine.high %v37_v32, %v37_v32  ;;  %v1349_v36 = vcombine.low %v38_v33, %v38_v33  ;;  %v1350_v37 = vcombine.high %v38_v33, %v38_v33  ;;  %v1798_v43 = vld [vmem:[%s2334_s1 + $0x168] sm:$0xff]   ;;  %v1800_v45 = vld [vmem:[%s2334_s1 + $0x160] sm:$0xff]   ;;  %v1803_v49 = vld [vmem:[%s2334_s1 + $0x118] sm:$0xff]  }
   0xf   :  { %v1799_v44 = vld [vmem:[%s2334_s1 + $0x128] sm:$0xff]   ;;  %v1801_v46 = vld [vmem:[%s2334_s1 + $0x120] sm:$0xff]   ;;  %v1804_v50 = vld [vmem:[%s2334_s1 + $0x150] sm:$0xff]  }
  0x10   :  { %1511 = vmatpush3.bf16.msra.mxu0 %v1772_v14  ;;  %501 = vmatprep.mubr.bf16.mxu0 %v1348_v35  ;;  %v1808_v48 = vld [vmem:[%s2334_s1 + $0x188] sm:$0xff]   ;;  %v1811_v51 = vld [vmem:[%s2334_s1 + $0x180] sm:$0xff]   ;;  %v39_v52 = vld [vmem:[%s2333_s0 + $0x10] sm:$0xff] }
  0x11   :  { %1533 = vmatpush3.bf16.msra.mxu1 %v1773_v15  ;;  %1512 = vmatprep.subr.bf16.mxu0 %v1774_v16  ;;  %v1352_v53 = vcombine.high %v39_v52, %v39_v52  ;;  %v1814_v54 = vld [vmem:[%s2333_s0 + $0x18] ss:$0 sps:$4 sm:$0xff]   ;;  %v1805_v55 = vld [vmem:[%s2334_s1 + $0x110] sm:$0xff]   ;;  %v1806_v56 = vld [vmem:[%s2334_s1 + $0x148] sm:$0xff]   ;;  %v1351_v60 = vcombine.low %v39_v52, %v39_v52 }
  0x12   :  { %1534 = vmatprep.subr.bf16.mxu1 %v1775_v17  ;;  %541 = vmatprep.mubr.bf16.mxu1 %v1350_v37  ;;  %v1807_v57 = vld [vmem:[%s2334_s1 + $0x108] sm:$0xff]   ;;  %v1809_v58 = vld [vmem:[%s2334_s1 + $0x140] sm:$0xff]  }
  0x13   :  { %v1810_v59 = vld [vmem:[%s2334_s1 + $0x100] sm:$0xff]  }
  0x14   :  { %1513 = vmatpush3.bf16.msra.mxu0 %v1776_v18 }
  0x15   :  { %1535 = vmatpush3.bf16.msra.mxu1 %v1777_v19  ;;  %1514 = vmatprep.subr.bf16.mxu0 %v1778_v20 }
  0x16   :  { %1536 = vmatprep.subr.bf16.mxu1 %v1779_v21 }
  0x18   :  { %1515 = vmatpush3.bf16.msra.mxu0 %v1780_v22 }
  0x19   :  { %1537 = vmatpush3.bf16.msra.mxu1 %v1781_v23  ;;  %1516 = vmatprep.subr.bf16.mxu0 %v1782_v24 }
  0x1a   :  { %1538 = vmatprep.subr.bf16.mxu1 %v1783_v25 }
  0x1c   :  { %1517 = vmatpush3.bf16.msra.mxu0 %v1784_v26 }
  0x1d   :  { %1539 = vmatpush3.bf16.msra.mxu1 %v1785_v27  ;;  %1518 = vmatprep.subr.bf16.mxu0 %v1786_v28 }
  0x1e   :  { %1540 = vmatprep.subr.bf16.mxu1 %v1787_v29 }
  0x20   :  { %1519 = vmatpush3.bf16.msra.mxu0 %v1788_v30 }
  0x21   :  { %1541 = vmatpush3.bf16.msra.mxu1 %v1789_v31  ;;  %1548 = vmatprep.subr.bf16.mxu0 %v1794_v38 }
  0x22   :  { %1627 = vmatprep.subr.bf16.mxu1 %v1887_v40 }
  0x23   :  { %502 = vmatmul.mubr.bf16.vlgmr.msra.gmra.mxu0 %v1347_v34 }
  0x24   :  { %542 = vmatmul.mubr.bf16.vlgmr.msra.gmra.mxu1 %v1349_v36  ;;  %1549 = vmatpush3.bf16.msra.mxu0 %v1795_v39 }
  0x25   :  { %1631 = vmatprep.mubr.msk.bf16.mxu1 %vm1888_vm0, %v1887_v40  ;;  %1550 = vmatprep.subr.bf16.mxu0 %v1796_v41 }
  0x26   :  { %1628 = vmatpush3.bf16.msra.mxu1 %v1808_v48  ;;  %581 = vmatprep.mubr.bf16.mxu0 %v1352_v53 }
  0x27   :  { %1629 = vmatprep.subr.bf16.mxu1 %v1887_v40 }
  0x28   :  { %1551 = vmatpush3.bf16.msra.mxu0 %v1797_v42 }
  0x29   :  { %1552 = vmatprep.subr.bf16.mxu0 %v1798_v43 }
  0x2a   :  { %1630 = vmatpush3.bf16.msra.mxu1 %v1811_v51 }
  0x2b   :  { %1635 = vmatprep.subr.bf16.mxu1 %v1887_v40 }
  0x2c   :  { %1553 = vmatpush3.bf16.msra.mxu0 %v1799_v44 }
  0x2d   :  { %1554 = vmatprep.subr.bf16.mxu0 %v1800_v45  ;;  %1632 = vmatmul.mubr.msk.bf16.vlgmr.msra.gmra.mxu1 %vm465_vm1, %v1814_v54 }
  0x2e   :  { %1651 = vmatprep.mubr.msk.bf16.mxu1 %vm1888_vm0, %v1887_v40 }
  0x30   :  { %1555 = vmatpush3.bf16.msra.mxu0 %v1801_v46 }
  0x31   :  { %1556 = vmatprep.subr.bf16.mxu0 %v1802_v47 }
  0x34   :  { %1557 = vmatpush3.bf16.msra.mxu0 %v1803_v49 }
  0x35   :  { %1558 = vmatprep.subr.bf16.mxu0 %v1804_v50 }
  0x38   :  { %1559 = vmatpush3.bf16.msra.mxu0 %v1805_v55 }
  0x39   :  { %1560 = vmatprep.subr.bf16.mxu0 %v1806_v56 }
  0x3c   :  { %1561 = vmatpush3.bf16.msra.mxu0 %v1807_v57 }
  0x3d   :  { %1562 = vmatprep.subr.bf16.mxu0 %v1809_v58 }
  0x40   :  { %1563 = vmatpush3.bf16.msra.mxu0 %v1810_v59 }
  0x41   :  { %1655 = vmatprep.subr.bf16.mxu0 %v1887_v40 }
  0x43   :  { %582 = vmatmul.mubr.bf16.vlgmr.msra.gmra.mxu0 %v1351_v60 }
  0x44   :  { %1671 = vmatprep.mubr.msk.bf16.mxu0 %vm1888_vm0, %v1887_v40 }
  0x45   :  { %15 = vsyncpa [#allocation3], 0  ;;  %v1815_v61 = vld [vmem:[%s2337_s4 + $0x38] sm:$0xff]   ;;  %v1817_v63 = vld [vmem:[%s2337_s4 + $0x30] sm:$0xff]   ;;  %v655_v55 = vlaneseq  ;;  %s1889_s27 = smov [#allocation2]  }
  0x46   :  { %v1816_v62 = vld [vmem:[%s2337_s4 + $0x78] sm:$0xff]   ;;  %1656 = vmatpush3.bf16.msra.mxu0 %v1815_v61  ;;  %v1818_v0 = vld [vmem:[%s2337_s4 + $0x70] sm:$0xff]   ;;  %v1819_v1 = vld [vmem:[%s2337_s4 + $0x28] sm:$0xff]   ;;  %s1339_s28 = sshll.u32 %s1889_s27, 4  ;;  %s1340_s28 = int_to_ptr.vmem [resolvable:$true] %s1339_s28 }
  0x47   :  { %1636 = vmatpush3.bf16.msra.mxu1 %v1816_v62  ;;  %1657 = vmatprep.subr.bf16.mxu0 %v1887_v40  ;;  %v1820_v2 = vld [vmem:[%s2337_s4 + $0x68] sm:$0xff]   ;;  %v1821_v3 = vld [vmem:[%s2337_s4 + $0x20] sm:$0xff]   ;;  %v1823_v5 = vld [vmem:[%s2337_s4 + $0x18] sm:$0xff]   ;;  %v656_v56 = vshrl.u32 %v655_v55, 7  ;;  %p1870_p1 = scmp.lt.s32.totalorder %s1340_s28, %s1340_s28 }
  0x48   :  { %1637 = vmatprep.subr.bf16.mxu1 %v1887_v40  ;;  %v1822_v4 = vld [vmem:[%s2337_s4 + $0x60] sm:$0xff]   ;;  %v1824_v6 = vld [vmem:[%s2337_s4 + $0x58] sm:$0xff]   ;;  %v1825_v7 = vld [vmem:[%s2337_s4 + $0x10] sm:$0xff]  }
  0x49   :  { %v1826_v8 = vld [vmem:[%s2337_s4 + $0x50] sm:$0xff]   ;;  %v1827_v9 = vld [vmem:[%s2337_s4 + $0x8] sm:$0xff]   ;;  %v1829_v11 = vld [vmem:[%s2337_s4] sm:$0xff]   ;;  %v657_v58 = vsub.s32 0, %v656_v56 }
  0x4a   :  { %1658 = vmatpush3.bf16.msra.mxu0 %v1817_v63  ;;  %v1828_v10 = vld [vmem:[%s2337_s4 + $0x48] sm:$0xff]   ;;  %v1830_v12 = vld [vmem:[%s2337_s4 + $0x40] sm:$0xff]  }
  0x4b   :  { %1638 = vmatpush3.bf16.msra.mxu1 %v1818_v0  ;;  %1659 = vmatprep.subr.bf16.mxu0 %v1887_v40  ;;  %v647_v57 = vld [vmem:[%s2335_s2] sm:$0x1] }
  0x4c   :  { %1639 = vmatprep.subr.bf16.mxu1 %v1887_v40  ;;  %v651_v61 = vld [vmem:[%s2336_s3] sm:$0x1] }
  0x4e   :  { %1660 = vmatpush3.bf16.msra.mxu0 %v1819_v1 }
  0x4f   :  { %1640 = vmatpush3.bf16.msra.mxu1 %v1820_v2  ;;  %1661 = vmatprep.subr.bf16.mxu0 %v1887_v40 }
  0x50   :  { %1641 = vmatprep.subr.bf16.mxu1 %v1887_v40 }
  0x52   :  { %1662 = vmatpush3.bf16.msra.mxu0 %v1821_v3 }
  0x53   :  { %1642 = vmatpush3.bf16.msra.mxu1 %v1822_v4  ;;  %1663 = vmatprep.subr.bf16.mxu0 %v1887_v40 }
  0x54   :  { %1643 = vmatprep.subr.bf16.mxu1 %v1887_v40 }
  0x56   :  { %1664 = vmatpush3.bf16.msra.mxu0 %v1823_v5  ;;  %v1831_v5 = vld [vmem:[%s2337_s4 + $0xf8] sm:$0xff]  }
  0x57   :  { %1644 = vmatpush3.bf16.msra.mxu1 %v1824_v6  ;;  %1665 = vmatprep.subr.bf16.mxu0 %v1887_v40 }
  0x58   :  { %1645 = vmatprep.subr.bf16.mxu1 %v1887_v40 }
  0x5a   :  { %1666 = vmatpush3.bf16.msra.mxu0 %v1825_v7  ;;  %v1832_v7 = vld [vmem:[%s2337_s4 + $0xb8] sm:$0xff]  }
  0x5b   :  { %1646 = vmatpush3.bf16.msra.mxu1 %v1826_v8  ;;  %1667 = vmatprep.subr.bf16.mxu0 %v1887_v40 }
  0x5c   :  { %1647 = vmatprep.subr.bf16.mxu1 %v1887_v40 }
  0x5e   :  { %1668 = vmatpush3.bf16.msra.mxu0 %v1827_v9  ;;  %v1833_v9 = vld [vmem:[%s2337_s4 + $0xf0] sm:$0xff]  }
  0x5f   :  { %1648 = vmatpush3.bf16.msra.mxu1 %v1828_v10  ;;  %1669 = vmatprep.subr.bf16.mxu0 %v1887_v40  ;;  %v1834_v10 = vld [vmem:[%s2337_s4 + $0xb0] sm:$0xff]  }
  0x60   :  { %1649 = vmatprep.subr.bf16.mxu1 %v1887_v40 }
  0x62   :  { %1670 = vmatpush3.bf16.msra.mxu0 %v1829_v11  ;;  %v1835_v11 = vld [vmem:[%s2337_s4 + $0xe8] sm:$0xff]  }
  0x63   :  { %1650 = vmatpush3.bf16.msra.mxu1 %v1830_v12  ;;  %1695 = vmatprep.subr.bf16.mxu0 %v1887_v40  ;;  %v1836_v12 = vld [vmem:[%s2337_s4 + $0xa8] sm:$0xff]  }
  0x64   :  { %1675 = vmatprep.subr.bf16.mxu1 %v1887_v40 }
  0xe3   :  { %v1520_v13 = vpop.f32.mrf.mxu0 }
  0xe4   :  { %v1542_v14 = vpop.f32.mrf.mxu1 }
  0xe5   :  { %v1521_v15 = vpop.f32.mrf.mxu0 }
  0xe6   :  { %v1543_v16 = vpop.f32.mrf.mxu1  ;;  %v1522_v25 = vadd.f32 %v1521_v15, %v1520_v13  ;;  %v1837_v13 = vld [vmem:[%s2337_s4 + $0xe0] sm:$0xff]   ;;  %v1839_v15 = vld [vmem:[%s2337_s4 + $0xd8] sm:$0xff]  }
  0xe7   :  { %v1523_v17 = vpop.f32.mrf.mxu0  ;;  %v1544_v26 = vadd.f32 %v1543_v16, %v1542_v14  ;;  %v1838_v14 = vld [vmem:[%s2337_s4 + $0xa0] sm:$0xff]   ;;  %v1840_v16 = vld [vmem:[%s2337_s4 + $0x98] sm:$0xff]  }
  0xe8   :  { %v1545_v18 = vpop.f32.mrf.mxu1  ;;  %v1841_v17 = vld [vmem:[%s2337_s4 + $0xd0] sm:$0xff]  }
  0xe9   :  { %v1524_v19 = vpop.f32.mrf.mxu0  ;;  %v544_v29 = vadd.f32 %v1544_v26, %v1522_v25  ;;  %v1842_v18 = vld [vmem:[%s2337_s4 + $0x90] sm:$0xff]   ;;  %v1847_v25 = vld [vmem:[%s2339_s6 + $0x38] sm:$0xff]  }
  0xea   :  { %v1546_v20 = vpop.f32.mrf.mxu1  ;;  %v1843_v19 = vld [vmem:[%s2337_s4 + $0xc8] sm:$0xff]   ;;  %v1848_v26 = vld [vmem:[%s2339_s6 + $0x30] sm:$0xff]  }
  0xeb   :  { %v1844_v20 = vld [vmem:[%s2337_s4 + $0x88] sm:$0xff]  }
  0xed   :  { %v623_v21 = vpop.f32.mrf.mxu1 }
  0xef   :  { %v1633_v22 = vpop.f32.mrf.mxu1 }
  0xf0   :  { %v1846_v22 = vld [vmem:[%s2337_s4 + $0x80] sm:$0xff]  }
  0xf1   :  { %v626_v23 = vpop.f32.mrf.mxu1 }
  0xf3   :  { %v1634_v24 = vpop.f32.mrf.mxu1 }
 0x103   :  { %v1564_v27 = vpop.f32.mrf.mxu0 }
 0x105   :  { %v1565_v28 = vpop.f32.mrf.mxu0 }
 0x106   :  { %v1566_v30 = vadd.f32 %v1565_v28, %v1564_v27  ;;  %v1849_v27 = vld [vmem:[%s2339_s6 + $0x28] sm:$0xff]   ;;  %v1850_v28 = vld [vmem:[%s2339_s6 + $0x20] sm:$0xff]  }
 0x107   :  { %v1567_v31 = vpop.f32.mrf.mxu0 }
 0x108   :  { %v584_v32 = vadd.f32 %v1566_v30, %v544_v29  ;;  %v1851_v29 = vld [vmem:[%s2339_s6 + $0x18] sm:$0xff]   ;;  %v1852_v30 = vld [vmem:[%s2339_s6 + $0x10] sm:$0xff]   ;;  %v1853_v31 = vld [vmem:[%s2339_s6 + $0x8] sm:$0xff]  }
 0x109   :  { %v1568_v33 = vpop.f32.mrf.mxu0 }
 0x10a   :  { %v624_v34 = vadd.f32 %v623_v21, %v584_v32  ;;  %v1845_v21 = vld [vmem:[%s2337_s4 + $0xc0] sm:$0xff]   ;;  %v1855_v33 = vld [vmem:[%s2341_s8 + $0x38] sm:$0xff]  }
 0x10b   :  { %v1854_v32 = vld [vmem:[%s2339_s6] sm:$0xff]  }
 0x10c   :  { %v629_v35 = vrot.slane %v624_v34, 4  ;;  %v636_v36 = vmul.f32 %v624_v34, %v624_v34 }
 0x10e   :  { %v630_v37 = vadd.f32 %v629_v35, %v624_v34  ;;  %v637_v38 = vrot.slane %v636_v36, 4  ;;  %v1857_v35 = vld [vmem:[%s2341_s8 + $0x28] sm:$0xff]  }
 0x110   :  { %v631_v39 = vrot.slane %v630_v37, 2  ;;  %v638_v41 = vadd.f32 %v637_v38, %v636_v36  ;;  %v1858_v36 = vld [vmem:[%s2341_s8 + $0x20] sm:$0xff]   ;;  %v1860_v38 = vld [vmem:[%s2341_s8 + $0x10] sm:$0xff]  }
 0x112   :  { %v632_v42 = vadd.f32 %v631_v39, %v630_v37  ;;  %v639_v43 = vrot.slane %v638_v41, 2  ;;  %v1859_v37 = vld [vmem:[%s2341_s8 + $0x18] sm:$0xff]  }
 0x114   :  { %v633_v44 = vrot.slane %v632_v42, 1  ;;  %v640_v45 = vadd.f32 %v639_v43, %v638_v41 }
 0x116   :  { %v634_v46 = vadd.f32 %v633_v44, %v632_v42  ;;  %v641_v47 = vrot.slane %v640_v45, 1 }
 0x118   :  { %v642_v48 = vadd.f32 %v641_v47, %v640_v45  ;;  %v635_v49 = vmul.f32 0.125, %v634_v46 }
 0x11a   :  { %v643_v50 = vmul.f32 0.125, %v642_v48  ;;  %v644_v51 = vmul.f32 %v635_v49, %v635_v49 }
 0x11c   :  { %v645_v52 = vsub.f32 %v643_v50, %v644_v51 }
 0x11e   :  { %v646_v53 = vmax.f32 %v645_v52, 0.0 }
 0x120   :  { %v648_v54 = vadd.f32 1e-05, %v646_v53  ;;  %v1485_v53 = vld [vmem:[%s2338_s5] ss:$0 sm:$0xff] }
 0x122   :  { %1863 = vrsqrt.f32 %v648_v54 }
 0x12f   :  { %v1864_v59 = vpop.eup %1863 }
 0x130   :  { %v650_v60 = vmul.f32 %v1864_v59, %v647_v57 }
 0x132   :  { %v652_v62 = vmul.f32 %v650_v60, %v635_v49  ;;  %v658_v63 = vrot.slane %v650_v60, %v657_v58 }
 0x134   :  { %v653_v0 = vsub.f32 %v651_v61, %v652_v62  ;;  %v660_v1 = vmul.f32 %v658_v63, %v624_v34  ;;  %v1856_v34 = vld [vmem:[%s2341_s8 + $0x30] sm:$0xff]   ;;  %v1861_v63 = vld [vmem:[%s2341_s8 + $0x8] sm:$0xff]  }
 0x136   :  { %v665_v2 = vrot.slane %v653_v0, %v657_v58  ;;  %v1862_v0 = vld [vmem:[%s2341_s8] sm:$0xff]  }
 0x138   :  { %v667_v3 = vadd.f32 %v665_v2, %v660_v1  ;;  %v1486_v1 = vld [vmem:[%s2340_s7] ss:$0 sm:$0xff]  ;;  %s1865_s7 = scalar_lea.vmem %s1340_s28, 32 }
 0x139   :  { %p1866_p0 = scmp.ne.s32.totalorder %s1340_s28, %s1865_s7  ;;  %p1871_p2 = scmp.lt.s32.totalorder %s1865_s7, %s1865_s7 }
 0x13a   :  { %v668_v4 = vmax.f32 %v667_v3, 0.0 }
 0x13b   :  { %p1872_p3 = por %p1871_p2, %p1870_p1 }
 0x13c   :  { %v669_v6 = vpack.c.bf16 %v668_v4, %v668_v4 }
 0x13d   :  { %p1873_p4 = pnand %p1872_p3, %p1866_p0 }
 0x13e   :  { %1672 = vmatmul.mubr.bf16.vlgmr.msra.gmra.mxu0 %v669_v6  ;;  %v704_v8 = vrot.slane %v669_v6, 1  ;;  %v1007_v23 = vrot.slane %v669_v6, 3  ;;  %v899_v24 = vrot.slane %v669_v6, 2 }
 0x13f   :  { %1696 = vmatpush3.bf16.msra.mxu0 %v1831_v5  ;;  %1711 = vmatprep.mubr.msk.bf16.mxu0 %vm1888_vm0, %v1887_v40 }
 0x140   :  { %1652 = vmatmul.mubr.bf16.vlgmr.msra.gmra.mxu1 %v704_v8  ;;  %1697 = vmatprep.subr.bf16.mxu0 %v1887_v40 }
 0x141   :  { %1676 = vmatpush3.bf16.msra.mxu1 %v1832_v7  ;;  %1691 = vmatprep.mubr.msk.bf16.mxu1 %vm1888_vm0, %v1887_v40 }
 0x142   :  { %1677 = vmatprep.subr.bf16.mxu1 %v1887_v40 }
 0x143   :  { %1698 = vmatpush3.bf16.msra.mxu0 %v1833_v9 }
 0x144   :  { %1699 = vmatprep.subr.bf16.mxu0 %v1887_v40 }
 0x145   :  { %1678 = vmatpush3.bf16.msra.mxu1 %v1834_v10 }
 0x146   :  { %1679 = vmatprep.subr.bf16.mxu1 %v1887_v40 }
 0x147   :  { %1700 = vmatpush3.bf16.msra.mxu0 %v1835_v11 }
 0x148   :  { %1701 = vmatprep.subr.bf16.mxu0 %v1887_v40 }
 0x149   :  { %1680 = vmatpush3.bf16.msra.mxu1 %v1836_v12 }
 0x14a   :  { %1681 = vmatprep.subr.bf16.mxu1 %v1887_v40 }
 0x14b   :  { %1702 = vmatpush3.bf16.msra.mxu0 %v1837_v13 }
 0x14c   :  { %1703 = vmatprep.subr.bf16.mxu0 %v1887_v40 }
 0x14d   :  { %1682 = vmatpush3.bf16.msra.mxu1 %v1838_v14 }
 0x14e   :  { %1683 = vmatprep.subr.bf16.mxu1 %v1887_v40 }
 0x14f   :  { %1704 = vmatpush3.bf16.msra.mxu0 %v1839_v15 }
 0x150   :  { %1705 = vmatprep.subr.bf16.mxu0 %v1887_v40 }
 0x151   :  { %1684 = vmatpush3.bf16.msra.mxu1 %v1840_v16 }
 0x152   :  { %1685 = vmatprep.subr.bf16.mxu1 %v1887_v40 }
 0x153   :  { %1706 = vmatpush3.bf16.msra.mxu0 %v1841_v17 }
 0x154   :  { %1707 = vmatprep.subr.bf16.mxu0 %v1887_v40 }
 0x155   :  { %1686 = vmatpush3.bf16.msra.mxu1 %v1842_v18 }
 0x156   :  { %1687 = vmatprep.subr.bf16.mxu1 %v1887_v40 }
 0x157   :  { %1708 = vmatpush3.bf16.msra.mxu0 %v1843_v19 }
 0x158   :  { %1709 = vmatprep.subr.bf16.mxu0 %v1887_v40 }
 0x159   :  { %1688 = vmatpush3.bf16.msra.mxu1 %v1844_v20 }
 0x15a   :  { %1689 = vmatprep.subr.bf16.mxu1 %v1887_v40 }
 0x15b   :  { %1710 = vmatpush3.bf16.msra.mxu0 %v1845_v21 }
 0x15c   :  { %1735 = vmatprep.subr.bf16.mxu0 %v1887_v40 }
 0x15d   :  { %1690 = vmatpush3.bf16.msra.mxu1 %v1846_v22 }
 0x15e   :  { %1712 = vmatmul.mubr.bf16.vlgmr.msra.gmra.mxu0 %v1007_v23  ;;  %1715 = vmatprep.subr.bf16.mxu1 %v1887_v40 }
 0x15f   :  { %1751 = vmatprep.mubr.msk.bf16.mxu0 %vm1888_vm0, %v1887_v40  ;;  %1736 = vmatpush3.bf16.msra.mxu0 %v1855_v33 }
 0x160   :  { %1692 = vmatmul.mubr.bf16.vlgmr.msra.gmra.mxu1 %v899_v24  ;;  %1737 = vmatprep.subr.bf16.mxu0 %v1887_v40 }
 0x161   :  { %1731 = vmatprep.mubr.msk.bf16.mxu1 %vm1888_vm0, %v1887_v40  ;;  %1716 = vmatpush3.bf16.msra.mxu1 %v1847_v25 }
 0x162   :  { %1717 = vmatprep.subr.bf16.mxu1 %v1887_v40 }
 0x163   :  { %1738 = vmatpush3.bf16.msra.mxu0 %v1856_v34 }
 0x164   :  { %1739 = vmatprep.subr.bf16.mxu0 %v1887_v40 }
 0x165   :  { %1718 = vmatpush3.bf16.msra.mxu1 %v1848_v26 }
 0x166   :  { %1719 = vmatprep.subr.bf16.mxu1 %v1887_v40 }
 0x167   :  { %1740 = vmatpush3.bf16.msra.mxu0 %v1857_v35 }
 0x168   :  { %1741 = vmatprep.subr.bf16.mxu0 %v1887_v40 }
 0x169   :  { %1720 = vmatpush3.bf16.msra.mxu1 %v1849_v27 }
 0x16a   :  { %1721 = vmatprep.subr.bf16.mxu1 %v1887_v40 }
 0x16b   :  { %1742 = vmatpush3.bf16.msra.mxu0 %v1858_v36 }
 0x16c   :  { %1743 = vmatprep.subr.bf16.mxu0 %v1887_v40 }
 0x16d   :  { %1722 = vmatpush3.bf16.msra.mxu1 %v1850_v28 }
 0x16e   :  { %1723 = vmatprep.subr.bf16.mxu1 %v1887_v40 }
 0x16f   :  { %1744 = vmatpush3.bf16.msra.mxu0 %v1859_v37 }
 0x170   :  { %1745 = vmatprep.subr.bf16.mxu0 %v1887_v40 }
 0x171   :  { %1724 = vmatpush3.bf16.msra.mxu1 %v1851_v29 }
 0x172   :  { %1725 = vmatprep.subr.bf16.mxu1 %v1887_v40 }
 0x173   :  { %1746 = vmatpush3.bf16.msra.mxu0 %v1860_v38 }
 0x174   :  { %1747 = vmatprep.subr.bf16.mxu0 %v1887_v40 }
 0x175   :  { %1726 = vmatpush3.bf16.msra.mxu1 %v1852_v30 }
 0x176   :  { %1727 = vmatprep.subr.bf16.mxu1 %v1887_v40 }
 0x177   :  { %1748 = vmatpush3.bf16.msra.mxu0 %v1861_v63 }
 0x178   :  { %1749 = vmatprep.subr.bf16.mxu0 %v1887_v40 }
 0x179   :  { %1728 = vmatpush3.bf16.msra.mxu1 %v1853_v31 }
 0x17a   :  { %1729 = vmatprep.subr.bf16.mxu1 %v1887_v40  ;;  %v1495_v40 = vld [vmem:[%s2342_s9] ss:$0 sm:$0xff] }
 0x17b   :  { %1750 = vmatpush3.bf16.msra.mxu0 %v1862_v0 }
 0x17d   :  { %1730 = vmatpush3.bf16.msra.mxu1 %v1854_v32 }
 0x1fe   :  { %v876_v39 = vpop.f32.mrf.mxu0 }
 0x200   :  { %v788_v41 = vpop.f32.mrf.mxu1  ;;  %v1673_v42 = vpop.f32.mrf.mxu0 }
 0x201   :  { %v877_v49 = vadd.f32 %v876_v39, %v788_v41 }
 0x202   :  { %v1653_v43 = vpop.f32.mrf.mxu1  ;;  %v879_v44 = vpop.f32.mrf.mxu0 }
 0x204   :  { %v791_v45 = vpop.f32.mrf.mxu1  ;;  %v1674_v46 = vpop.f32.mrf.mxu0 }
 0x206   :  { %v1654_v47 = vpop.f32.mrf.mxu1 }
 0x21e   :  { %v1091_v48 = vpop.f32.mrf.mxu0 }
 0x220   :  { %v983_v50 = vpop.f32.mrf.mxu1  ;;  %v1713_v51 = vpop.f32.mrf.mxu0 }
 0x221   :  { %v989_v52 = vadd.f32 %v983_v50, %v877_v49 }
 0x222   :  { %v1693_v54 = vpop.f32.mrf.mxu1  ;;  %v1094_v55 = vpop.f32.mrf.mxu0 }
 0x223   :  { %v1097_v56 = vadd.f32 %v1091_v48, %v989_v52 }
 0x224   :  { %v986_v57 = vpop.f32.mrf.mxu1  ;;  %v1714_v58 = vpop.f32.mrf.mxu0 }
 0x225   :  { %v1105_v59 = vadd.f32 %v1485_v53, %v1097_v56 }
 0x226   :  { %v1694_v60 = vpop.f32.mrf.mxu1 }
 0x227   :  { %v1106_v61 = vmax.f32 %v1105_v59, 0.0 }
 0x229   :  { %v1107_v62 = vpack.c.bf16 %v1106_v61, %v1106_v61 }
 0x22b   :  { %1732 = vmatmul.mubr.bf16.vlgmr.msra.gmra.mxu1 %v1107_v62 }
 0x2eb   :  { %v1213_v2 = vpop.f32.mrf.mxu1 }
 0x2ec   :  { %v1214_v3 = vadd.f32 %v1486_v1, %v1213_v2 }
 0x2ed   :  { %v1733_v4 = vpop.f32.mrf.mxu1 }
 0x2ee   :  { %v1219_v5 = vmax.f32 %v1214_v3, 0.0 }
 0x2ef   :  { %v1216_v6 = vpop.f32.mrf.mxu1 }
 0x2f0   :  { %v1220_v7 = vpack.c.bf16 %v1219_v5, %v1219_v5 }
 0x2f1   :  { %v1734_v8 = vpop.f32.mrf.mxu1 }
 0x2f2   :  { %1752 = vmatmul.mubr.bf16.vlgmr.msra.gmra.mxu0 %v1220_v7 }
 0x3b2   :  { %v1326_v9 = vpop.f32.mrf.mxu0 }
 0x3b3   :  { %v1327_v10 = vadd.f32 %v1495_v40, %v1326_v9 }
 0x3b4   :  { %v1753_v11 = vpop.f32.mrf.mxu0 }
 0x3b5   :  { %1332 = vst [vmem:[#allocation2] sm:$0x3] %v1327_v10 }
 0x3b6   :  { %v1329_v12 = vpop.f32.mrf.mxu0 }
 0x3b7   :  { %1876 = shalt.err (!%p1873_p4)
}
 0x3b8   :  { %1342 = dma.vmem_to_hbm [thread:$0]  %s1340_s28, 32, %s2343_s10, [#allocation3]   ;;  %v1754_v13 = vpop.f32.mrf.mxu0 }
 0x3b9   :  { %1885 = dma.done.wait [#allocation3], 32  }
 0x3ba   :  { %1886 = vsyncadd [#allocation3], 4294967264 }
 0x3bb   :  { %1346 = vsyncpa [#allocation3], 1 }

</bundles_post_ra>
